<compile_context>
chip_gen: v5e
topology: v5e:2x2
jax: 0.10.0
libtpu: 0.0.40
codegen_flags: <defaults>
</compile_context>

<pallas_src>
import math

import jax
import jax.numpy as jnp
from jax.experimental import pallas as pl
from jax.experimental.pallas import tpu as pltpu


def _round_up(x, m):
    return (x + m - 1) // m * m


def _num_tensorcores():
    """Best-effort TensorCore count of the attached chip (v7x=2, v5e/v6e=1)."""
    try:
        kind = jax.devices()[0].device_kind.lower()
    except Exception:
        return 1
    return 2 if "v7" in kind else 1


# ---------------------------------------------------------------------------
# One-time parameter fusion (model init, NOT the per-call hot path).
# ---------------------------------------------------------------------------
def fuse_reduce_params(w_left, b_left, w_right, w_track,
                       *, weight_dtype=jnp.bfloat16):
    """Fuse [W_left; W_right; W_track] into one (K, 5*S_pad) matrix whose gate
    columns are 128-lane aligned, stored in bf16 (MXU-native); bias likewise
    padded (kept f32)."""
    S = w_left.shape[0]
    T = w_track.shape[0]
    K = 2 * S + T
    S_pad = _round_up(S, 128)

    w_cat = jnp.concatenate([w_left, w_right, w_track], axis=0)          # (K, 5S)
    w_pad = jnp.pad(w_cat.reshape(K, 5, S), ((0, 0), (0, 0), (0, S_pad - S)))
    w_pad = w_pad.reshape(K, 5 * S_pad).astype(weight_dtype)

    b_row = jnp.asarray(b_left, jnp.float32).reshape(5, S)
    b_pad = jnp.pad(b_row, ((0, 0), (0, S_pad - S))).reshape(1, 5 * S_pad)

    return dict(w=w_pad, b=b_pad, S=S, T=T, S_pad=S_pad)


# ---------------------------------------------------------------------------
# Kernel
# ---------------------------------------------------------------------------
def _reduce_kernel(hcat_ref, cl_ref, cr_ref, w_ref, b_ref, out_ref):
    """Fused TreeLSTM REDUCE tile.

    gates = [h_l | h_r | h_t] @ W_cat + b   (single MXU push, K = 2S+T).
    Gate columns are laid out with stride S_pad (multiple of 128), so every
    gate slice and both halves of the fused [c | h] output store are whole
    lane-tile selections (no masked stores / lane rotates).
    """
    S_pad = cl_ref.shape[1]

    h = hcat_ref[...].astype(w_ref.dtype)            # bf16 operands for the MXU
    gates = jnp.dot(h, w_ref[...], preferred_element_type=jnp.float32)
    gates = gates + b_ref[...]                       # (1, 5*S_pad) broadcasts

    i_gate = jax.nn.sigmoid(gates[:, 0 * S_pad:1 * S_pad])
    fl_gate = jax.nn.sigmoid(gates[:, 1 * S_pad:2 * S_pad])
    fr_gate = jax.nn.sigmoid(gates[:, 2 * S_pad:3 * S_pad])
    o_gate = jax.nn.sigmoid(gates[:, 3 * S_pad:4 * S_pad])
    cell_inp = jnp.tanh(gates[:, 4 * S_pad:5 * S_pad])

    # TODO(synk): dropout on i_gate*cell_inp (training mode) is omitted — this
    # matches Reduce.forward eval semantics (use_dropout=False).
    c_t = fl_gate * cl_ref[...] + fr_gate * cr_ref[...] + i_gate * cell_inp
    out_ref[:, :S_pad] = c_t                         # fused [c | h] output,
    out_ref[:, S_pad:] = o_gate * jnp.tanh(c_t)      # both halves lane-dense


# ---------------------------------------------------------------------------
# Per-call wrapper
# ---------------------------------------------------------------------------
def reduce_forward(left, right, tracking, fused, *, block_b=None):
    """left/right: (B, 2S); tracking: (B, 2T). Returns (B, 2S) = [c_t | h_t]."""
    w_pad, b_pad = fused["w"], fused["b"]
    S, T, S_pad = fused["S"], fused["T"], fused["S_pad"]
    B = left.shape[0]
    K = 2 * S + T
    G = 5 * S_pad

    # Cheap XLA layout work kept out of the kernel: c/h split + h concat.
    c_left, h_left = left[:, :S], left[:, S:]
    c_right, h_right = right[:, :S], right[:, S:]
    h_track = tracking[:, T:]
    h_cat = jnp.concatenate([h_left, h_right, h_track], axis=1)        # (B, K)
    if S_pad != S:
        colpad = ((0, 0), (0, S_pad - S))
        c_left = jnp.pad(c_left, colpad)                               # (B, S_pad)
        c_right = jnp.pad(c_right, colpad)

    # Batch tiling: one big tile per TensorCore, no explicit batch padding —
    # grid = cdiv(B, block_b) and Pallas masks the ragged tail block.
    if block_b is None:
        block_b = min(512, _round_up(pl.cdiv(B, _num_tensorcores()), 8))
    block_b = min(block_b, _round_up(B, 8))
    grid = (pl.cdiv(B, block_b),)

    row_spec = lambda cols: pl.BlockSpec((block_b, cols), lambda i: (i, 0))
    const_spec = lambda shape: pl.BlockSpec(shape, lambda i: (0, 0))

    cost = pl.CostEstimate(
        flops=2 * B * K * G,
        transcendentals=6 * B * S_pad,
        bytes_accessed=4 * B * (K + 4 * S_pad) + 2 * w_pad.size + 4 * G,
    )

    out = pl.pallas_call(
        _reduce_kernel,
        out_shape=jax.ShapeDtypeStruct((B, 2 * S_pad), jnp.float32),
        grid=grid,
        in_specs=[
            row_spec(K),             # h_cat
            row_spec(S_pad),         # c_left  (lane-padded)
            row_spec(S_pad),         # c_right (lane-padded)
            const_spec((K, G)),      # fused bf16 weight: VMEM-resident across grid
            const_spec((1, G)),      # fused bias
        ],
        out_specs=row_spec(2 * S_pad),
        compiler_params=pltpu.CompilerParams(
            dimension_semantics=("parallel",)),      # megacore split on v7x
        cost_estimate=cost,
    )(h_cat, c_left, c_right, w_pad, b_pad)

    if S_pad == S:
        return out                                    # already (B, 2S) = [c | h]
    # Strip lane padding back to the caller's bundled (B, 2S) = [c | h] layout.
    return jnp.concatenate([out[:, :S], out[:, S_pad:S_pad + S]], axis=1)


# ---------------------------------------------------------------------------
# Pure-JAX f32 reference mirroring Reduce.forward / treelstm (eval mode).
# ---------------------------------------------------------------------------
def reduce_reference(left, right, tracking, w_left, b_left, w_right, w_track):
    S = left.shape[1] // 2
    T = tracking.shape[1] // 2
    c_l, h_l = left[:, :S], left[:, S:]
    c_r, h_r = right[:, :S], right[:, S:]
    h_t = tracking[:, T:]
    gates = h_l @ w_left + b_left + h_r @ w_right + h_t @ w_track
    i_g = jax.nn.sigmoid(gates[:, 0 * S:1 * S])
    fl = jax.nn.sigmoid(gates[:, 1 * S:2 * S])
    fr = jax.nn.sigmoid(gates[:, 2 * S:3 * S])
    o_g = jax.nn.sigmoid(gates[:, 3 * S:4 * S])
    ci = jnp.tanh(gates[:, 4 * S:5 * S])
    c_t = fl * c_l + fr * c_r + i_g * ci
    h_out = o_g * jnp.tanh(c_t)
    return jnp.concatenate([c_t, h_out], axis=1)


if __name__ == "__main__":
    B = 256          # batch of nodes to REDUCE
    S = 32           # model state size
    T = 16           # tracker hidden size

    key = jax.random.PRNGKey(0)
    k_l, k_r, k_t, k_wl, k_wr, k_wt = jax.random.split(key, 6)

    # Bundled inputs: (B, 2*S) = [c | h]
    left = jax.random.normal(k_l, (B, 2 * S), dtype=jnp.float32)
    right = jax.random.normal(k_r, (B, 2 * S), dtype=jnp.float32)
    tracking = jax.random.normal(k_t, (B, 2 * T), dtype=jnp.float32)

    # He-Kaiming init: scale = sqrt(4 / (fan_out + fan_in)); torch weight is
    # (5S, in), stored here transposed as (in, 5S).
    def he(k, fan_in, fan_out):
        scale = math.sqrt(4.0 / (fan_out + fan_in))
        return scale * jax.random.normal(k, (fan_in, fan_out), dtype=jnp.float32)

    w_left = he(k_wl, S, 5 * S)
    b_left = jnp.zeros((5 * S,), dtype=jnp.float32)     # ZeroInitializer
    w_right = he(k_wr, S, 5 * S)                        # bias=False
    w_track = he(k_wt, T, 5 * S)                        # bias=False

    # One-time weight fusion (per-call weight concat removed from hot path).
    fused = fuse_reduce_params(w_left, b_left, w_right, w_track)

    out = reduce_forward(left, right, tracking, fused)
    out = jax.block_until_ready(out)
    assert out.shape == (B, 2 * S)

    # Tight check vs a reference using the same bf16-rounded weights / h inputs
    # (kernel keeps f32 accumulation and f32 c-state math).
    q = lambda x: x.astype(jnp.bfloat16).astype(jnp.float32)

    def q_h(bundled, size):
        return jnp.concatenate([bundled[:, :size], q(bundled[:, size:])], axis=1)

    ref_q = reduce_reference(q_h(left, S), q_h(right, S), q_h(tracking, T),
                             q(w_left), b_left, q(w_right), q(w_track))
    assert jnp.allclose(out, ref_q, atol=1e-2, rtol=1e-2), "mismatch vs bf16 ref"

    # Loose check vs exact f32 module semantics (bf16 quantization of weights
    # and h contributes ~1e-2 absolute error at these sizes).
    ref32 = reduce_reference(left, right, tracking,
                             w_left, b_left, w_right, w_track)
    assert jnp.allclose(out, ref32, atol=1.5e-1, rtol=5e-2), "mismatch vs f32 ref"

    # `unbundle` equivalent: tuple of B rows, each (1, 2S) = [c_t | h_t]
    unbundled = tuple(out[i:i + 1] for i in range(B))
    assert len(unbundled) == B and unbundled[0].shape == (1, 2 * S)

    print("KERNEL_OK")
</pallas_src>

<mosaic_0001>
module attributes {stable_mosaic.version = 11 : i64} {
  func.func @_reduce_kernel(%arg0: i32, %arg1: memref<256x80xf32, #tpu.memory_space<vmem>>, %arg2: memref<256x128xf32, #tpu.memory_space<vmem>>, %arg3: memref<256x128xf32, #tpu.memory_space<vmem>>, %arg4: memref<80x640xbf16, #tpu.memory_space<vmem>>, %arg5: memref<1x640xf32, #tpu.memory_space<vmem>>, %arg6: memref<256x256xf32, #tpu.memory_space<vmem>>) attributes {dimension_semantics = [#tpu.dimension_semantics<parallel>], iteration_bounds = array<i64: 1>, scalar_prefetch = 0 : i64, scratch_operands = 0 : i64, tpu.core_type = #tpu.core_type<tc>, window_params = [{transform_indices = @transform_0, window_bounds = array<i64: 256, 80>}, {transform_indices = @transform_1, window_bounds = array<i64: 256, 128>}, {transform_indices = @transform_2, window_bounds = array<i64: 256, 128>}, {pipeline_mode = #tpu.pipeline_mode<synchronous>, transform_indices = @transform_3, window_bounds = array<i64: 80, 640>}, {pipeline_mode = #tpu.pipeline_mode<synchronous>, transform_indices = @transform_4, window_bounds = array<i64: 1, 640>}, {transform_indices = @transform_5, window_bounds = array<i64: 256, 256>}]} {
    %c0 = arith.constant 0 : index
    %c0_0 = arith.constant 0 : index
    %0 = vector.load %arg1[%c0, %c0_0] : memref<256x80xf32, #tpu.memory_space<vmem>>, vector<256x80xf32>
    %1 = arith.truncf %0 : vector<256x80xf32> to vector<256x80xbf16>
    %c0_1 = arith.constant 0 : index
    %c0_2 = arith.constant 0 : index
    %2 = vector.load %arg4[%c0_1, %c0_2] : memref<80x640xbf16, #tpu.memory_space<vmem>>, vector<80x640xbf16>
    %cst = arith.constant dense<0.000000e+00> : vector<256x640xf32>
    %3 = tpu.matmul %1, %2, %cst {dimension_numbers = #tpu.dot_dimension_numbers<[1], [0], [0], [1], [0, 0, 1, 1], [], []>} : vector<256x80xbf16>, vector<80x640xbf16>, vector<256x640xf32> -> vector<256x640xf32>
    %c0_3 = arith.constant 0 : index
    %c0_4 = arith.constant 0 : index
    %4 = vector.load %arg5[%c0_3, %c0_4] : memref<1x640xf32, #tpu.memory_space<vmem>>, vector<1x640xf32>
    %5 = vector.broadcast %4 : vector<1x640xf32> to vector<256x640xf32>
    %6 = arith.addf %3, %5 : vector<256x640xf32>
    %7 = vector.extract_strided_slice %6 {offsets = [0, 0], sizes = [256, 128], strides = [1, 1]} : vector<256x640xf32> to vector<256x128xf32>
    %8 = arith.negf %7 : vector<256x128xf32>
    %9 = math.exp %8 : vector<256x128xf32>
    %cst_5 = arith.constant 1.000000e+00 : f32
    %10 = vector.broadcast %cst_5 : f32 to vector<256x128xf32>
    %11 = arith.addf %10, %9 : vector<256x128xf32>
    %12 = arith.divf %10, %11 : vector<256x128xf32>
    %13 = vector.extract_strided_slice %6 {offsets = [0, 128], sizes = [256, 128], strides = [1, 1]} : vector<256x640xf32> to vector<256x128xf32>
    %14 = arith.negf %13 : vector<256x128xf32>
    %15 = math.exp %14 : vector<256x128xf32>
    %cst_6 = arith.constant 1.000000e+00 : f32
    %16 = vector.broadcast %cst_6 : f32 to vector<256x128xf32>
    %17 = arith.addf %16, %15 : vector<256x128xf32>
    %18 = arith.divf %16, %17 : vector<256x128xf32>
    %19 = vector.extract_strided_slice %6 {offsets = [0, 256], sizes = [256, 128], strides = [1, 1]} : vector<256x640xf32> to vector<256x128xf32>
    %20 = arith.negf %19 : vector<256x128xf32>
    %21 = math.exp %20 : vector<256x128xf32>
    %cst_7 = arith.constant 1.000000e+00 : f32
    %22 = vector.broadcast %cst_7 : f32 to vector<256x128xf32>
    %23 = arith.addf %22, %21 : vector<256x128xf32>
    %24 = arith.divf %22, %23 : vector<256x128xf32>
    %25 = vector.extract_strided_slice %6 {offsets = [0, 384], sizes = [256, 128], strides = [1, 1]} : vector<256x640xf32> to vector<256x128xf32>
    %26 = arith.negf %25 : vector<256x128xf32>
    %27 = math.exp %26 : vector<256x128xf32>
    %cst_8 = arith.constant 1.000000e+00 : f32
    %28 = vector.broadcast %cst_8 : f32 to vector<256x128xf32>
    %29 = arith.addf %28, %27 : vector<256x128xf32>
    %30 = arith.divf %28, %29 : vector<256x128xf32>
    %31 = vector.extract_strided_slice %6 {offsets = [0, 512], sizes = [256, 128], strides = [1, 1]} : vector<256x640xf32> to vector<256x128xf32>
    %32 = math.tanh %31 : vector<256x128xf32>
    %c0_9 = arith.constant 0 : index
    %c0_10 = arith.constant 0 : index
    %33 = vector.load %arg2[%c0_9, %c0_10] : memref<256x128xf32, #tpu.memory_space<vmem>>, vector<256x128xf32>
    %34 = arith.mulf %18, %33 : vector<256x128xf32>
    %c0_11 = arith.constant 0 : index
    %c0_12 = arith.constant 0 : index
    %35 = vector.load %arg3[%c0_11, %c0_12] : memref<256x128xf32, #tpu.memory_space<vmem>>, vector<256x128xf32>
    %36 = arith.mulf %24, %35 : vector<256x128xf32>
    %37 = arith.addf %34, %36 : vector<256x128xf32>
    %38 = arith.mulf %12, %32 : vector<256x128xf32>
    %39 = arith.addf %37, %38 : vector<256x128xf32>
    %c0_13 = arith.constant 0 : index
    %c0_14 = arith.constant 0 : index
    %40 = vector.load %arg6[%c0_13, %c0_14] : memref<256x256xf32, #tpu.memory_space<vmem>>, vector<256x128xf32>
    tpu.vector_store %arg6[%c0_13, %c0_14], %39 {strides = array<i32>} : memref<256x256xf32, #tpu.memory_space<vmem>>, vector<256x128xf32>,
    %41 = math.tanh %39 : vector<256x128xf32>
    %42 = arith.mulf %30, %41 : vector<256x128xf32>
    %c0_15 = arith.constant 0 : index
    %c128 = arith.constant 128 : index
    %43 = vector.load %arg6[%c0_15, %c128] : memref<256x256xf32, #tpu.memory_space<vmem>>, vector<256x128xf32>
    tpu.vector_store %arg6[%c0_15, %c128], %42 {strides = array<i32>} : memref<256x256xf32, #tpu.memory_space<vmem>>, vector<256x128xf32>,
    return
  }
  func.func @transform_0(%arg0: i32) -> (i32, i32) {
    %c0_i32 = arith.constant 0 : i32
    %c0_i32_0 = arith.constant 0 : i32
    return %arg0, %c0_i32 : i32, i32
  }
  func.func @transform_1(%arg0: i32) -> (i32, i32) {
    %c0_i32 = arith.constant 0 : i32
    %c0_i32_0 = arith.constant 0 : i32
    return %arg0, %c0_i32 : i32, i32
  }
  func.func @transform_2(%arg0: i32) -> (i32, i32) {
    %c0_i32 = arith.constant 0 : i32
    %c0_i32_0 = arith.constant 0 : i32
    return %arg0, %c0_i32 : i32, i32
  }
  func.func @transform_3(%arg0: i32) -> (i32, i32) {
    %c0_i32 = arith.constant 0 : i32
    %c0_i32_0 = arith.constant 0 : i32
    %c0_i32_1 = arith.constant 0 : i32
    return %c0_i32, %c0_i32_0 : i32, i32
  }
  func.func @transform_4(%arg0: i32) -> (i32, i32) {
    %c0_i32 = arith.constant 0 : i32
    %c0_i32_0 = arith.constant 0 : i32
    %c0_i32_1 = arith.constant 0 : i32
    return %c0_i32, %c0_i32_0 : i32, i32
  }
  func.func @transform_5(%arg0: i32) -> (i32, i32) {
    %c0_i32 = arith.constant 0 : i32
    %c0_i32_0 = arith.constant 0 : i32
    return %arg0, %c0_i32 : i32, i32
  }
}

</mosaic_0001>

<bundles_post_ra>
// kernel: tpu_custom_call.1
= control target key start
LH: loop header
LB: loop body
LE: loop exit
PB: predicated region body
PF: predicated region fallthrough
CT: control target
= control target key end

     0   :  { %10 = vsyncpa [#allocation3], 0  ;;  %s8159_s0 = inlined_call_operand.vmem [shape: f32[256,80], index: 0, kind: input, shape index: {}]   ;;  %s8160_s1 = inlined_call_operand.vmem [shape: f32[256,128], index: 1, kind: input, shape index: {}]   ;;  %s8161_s2 = inlined_call_operand.hbm [shape: f32[256,128], index: 2, kind: input, shape index: {}]   ;;  %s8162_s3 = inlined_call_operand.hbm [shape: bf16[80,640], index: 3, kind: input, shape index: {}]   ;;  %s8163_s4 = inlined_call_operand.vmem [shape: f32[1,640], index: 4, kind: input, shape index: {}]   ;;  %s8164_s5 = inlined_call_operand.hbm [shape: f32[256,256], index: 5, kind: output, shape index: {}]  }
   0x1   :  { %11 = vsyncpa [#allocation6], 0 }
   0x2   :  { %12 = vsyncpa [#allocation4], 0  ;;  %s21_s20 = sshll.u32 %s8161_s2, 4  ;;  %s4679_s21 = smov [#allocation2]   ;;  %s22_s20 = int_to_ptr.hbm [resolvable:$true] %s21_s20 }
   0x3   :  { %s23_s22 = sshll.u32 %s4679_s21, 4  ;;  %s34_s25 = sshll.u32 %s8162_s3, 4  ;;  %s24_s22 = int_to_ptr.vmem [resolvable:$true] %s23_s22  ;;  %s35_s25 = int_to_ptr.hbm [resolvable:$true] %s34_s25 }
   0x4   :  { %s4680_s26 = smov 128   ;;  %s4681_s27 = smov 8  }
   0x5   :  { %29 = dma.hbm_to_vmem [thread:$0]  %s22_s20, 4096, %s24_s22, [#allocation3], %s4680_s26, %s4680_s26, %s4681_s27  }
   0x6   :  { %s4682_s28 = smov [#allocation5]   ;;  %s4683_s30 = smov 320  }
   0x7   :  { %s36_s29 = sshll.u32 %s4682_s28, 4  ;;  %s4684_s6 = smov 20   ;;  %s37_s29 = int_to_ptr.vmem [resolvable:$true] %s36_s29 }
   0x8   :  { %42 = dma.hbm_to_vmem [thread:$0]  %s35_s25, 3200, %s37_s29, [#allocation6], %s4683_s30, %s4683_s30, %s4684_s6  }
   0x9   :  { %4673 = dma.done.wait [#allocation3], 4096  }
   0xa   :  { %4674 = vsyncadd [#allocation3], 4294963200 }
   0xb   :  { %4675 = dma.done.wait [#allocation6], 3200  }
   0xc   :  { %4676 = vsyncadd [#allocation6], 4294964096  ;;  %v3686_v0 = vld [vmem:[#allocation5 + $0xa0] sm:$0xf]  ;;  %v3934_v1 = vld [vmem:[#allocation5 + $0xb0] sm:$0xf0] }
   0xd   :  { %v3666_v2 = vld [vmem:[#allocation5 + $0x78] sm:$0xf]  ;;  %v3687_v3 = vor.u32 %v3934_v1, %v3686_v0  ;;  %v3929_v4 = vld [vmem:[#allocation5 + $0x88] sm:$0xf0]  ;;  %v3646_v6 = vld [vmem:[#allocation5 + $0x50] sm:$0xf] }
   0xe   :  { %v3667_v5 = vor.u32 %v3929_v4, %v3666_v2  ;;  %v3924_v7 = vld [vmem:[#allocation5 + $0x60] sm:$0xf0]  ;;  %v3626_v9 = vld [vmem:[#allocation5 + $0x28] sm:$0xf]  ;;  %v3919_v10 = vld [vmem:[#allocation5 + $0x38] sm:$0xf0] }
   0xf   :  { %326 = vmatpush.bf16.msra.mxu0 %v3687_v3  ;;  %3937 = vmatpush.bf16.msra.mxu1 %v3687_v3  ;;  %v3647_v8 = vor.u32 %v3924_v7, %v3646_v6  ;;  %v3627_v11 = vor.u32 %v3919_v10, %v3626_v9  ;;  %v3606_v12 = vld [vmem:[#allocation5] sm:$0xf]  ;;  %v3914_v13 = vld [vmem:[#allocation5 + $0x10] sm:$0xf0]  ;;  %v55_v15 = vld [vmem:[%s8159_s0 + $0x8] sm:$0xff]  ;;  %vm274_vm0 = vcmask 654336  }
  0x10   :  { %3938 = vmatpush.bf16.msra.mxu2 %v3687_v3  ;;  %3939 = vmatpush.bf16.msra.mxu3 %v3687_v3  ;;  %v54_v14 = vld [vmem:[%s8159_s0] sm:$0xff]  ;;  %v63_v17 = vld [vmem:[%s8159_s0 + $0x48] sm:$0xff]  ;;  %v3935_v19 = vld [vmem:[#allocation5 + $0xb8] sm:$0xf0]  ;;  %v3607_v22 = vor.u32 %v3914_v13, %v3606_v12  ;;  %s3590_s24 = sshll.u32 %s8164_s5, 4  ;;  %s4686_s25 = smov 256   ;;  %s3591_s24 = int_to_ptr.hbm [resolvable:$true] %s3590_s24 }
  0x11   :  { %v62_v16 = vld [vmem:[%s8159_s0 + $0x40] sm:$0xff]  ;;  %v3694_v18 = vld [vmem:[#allocation5 + $0xa8] sm:$0xf]  ;;  %v3688_v21 = vld [vmem:[#allocation5 + $0xb4] sm:$0xf0]  ;;  %v4748_v34 = vpack.c.bf16 %v55_v15, %v54_v14  ;;  %s4687_s26 = smov 16  }
  0x12   :  { %v3932_v20 = vld [vmem:[#allocation5 + $0xa4] sm:$0xf]  ;;  %v71_v24 = vld [vmem:[%s8159_s0 + $0x88] sm:$0xff]  ;;  %v3674_v27 = vld [vmem:[#allocation5 + $0x80] sm:$0xf]  ;;  %v3695_v29 = vor.u32 %v3935_v19, %v3694_v18  ;;  %v4750_v35 = vpack.c.bf16 %v63_v17, %v62_v16 }
  0x13   :  { %327 = vmatpush.bf16.msra.mxu0 %v3667_v5  ;;  %3940 = vmatpush.bf16.msra.mxu1 %v3667_v5  ;;  %v70_v23 = vld [vmem:[%s8159_s0 + $0x80] sm:$0xff]  ;;  %v79_v26 = vld [vmem:[%s8159_s0 + $0xc8] sm:$0xff]  ;;  %v3691_v30 = vor.u32 %v3932_v20, %v3688_v21  ;;  %v3702_v32 = vld [vmem:[#allocation5 + $0xb0] sm:$0xf] }
  0x14   :  { %3941 = vmatpush.bf16.msra.mxu2 %v3667_v5  ;;  %3942 = vmatpush.bf16.msra.mxu3 %v3667_v5  ;;  %v78_v25 = vld [vmem:[%s8159_s0 + $0xc0] sm:$0xff]  ;;  %v3933_v28 = vld [vmem:[#allocation5 + $0xac] sm:$0xf]  ;;  %v3930_v36 = vld [vmem:[#allocation5 + $0x90] sm:$0xf0]  ;;  %v4752_v39 = vpack.c.bf16 %v71_v24, %v70_v23 }
  0x15   :  { %v3696_v31 = vld [vmem:[#allocation5 + $0xbc] sm:$0xf0]  ;;  %v3936_v33 = vld [vmem:[#allocation5 + $0xc0] sm:$0xf0]  ;;  %v3927_v37 = vld [vmem:[#allocation5 + $0x7c] sm:$0xf]  ;;  %v4754_v40 = vpack.c.bf16 %v79_v26, %v78_v25  ;;  %v3675_v43 = vor.u32 %v3930_v36, %v3674_v27 }
  0x16   :  { %v3668_v38 = vld [vmem:[#allocation5 + $0x8c] sm:$0xf0]  ;;  %v3699_v41 = vor.u32 %v3933_v28, %v3696_v31  ;;  %v3703_v42 = vor.u32 %v3936_v33, %v3702_v32  ;;  %v3928_v45 = vld [vmem:[#allocation5 + $0x84] sm:$0xf]  ;;  %v3676_v46 = vld [vmem:[#allocation5 + $0x94] sm:$0xf0] }
  0x17   :  { %328 = vmatpush.bf16.msra.mxu0 %v3647_v8  ;;  %3943 = vmatpush.bf16.msra.mxu1 %v3647_v8  ;;  %v3671_v44 = vor.u32 %v3927_v37, %v3668_v38  ;;  %v3654_v47 = vld [vmem:[#allocation5 + $0x58] sm:$0xf]  ;;  %v3925_v48 = vld [vmem:[#allocation5 + $0x68] sm:$0xf0]  ;;  %v3922_v49 = vld [vmem:[#allocation5 + $0x54] sm:$0xf]  ;;  %v3679_v51 = vor.u32 %v3928_v45, %v3676_v46 }
  0x18   :  { %3944 = vmatpush.bf16.msra.mxu2 %v3647_v8  ;;  %3945 = vmatpush.bf16.msra.mxu3 %v3647_v8  ;;  %v3648_v50 = vld [vmem:[#allocation5 + $0x64] sm:$0xf0]  ;;  %v3634_v52 = vld [vmem:[#allocation5 + $0x30] sm:$0xf]  ;;  %v3923_v53 = vld [vmem:[#allocation5 + $0x5c] sm:$0xf]  ;;  %v3655_v54 = vor.u32 %v3925_v48, %v3654_v47 }
  0x19   :  { %v3651_v55 = vor.u32 %v3922_v49, %v3648_v50  ;;  %v3656_v56 = vld [vmem:[#allocation5 + $0x6c] sm:$0xf0]  ;;  %v3682_v57 = vld [vmem:[#allocation5 + $0x88] sm:$0xf]  ;;  %v3931_v58 = vld [vmem:[#allocation5 + $0x98] sm:$0xf0] }
  0x1a   :  { %v3920_v59 = vld [vmem:[#allocation5 + $0x40] sm:$0xf0]  ;;  %v3683_v60 = vor.u32 %v3931_v58, %v3682_v57  ;;  %v3917_v61 = vld [vmem:[#allocation5 + $0x2c] sm:$0xf]  ;;  %v3628_v62 = vld [vmem:[#allocation5 + $0x3c] sm:$0xf0]  ;;  %v3659_v63 = vor.u32 %v3923_v53, %v3656_v56 }
  0x1b   :  { %329 = vmatpush.bf16.msra.mxu0 %v3627_v11  ;;  %3946 = vmatpush.bf16.msra.mxu1 %v3627_v11  ;;  %v3635_v0 = vor.u32 %v3920_v59, %v3634_v52  ;;  %v3631_v1 = vor.u32 %v3917_v61, %v3628_v62  ;;  %v56_v2 = vld [vmem:[%s8159_s0 + $0x10] sm:$0xff]  ;;  %v57_v3 = vld [vmem:[%s8159_s0 + $0x18] sm:$0xff]  ;;  %v3614_v14 = vld [vmem:[#allocation5 + $0x8] sm:$0xf] }
  0x1c   :  { %3947 = vmatpush.bf16.msra.mxu2 %v3627_v11  ;;  %3948 = vmatpush.bf16.msra.mxu3 %v3627_v11  ;;  %v64_v4 = vld [vmem:[%s8159_s0 + $0x50] sm:$0xff]  ;;  %v65_v5 = vld [vmem:[%s8159_s0 + $0x58] sm:$0xff]  ;;  %v4788_v10 = vpack.c.bf16 %v57_v3, %v56_v2  ;;  %v3636_v18 = vld [vmem:[#allocation5 + $0x44] sm:$0xf0] }
  0x1d   :  { %v72_v6 = vld [vmem:[%s8159_s0 + $0x90] sm:$0xff]  ;;  %v73_v7 = vld [vmem:[%s8159_s0 + $0x98] sm:$0xff]  ;;  %v4790_v11 = vpack.c.bf16 %v65_v5, %v64_v4  ;;  %v3662_v19 = vld [vmem:[#allocation5 + $0x60] sm:$0xf] }
  0x1e   :  { %v80_v8 = vld [vmem:[%s8159_s0 + $0xd0] sm:$0xff]  ;;  %v81_v9 = vld [vmem:[%s8159_s0 + $0xd8] sm:$0xff]  ;;  %v4792_v12 = vpack.c.bf16 %v73_v7, %v72_v6  ;;  %v3921_v24 = vld [vmem:[#allocation5 + $0x48] sm:$0xf0] }
  0x1f   :  { %330 = vmatpush.bf16.msra.mxu0 %v3607_v22  ;;  %3949 = vmatpush.bf16.msra.mxu1 %v3607_v22  ;;  %v4794_v13 = vpack.c.bf16 %v81_v9, %v80_v8  ;;  %v3915_v15 = vld [vmem:[#allocation5 + $0x18] sm:$0xf0]  ;;  %v3918_v16 = vld [vmem:[#allocation5 + $0x34] sm:$0xf]  ;;  %v3642_v23 = vld [vmem:[#allocation5 + $0x38] sm:$0xf] }
  0x20   :  { %3950 = vmatpush.bf16.msra.mxu2 %v3607_v22  ;;  %3951 = vmatpush.bf16.msra.mxu3 %v3607_v22  ;;  %v3615_v17 = vor.u32 %v3915_v15, %v3614_v14  ;;  %v3926_v20 = vld [vmem:[#allocation5 + $0x70] sm:$0xf0]  ;;  %v3639_v21 = vor.u32 %v3918_v16, %v3636_v18  ;;  %v3912_v25 = vld [vmem:[#allocation5 + $0x4] sm:$0xf]  ;;  %v3608_v26 = vld [vmem:[#allocation5 + $0x14] sm:$0xf0] }
  0x21   :  { %v3663_v22 = vor.u32 %v3926_v20, %v3662_v19  ;;  %v3913_v27 = vld [vmem:[#allocation5 + $0xc] sm:$0xf]  ;;  %v3616_v28 = vld [vmem:[#allocation5 + $0x1c] sm:$0xf0]  ;;  %v3622_v32 = vld [vmem:[#allocation5 + $0x10] sm:$0xf] }
  0x22   :  { %3704 = vmatmul.msk.bf16.vlgmr.msra.gmra.mxu0 %vm274_vm0, %v4748_v34  ;;  %3708 = vmatmul.msk.bf16.vlgmr.msra.gmra.mxu1 %vm274_vm0, %v4750_v35  ;;  %v3619_v31 = vor.u32 %v3913_v27, %v3616_v28  ;;  %v3916_v33 = vld [vmem:[#allocation5 + $0x20] sm:$0xf0]  ;;  %v59_v37 = vld [vmem:[%s8159_s0 + $0x28] sm:$0xff]  ;;  %v61_v52 = vld [vmem:[%s8159_s0 + $0x38] sm:$0xff] }
  0x23   :  { %415 = vmatpush.bf16.msrb.mxu1 %v3691_v30  ;;  %3712 = vmatmul.msk.bf16.vlgmr.msra.gmra.mxu2 %vm274_vm0, %v4752_v39  ;;  %v3611_v30 = vor.u32 %v3912_v25, %v3608_v26  ;;  %v58_v36 = vld [vmem:[%s8159_s0 + $0x20] sm:$0xff]  ;;  %v83_v46 = vld [vmem:[%s8159_s0 + $0xe8] sm:$0xff]  ;;  %v68_v53 = vld [vmem:[%s8159_s0 + $0x70] sm:$0xff] }
  0x24   :  { %504 = vmatpush.bf16.msrb.mxu2 %v3695_v29  ;;  %3716 = vmatmul.msk.bf16.vlgmr.msra.gmra.mxu3 %vm274_vm0, %v4754_v40  ;;  %v3643_v29 = vor.u32 %v3921_v24, %v3642_v23  ;;  %v66_v38 = vld [vmem:[%s8159_s0 + $0x60] sm:$0xff]  ;;  %v88_v47 = vpack.c.bf16 %v59_v37, %v58_v36  ;;  %v77_v56 = vld [vmem:[%s8159_s0 + $0xb8] sm:$0xff]  ;;  %v84_v57 = vld [vmem:[%s8159_s0 + $0xf0] sm:$0xff] }
  0x25   :  { %593 = vmatpush.bf16.msrb.mxu3 %v3699_v41  ;;  %682 = vmatpush.bf16.msrb.mxu0 %v3703_v42  ;;  %v67_v41 = vld [vmem:[%s8159_s0 + $0x68] sm:$0xff]  ;;  %v74_v42 = vld [vmem:[%s8159_s0 + $0xa0] sm:$0xff]  ;;  %v85_v58 = vld [vmem:[%s8159_s0 + $0xf8] sm:$0xff] }
  0x26   :  { %v82_v45 = vld [vmem:[%s8159_s0 + $0xe0] sm:$0xff]  ;;  %v4828_v48 = vpack.c.bf16 %v67_v41, %v66_v38  ;;  %v4869_v62 = vpack.c.bf16 %v85_v58, %v84_v57 }
  0x27   :  { %416 = vmatpush.bf16.msrb.mxu1 %v3671_v44  ;;  %v75_v44 = vld [vmem:[%s8159_s0 + $0xa8] sm:$0xff]  ;;  %v4832_v50 = vpack.c.bf16 %v83_v46, %v82_v45 }
  0x28   :  { %505 = vmatpush.bf16.msrb.mxu2 %v3675_v43  ;;  %v3623_v43 = vor.u32 %v3916_v33, %v3622_v32  ;;  %v4830_v49 = vpack.c.bf16 %v75_v44, %v74_v42  ;;  %8195 = vst [vmem:[#allocation12_spill] sm:$0xff] %v4869_v62 }
  0x29   :  { %594 = vmatpush.bf16.msrb.mxu3 %v3679_v51  ;;  %683 = vmatpush.bf16.msrb.mxu0 %v3683_v60  ;;  %8194 = vst [vmem:[#allocation11_spill] sm:$0xff] %v4832_v50  ;;  %v60_v51 = vld [vmem:[%s8159_s0 + $0x30] sm:$0xff] }
  0x2a   :  { %v89_v59 = vpack.c.bf16 %v61_v52, %v60_v51 }
  0x2b   :  { %417 = vmatpush.bf16.msrb.mxu1 %v3651_v55  ;;  %v76_v55 = vld [vmem:[%s8159_s0 + $0xb0] sm:$0xff] }
  0x2c   :  { %506 = vmatpush.bf16.msrb.mxu2 %v3655_v54  ;;  %v69_v54 = vld [vmem:[%s8159_s0 + $0x78] sm:$0xff]  ;;  %v4867_v61 = vpack.c.bf16 %v77_v56, %v76_v55 }
  0x2d   :  { %595 = vmatpush.bf16.msrb.mxu3 %v3659_v63  ;;  %684 = vmatpush.bf16.msrb.mxu0 %v3663_v22  ;;  %v4865_v60 = vpack.c.bf16 %v69_v54, %v68_v53 }
  0x2f   :  { %418 = vmatpush.bf16.msrb.mxu1 %v3631_v1 }
  0x30   :  { %507 = vmatpush.bf16.msrb.mxu2 %v3635_v0 }
  0x31   :  { %596 = vmatpush.bf16.msrb.mxu3 %v3639_v21  ;;  %685 = vmatpush.bf16.msrb.mxu0 %v3643_v29 }
  0x32   :  { %3705 = vmatmul.msk.bf16.gmra.mxu0 %vm274_vm0, %v4788_v10  ;;  %3709 = vmatmul.msk.bf16.gmra.mxu1 %vm274_vm0, %v4790_v11 }
  0x33   :  { %3713 = vmatmul.msk.bf16.gmra.mxu2 %vm274_vm0, %v4792_v12  ;;  %419 = vmatpush.bf16.msrb.mxu1 %v3611_v30 }
  0x34   :  { %3717 = vmatmul.msk.bf16.gmra.mxu3 %vm274_vm0, %v4794_v13  ;;  %508 = vmatpush.bf16.msrb.mxu2 %v3615_v17 }
  0x35   :  { %597 = vmatpush.bf16.msrb.mxu3 %v3619_v31  ;;  %686 = vmatpush.bf16.msrb.mxu0 %v3623_v43 }
  0x42   :  { %3706 = vmatmul.msk.bf16.gmra.mxu0 %vm274_vm0, %v88_v47  ;;  %3710 = vmatmul.msk.bf16.gmra.mxu1 %vm274_vm0, %v4828_v48 }
  0x43   :  { %3714 = vmatmul.msk.bf16.gmra.mxu2 %vm274_vm0, %v4830_v49 }
  0x44   :  { %3718 = vmatmul.msk.bf16.gmra.mxu3 %vm274_vm0, %v4832_v50 }
  0x52   :  { %3707 = vmatmul.msk.bf16.gmra.mxu0 %vm274_vm0, %v89_v59  ;;  %3711 = vmatmul.msk.bf16.gmra.mxu1 %vm274_vm0, %v4865_v60 }
  0x53   :  { %3715 = vmatmul.msk.bf16.gmra.mxu2 %vm274_vm0, %v4867_v61 }
  0x54   :  { %3719 = vmatmul.msk.bf16.gmra.mxu3 %vm274_vm0, %v4869_v62 }
  0x62   :  { %3720 = vmatmul.msk.bf16.vlgmr.msrb.gmra.mxu1 %vm274_vm0, %v4748_v34  ;;  %3768 = vmatmul.msk.bf16.vlgmr.msrb.gmra.mxu0 %vm274_vm0, %v4748_v34 }
  0x63   :  { %3736 = vmatmul.msk.bf16.vlgmr.msrb.gmra.mxu2 %vm274_vm0, %v4748_v34 }
  0x64   :  { %3752 = vmatmul.msk.bf16.vlgmr.msrb.gmra.mxu3 %vm274_vm0, %v4748_v34  ;;  %v4905_v34 = vld [vmem:[%s8163_s4] sm:$0x1f] }
  0x65   :  { %v4908_v63 = vperm.slane %v4905_v34, 0 }
  0x72   :  { %3721 = vmatmul.msk.bf16.gmra.mxu1 %vm274_vm0, %v4788_v10  ;;  %3769 = vmatmul.msk.bf16.gmra.mxu0 %vm274_vm0, %v4788_v10 }
  0x73   :  { %3737 = vmatmul.msk.bf16.gmra.mxu2 %vm274_vm0, %v4788_v10 }
  0x74   :  { %3753 = vmatmul.msk.bf16.gmra.mxu3 %vm274_vm0, %v4788_v10 }
  0x82   :  { %3722 = vmatmul.msk.bf16.gmra.mxu1 %vm274_vm0, %v88_v47  ;;  %3770 = vmatmul.msk.bf16.gmra.mxu0 %vm274_vm0, %v88_v47 }
  0x83   :  { %3738 = vmatmul.msk.bf16.gmra.mxu2 %vm274_vm0, %v88_v47 }
  0x84   :  { %3754 = vmatmul.msk.bf16.gmra.mxu3 %vm274_vm0, %v88_v47 }
  0x92   :  { %3723 = vmatmul.msk.bf16.gmra.mxu1 %vm274_vm0, %v89_v59  ;;  %3771 = vmatmul.msk.bf16.gmra.mxu0 %vm274_vm0, %v89_v59 }
  0x93   :  { %3739 = vmatmul.msk.bf16.gmra.mxu2 %vm274_vm0, %v89_v59 }
  0x94   :  { %3755 = vmatmul.msk.bf16.gmra.mxu3 %vm274_vm0, %v89_v59 }
  0x9f   :  { %v332_v0 = vpop.f32.mrf.mxu0  ;;  %v352_v1 = vpop.f32.mrf.mxu1 }
  0xa0   :  { %v353_v2 = vadd.f32 %v352_v1, %v4908_v63  ;;  %v333_v28 = vadd.f32 %v332_v0, %v4908_v63 }
  0xa2   :  { %3724 = vmatmul.msk.bf16.gmra.mxu1 %vm274_vm0, %v4750_v35  ;;  %3772 = vmatmul.msk.bf16.gmra.mxu0 %vm274_vm0, %v4750_v35  ;;  %v3784_v36 = vmul.f32 -1.442695, %v333_v28 }
  0xa3   :  { %3740 = vmatmul.msk.bf16.gmra.mxu2 %vm274_vm0, %v4750_v35 }
  0xa4   :  { %3756 = vmatmul.msk.bf16.gmra.mxu3 %vm274_vm0, %v4750_v35  ;;  %3961 = vpow2.f32 %v3784_v36 }
  0xa6   :  { %v372_v3 = vpop.f32.mrf.mxu2 }
  0xa7   :  { %v392_v4 = vpop.f32.mrf.mxu3  ;;  %v373_v5 = vadd.f32 %v372_v3, %v4908_v63  ;;  %v334_v7 = vpop.f32.mrf.mxu0 }
  0xa8   :  { %v393_v6 = vadd.f32 %v392_v4, %v4908_v63  ;;  %v354_v8 = vpop.f32.mrf.mxu1  ;;  %v335_v37 = vadd.f32 %v334_v7, %v4908_v63 }
  0xa9   :  { %v355_v9 = vadd.f32 %v354_v8, %v4908_v63  ;;  %v3800_v53 = vmul.f32 -1.442695, %v373_v5 }
  0xaa   :  { %v3785_v47 = vmul.f32 -1.442695, %v335_v37  ;;  %v3962_v52 = vpop.eup %3961  ;;  %v3808_v57 = vmul.f32 -1.442695, %v393_v6 }
  0xab   :  { %v4986_v1 = vadd.f32 1.0, %v3962_v52 }
  0xac   :  { %3963 = vpow2.f32 %v3785_v47 }
  0xad   :  { %vm901_vm1 = vweird.f32 %v4986_v1 }
  0xae   :  { %v374_v10 = vpop.f32.mrf.mxu2 }
  0xaf   :  { %v394_v14 = vpop.f32.mrf.mxu3  ;;  %v4923_v15 = vadd.f32 %v374_v10, %v4908_v63  ;;  %v337_v17 = vpop.f32.mrf.mxu0 }
  0xb0   :  { %v4926_v16 = vadd.f32 %v394_v14, %v4908_v63  ;;  %v357_v35 = vpop.f32.mrf.mxu1  ;;  %v338_v54 = vadd.f32 %v337_v17, %v4908_v63 }
  0xb1   :  { %v4929_v18 = vadd.f32 %v357_v35, %v4908_v63  ;;  %v3801_v8 = vmul.f32 -1.442695, %v4923_v15 }
  0xb2   :  { %3725 = vmatmul.msk.bf16.gmra.mxu1 %vm274_vm0, %v4790_v11  ;;  %3773 = vmatmul.msk.bf16.gmra.mxu0 %vm274_vm0, %v4790_v11  ;;  %v3786_v5 = vmul.f32 -1.442695, %v338_v54  ;;  %v3964_v6 = vpop.eup %3963  ;;  %v3809_v10 = vmul.f32 -1.442695, %v4926_v16 }
  0xb3   :  { %3741 = vmatmul.msk.bf16.gmra.mxu2 %vm274_vm0, %v4790_v11 }
  0xb4   :  { %3757 = vmatmul.msk.bf16.gmra.mxu3 %vm274_vm0, %v4790_v11 }
  0xb6   :  { %v377_v19 = vpop.f32.mrf.mxu2 }
  0xb7   :  { %v397_v20 = vpop.f32.mrf.mxu3  ;;  %v4940_v21 = vadd.f32 %v377_v19, %v4908_v63  ;;  %v339_v22 = vpop.f32.mrf.mxu0 }
  0xb8   :  { %v359_v23 = vpop.f32.mrf.mxu1  ;;  %v4943_v24 = vadd.f32 %v397_v20, %v4908_v63  ;;  %v5009_v20 = vadd.f32 1.0, %v3964_v6 }
  0xb9   :  { %v4946_v25 = vadd.f32 %v359_v23, %v4908_v63 }
  0xba   :  { %vm916_vm5 = vweird.f32 %v5009_v20 }
  0xbe   :  { %v379_v26 = vpop.f32.mrf.mxu2 }
  0xbf   :  { %v399_v27 = vpop.f32.mrf.mxu3  ;;  %v4950_v29 = vadd.f32 %v379_v26, %v4908_v63  ;;  %v342_v30 = vpop.f32.mrf.mxu0 }
  0xc0   :  { %v4953_v11 = vadd.f32 %v399_v27, %v4908_v63  ;;  %v362_v31 = vpop.f32.mrf.mxu1  ;;  %v4956_v32 = vadd.f32 %v342_v30, %v4908_v63 }
  0xc1   :  { %v4959_v33 = vadd.f32 %v362_v31, %v4908_v63 }
  0xc2   :  { %3726 = vmatmul.msk.bf16.gmra.mxu1 %vm274_vm0, %v4828_v48  ;;  %3774 = vmatmul.msk.bf16.gmra.mxu0 %vm274_vm0, %v4828_v48 }
  0xc3   :  { %3742 = vmatmul.msk.bf16.gmra.mxu2 %vm274_vm0, %v4828_v48 }
  0xc4   :  { %3758 = vmatmul.msk.bf16.gmra.mxu3 %vm274_vm0, %v4828_v48  ;;  %v3792_v48 = vmul.f32 -1.442695, %v353_v2  ;;  %v3793_v2 = vmul.f32 -1.442695, %v355_v9  ;;  %v340_v9 = vadd.f32 %v339_v22, %v4908_v63 }
  0xc6   :  { %v382_v38 = vpop.f32.mrf.mxu2  ;;  %3965 = vpow2.f32 %v3792_v48  ;;  %v3787_v27 = vmul.f32 -1.442695, %v340_v9 }
  0xc7   :  { %v402_v41 = vpop.f32.mrf.mxu3  ;;  %v4971_v42 = vadd.f32 %v382_v38, %v4908_v63  ;;  %v344_v44 = vpop.f32.mrf.mxu0  ;;  %3967 = vpow2.f32 %v3800_v53  ;;  %v3788_v38 = vmul.f32 -1.442695, %v4956_v32 }
  0xc8   :  { %v4974_v43 = vadd.f32 %v402_v41, %v4908_v63  ;;  %v364_v45 = vpop.f32.mrf.mxu1  ;;  %v4977_v46 = vadd.f32 %v344_v44, %v4908_v63  ;;  %3969 = vpow2.f32 %v3808_v57  ;;  %v5046_v57 = vperm.slane %v4905_v34, 1 }
  0xc9   :  { %v4980_v51 = vadd.f32 %v364_v45, %v4908_v63  ;;  %3971 = vrcp.f32 %v4986_v1  ;;  %v3794_v45 = vmul.f32 -1.442695, %v4929_v18 }
  0xca   :  { %8196 = vst [vmem:[#allocation13_spill] sm:$0xff] %v4974_v43  ;;  %3973 = vpow2.f32 %v3793_v2 }
  0xcb   :  { %8197 = vst [vmem:[#allocation14_spill] sm:$0xff] %v4980_v51  ;;  %3975 = vpow2.f32 %v3786_v5 }
  0xcc   :  { %v3966_v14 = vpop.eup %3965  ;;  %3977 = vpow2.f32 %v3801_v8 }
  0xcd   :  { %v3968_v19 = vpop.eup %3967  ;;  %v5020_v28 = vadd.f32 1.0, %v3966_v14  ;;  %3979 = vpow2.f32 %v3809_v10  ;;  %v3810_v10 = vmul.f32 -1.442695, %v4943_v24  ;;  %v5074_v24 = vperm.slane %v4905_v34, 2 }
  0xce   :  { %v384_v55 = vpop.f32.mrf.mxu2  ;;  %v3970_v16 = vpop.eup %3969  ;;  %v5027_v36 = vadd.f32 1.0, %v3968_v19  ;;  %3981 = vrcp.f32 %v5009_v20  ;;  %v5077_v14 = vperm.slane %v4905_v34, 3  ;;  %v3795_v19 = vmul.f32 -1.442695, %v4946_v25 }
  0xcf   :  { %v404_v56 = vpop.f32.mrf.mxu3  ;;  %v4984_v58 = vadd.f32 %v384_v55, %v4908_v63  ;;  %v347_v59 = vpop.f32.mrf.mxu0  ;;  %8203 = vst [vmem:[#allocation20_spill] sm:$0xff] %v5020_v28  ;;  %v5031_v44 = vadd.f32 1.0, %v3970_v16  ;;  %3983 = vpow2.f32 %v3787_v27  ;;  %v3789_v16 = vmul.f32 -1.442695, %v4977_v46 }
  0xd0   :  { %v367_v0 = vpop.f32.mrf.mxu1  ;;  %v4989_v3 = vadd.f32 %v404_v56, %v4908_v63  ;;  %v4992_v4 = vadd.f32 %v347_v59, %v4908_v63  ;;  %v5025_v31 = vpop.eup %3971  ;;  %8205 = vst [vmem:[#allocation22_spill] sm:$0xff] %v5027_v36  ;;  %3985 = vrcp.f32 %v5020_v28  ;;  %v3802_v59 = vmul.f32 -1.442695, %v4940_v21 }
  0xd1   :  { %8198 = vst [vmem:[#allocation15_spill] sm:$0xff] %v4984_v58  ;;  %v4995_v7 = vadd.f32 %v367_v0, %v4908_v63  ;;  %v3974_v37 = vpop.eup %3973  ;;  %v897_v48 = vmul.f32 %v5025_v31, %v4986_v1  ;;  %3987 = vrcp.f32 %v5027_v36  ;;  %vm902_vm2 = vweird.f32 %v5025_v31 }
  0xd2   :  { %8199 = vst [vmem:[#allocation16_spill] sm:$0xff] %v4989_v3  ;;  %3727 = vmatmul.msk.bf16.gmra.mxu1 %vm274_vm0, %v4865_v60  ;;  %3775 = vmatmul.msk.bf16.gmra.mxu0 %vm274_vm0, %v4865_v60  ;;  %v3976_v41 = vpop.eup %3975  ;;  %v5038_v52 = vadd.f32 1.0, %v3974_v37  ;;  %3989 = vpow2.f32 %v3788_v38  ;;  %v905_v38 = vand.u32 2147483647, %v4986_v1  ;;  %vm5129_vm4 = vmor %vm901_vm1, %vm902_vm2 }
  0xd3   :  { %8200 = vst [vmem:[#allocation17_spill] sm:$0xff] %v4995_v7  ;;  %3743 = vmatmul.msk.bf16.gmra.mxu2 %vm274_vm0, %v4865_v60  ;;  %v3978_v47 = vpop.eup %3977  ;;  %v5040_v32 = vadd.f32 1.0, %v3976_v41  ;;  %3991 = vrcp.f32 %v5031_v44  ;;  %v898_v8 = vsub.f32 1.0, %v897_v48 }
  0xd4   :  { %3759 = vmatmul.msk.bf16.gmra.mxu3 %vm274_vm0, %v4865_v60  ;;  %8206 = vst [vmem:[#allocation23_spill] sm:$0xff] %v5031_v44  ;;  %v3980_v55 = vpop.eup %3979  ;;  %v5055_v5 = vadd.f32 1.0, %v3978_v47  ;;  %3993 = vpow2.f32 %v3794_v45  ;;  %vm5118_vm3 = vcmp.eq.f32.partialorder %v905_v38, 8.507059e+37 }
  0xd5   :  { %v5053_v2 = vpop.eup %3981  ;;  %3995 = vrcp.f32 %v5038_v52  ;;  %v5058_v9 = vadd.f32 1.0, %v3980_v55  ;;  %v899_v37 = vmul.f32 %v5025_v31, %v898_v8  ;;  %vm931_vm13 = vweird.f32 %v5040_v32 }
  0xd6   :  { %v387_v17 = vpop.f32.mrf.mxu2  ;;  %8209 = vst [vmem:[#allocation26_spill] sm:$0xff] %v5055_v5  ;;  %v3984_v6 = vpop.eup %3983  ;;  %3997 = vrcp.f32 %v5040_v32  ;;  %vm917_vm6 = vweird.f32 %v5053_v2 }
  0xd7   :  { %v407_v35 = vpop.f32.mrf.mxu3  ;;  %v5012_v23 = vadd.f32 %v387_v17, %v4908_v63  ;;  %v349_v60 = vpop.f32.mrf.mxu0  ;;  %8210 = vst [vmem:[#allocation27_spill] sm:$0xff] %v5058_v9  ;;  %3999 = vpow2.f32 %v3802_v59  ;;  %vm5165_vm7 = vmor %vm916_vm5, %vm917_vm6 }
  0xd8   :  { %v369_v26 = vpop.f32.mrf.mxu1  ;;  %v5015_v15 = vadd.f32 %v407_v35, %v4908_v63  ;;  %v5018_v22 = vadd.f32 %v349_v60, %v4908_v63  ;;  %v912_v35 = vmul.f32 %v5053_v2, %v5009_v20  ;;  %4001 = vrcp.f32 %v5055_v5 }
  0xd9   :  { %8201 = vst [vmem:[#allocation18_spill] sm:$0xff] %v5012_v23  ;;  %v5023_v30 = vadd.f32 %v369_v26, %v4908_v63  ;;  %v5085_v26 = vadd.f32 1.0, %v3984_v6  ;;  %4003 = vpow2.f32 %v3810_v10 }
  0xda   :  { %8202 = vst [vmem:[#allocation19_spill] sm:$0xff] %v5015_v15  ;;  %4005 = vrcp.f32 %v5058_v9 }
  0xdb   :  { %8204 = vst [vmem:[#allocation21_spill] sm:$0xff] %v5023_v30  ;;  %4007 = vpow2.f32 %v3795_v19 }
  0xdc   :  { %4009 = vrcp.f32 %v5085_v26 }
  0xdd   :  { %4011 = vpow2.f32 %v3789_v16 }
  0xde   :  { %v389_v53 = vpop.f32.mrf.mxu2 }
  0xdf   :  { %v409_v54 = vpop.f32.mrf.mxu3  ;;  %v5043_v56 = vadd.f32 %v389_v53, %v4908_v63  ;;  %v688_v19 = vpop.f32.mrf.mxu0 }
  0xe0   :  { %v421_v18 = vpop.f32.mrf.mxu1  ;;  %v5051_v0 = vadd.f32 %v409_v54, %v4908_v63  ;;  %v5065_v63 = vpop.eup %3985 }
  0xe1   :  { %8207 = vst [vmem:[#allocation24_spill] sm:$0xff] %v5043_v56  ;;  %v422_v21 = vadd.f32 %v421_v18, %v5046_v57  ;;  %v5079_v17 = vpop.eup %3987  ;;  %v913_v18 = vsub.f32 1.0, %v912_v35  ;;  %v5106_v8 = vmul.f32 %v5065_v63, %v5020_v28  ;;  %v5113_v35 = vperm.slane %v4905_v34, 4 }
  0xe2   :  { %8208 = vst [vmem:[#allocation25_spill] sm:$0xff] %v5051_v0  ;;  %3728 = vmatmul.msk.bf16.gmra.mxu1 %vm274_vm0, %v4752_v39  ;;  %3776 = vmatmul.msk.bf16.gmra.mxu0 %vm274_vm0, %v4752_v39  ;;  %v3990_v60 = vpop.eup %3989 }
  0xe3   :  { %8211 = vst [vmem:[#allocation28_spill] sm:$0xff] %v5065_v63  ;;  %3744 = vmatmul.msk.bf16.gmra.mxu2 %vm274_vm0, %v4752_v39  ;;  %v5089_v27 = vpop.eup %3991  ;;  %v3816_v47 = vmul.f32 -1.442695, %v422_v21  ;;  %v5099_v46 = vadd.f32 1.0, %v3990_v60  ;;  %v914_v16 = vmul.f32 %v5053_v2, %v913_v18 }
  0xe4   :  { %3760 = vmatmul.msk.bf16.gmra.mxu3 %vm274_vm0, %v4752_v39  ;;  %8212 = vst [vmem:[#allocation29_spill] sm:$0xff] %v5079_v17  ;;  %v907_v39 = vand.u32 2147483648, %v4986_v1  ;;  %v3994_v45 = vpop.eup %3993  ;;  %v689_v1 = vadd.f32 %v688_v19, %v5113_v35 }
  0xe5   :  { %8213 = vst [vmem:[#allocation30_spill] sm:$0xff] %v5089_v27  ;;  %v5097_v55 = vpop.eup %3995  ;;  %4013 = vpow2.f32 %v3816_v47  ;;  %v915_v19 = vadd.f32 %v5053_v2, %v914_v16  ;;  %v5184_v16 = vmul.f32 -1.442695, %v4959_v33 }
  0xe6   :  { %v510_v41 = vpop.f32.mrf.mxu2  ;;  %v5102_v6 = vpop.eup %3997  ;;  %8214 = vst [vmem:[#allocation31_spill] sm:$0xff] %v5106_v8  ;;  %v908_v60 = vor.u32 1.1754944e-38, %v907_v39  ;;  %4015 = vrcp.f32 %v5099_v46 }
  0xe7   :  { %v599_v25 = vpop.f32.mrf.mxu3  ;;  %v511_v48 = vadd.f32 %v510_v41, %v5074_v24  ;;  %v4000_v21 = vpop.eup %3999  ;;  %v5110_v41 = vadd.f32 1.0, %v3994_v45  ;;  %v927_v45 = vmul.f32 %v5102_v6, %v5040_v32  ;;  %vm932_vm14 = vweird.f32 %v5102_v6 }
  0xe8   :  { %v600_v53 = vadd.f32 %v599_v25, %v5077_v14  ;;  %v423_v54 = vpop.f32.mrf.mxu1  ;;  %v5115_v25 = vpop.eup %4001  ;;  %v5137_v47 = vadd.f32 1.0, %v4000_v21  ;;  %v922_v21 = vand.u32 2147483648, %v5009_v20 }
  0xe9   :  { %v424_v59 = vadd.f32 %v423_v54, %v5046_v57  ;;  %v3848_v10 = vmul.f32 -1.442695, %v511_v48  ;;  %8215 = vst [vmem:[#allocation32_spill] sm:$0xff] %v5110_v41  ;;  %v900_v54 = vadd.f32 %v5025_v31, %v899_v37  ;;  %v4004_v48 = vpop.eup %4003  ;;  %v928_v56 = vsub.f32 1.0, %v927_v45  ;;  %v690_v0 = vpop.f32.mrf.mxu0 }
  0xea   :  { %8216 = vst [vmem:[#allocation33_spill] sm:$0xff] %v5115_v25  ;;  %v3880_v15 = vmul.f32 -1.442695, %v600_v53  ;;  %v5134_v37 = vpop.eup %4005  ;;  %v5157_v25 = vmul.f32 %v5079_v17, %v5027_v36  ;;  %v5243_v17 = vmul.f32 -1.442695, %v5018_v22 }
  0xeb   :  { %v3817_v39 = vmul.f32 -1.442695, %v424_v59  ;;  %8221 = vst [vmem:[#allocation34_spill] sm:$0xff] %v5134_v37  ;;  %4017 = vpow2.f32 %v3848_v10  ;;  %v5140_v53 = vpop.eup %4007  ;;  %v920_v59 = vand.u32 2147483647, %v5009_v20  ;;  %v904_v10 = vsel %vm5129_vm4, %v5025_v31, %v900_v54 }
  0xec   :  { %8222 = vst [vmem:[#allocation35_spill] sm:$0xff] %v5137_v47  ;;  %4019 = vrcp.f32 %v5110_v41  ;;  %v5146_v37 = vpop.eup %4009  ;;  %v909_v34 = vsel %vm5118_vm3, %v908_v60, %v904_v10  ;;  %v919_v60 = vsel %vm5165_vm7, %v5053_v2, %v915_v19  ;;  %v3790_v2 = vmul.f32 -1.442695, %v4992_v4 }
  0xed   :  { %4021 = vpow2.f32 %v3880_v15  ;;  %v4012_v9 = vpop.eup %4011  ;;  %8223 = vst [vmem:[#allocation36_spill] sm:$0xff] %v5157_v25  ;;  %v3803_v15 = vmul.f32 -1.442695, %v4950_v29  ;;  %v5181_v20 = vmul.f32 %v5146_v37, %v5085_v26  ;;  %vm5196_vm8 = vcmp.eq.f32.partialorder %v920_v59, 8.507059e+37 }
  0xee   :  { %v512_v18 = vpop.f32.mrf.mxu2  ;;  %4023 = vpow2.f32 %v3817_v39  ;;  %v4014_v58 = vpop.eup %4013 }
  0xef   :  { %v601_v3 = vpop.f32.mrf.mxu3  ;;  %v513_v38 = vadd.f32 %v512_v18, %v5074_v24  ;;  %4025 = vrcp.f32 %v5137_v47  ;;  %v5169_v45 = vpop.eup %4015  ;;  %v5201_v18 = vadd.f32 1.0, %v4004_v48 }
  0xf0   :  { %v602_v23 = vadd.f32 %v601_v3, %v5077_v14  ;;  %v5171_v3 = vadd.f32 1.0, %v4014_v58  ;;  %4027 = vtanh.f32 %v689_v1  ;;  %v923_v58 = vor.u32 1.1754944e-38, %v922_v21  ;;  %v426_v21 = vpop.f32.mrf.mxu1 }
  0xf1   :  { %v3849_v54 = vmul.f32 -1.442695, %v513_v38  ;;  %v4018_v29 = vpop.eup %4017  ;;  %v929_v38 = vmul.f32 %v5102_v6, %v928_v56  ;;  %v5209_v31 = vmul.f32 %v5169_v45, %v5099_v46  ;;  %v427_v4 = vadd.f32 %v426_v21, %v5046_v57 }
  0xf2   :  { %v3881_v39 = vmul.f32 -1.442695, %v602_v23  ;;  %3729 = vmatmul.msk.bf16.gmra.mxu1 %vm274_vm0, %v4792_v12  ;;  %3777 = vmatmul.msk.bf16.gmra.mxu0 %vm274_vm0, %v4792_v12  ;;  %v5190_v23 = vpop.eup %4019  ;;  %v5205_v10 = vadd.f32 1.0, %v4018_v29  ;;  %v5221_v19 = vsel %vm5196_vm8, %v923_v58, %v919_v60  ;;  %v1513_v29 = vand.u32 2147483647, %v5171_v3 }
  0xf3   :  { %4029 = vpow2.f32 %v3849_v54  ;;  %3745 = vmatmul.msk.bf16.gmra.mxu2 %vm274_vm0, %v4792_v12  ;;  %8226 = vst [vmem:[#allocation37_spill] sm:$0xff] %v5190_v23  ;;  %v4022_v1 = vpop.eup %4021  ;;  %v1515_v48 = vand.u32 2147483648, %v5171_v3  ;;  %vm1509_vm9 = vweird.f32 %v5171_v3 }
  0xf4   :  { %3761 = vmatmul.msk.bf16.gmra.mxu3 %vm274_vm0, %v4792_v12  ;;  %4031 = vrcp.f32 %v5171_v3  ;;  %v5203_v12 = vadd.f32 1.0, %v4012_v9  ;;  %v4024_v54 = vpop.eup %4023  ;;  %v5212_v59 = vadd.f32 1.0, %v4022_v1  ;;  %v691_v9 = vadd.f32 %v690_v0, %v5113_v35 }
  0xf5   :  { %4033 = vpow2.f32 %v3803_v15  ;;  %v5214_v56 = vpop.eup %4025  ;;  %v5231_v0 = vadd.f32 1.0, %v4024_v54  ;;  %v2121_v36 = vand.u32 2147483647, %v5205_v10  ;;  %vm5250_vm10 = vcmp.eq.f32.partialorder %v1513_v29, 8.507059e+37 }
  0xf6   :  { %4035 = vpow2.f32 %v3881_v39  ;;  %8229 = vst [vmem:[#allocation38_spill] sm:$0xff] %v5214_v56  ;;  %v4028_v15 = vpop.eup %4027  ;;  %v5227_v39 = vadd.f32 %v5102_v6, %v929_v38  ;;  %v1516_v22 = vor.u32 1.1754944e-38, %v1515_v48  ;;  %v2123_v5 = vand.u32 2147483648, %v5205_v10  ;;  %v515_v30 = vpop.f32.mrf.mxu2 }
  0xf7   :  { %4037 = vrcp.f32 %v5205_v10  ;;  %v5247_v56 = vmul.f32 %v4028_v15, %v909_v34  ;;  %vm2117_vm11 = vweird.f32 %v5205_v10  ;;  %vm5261_vm12 = vcmp.eq.f32.partialorder %v2121_v36, 8.507059e+37 }
  0xf8   :  { %4039 = vrcp.f32 %v5212_v59  ;;  %v1528_v29 = vand.u32 2147483647, %v5231_v0  ;;  %v2124_v25 = vor.u32 1.1754944e-38, %v2123_v5  ;;  %vm1524_vm1 = vweird.f32 %v5231_v0 }
  0xf9   :  { %v4030_v1 = vpop.eup %4029  ;;  %4041 = vrcp.f32 %v5203_v12  ;;  %v1530_v27 = vand.u32 2147483648, %v5231_v0  ;;  %vm2725_vm4 = vweird.f32 %v5212_v59  ;;  %v516_v5 = vadd.f32 %v515_v30, %v5074_v24 }
  0xfa   :  { %v5234_v60 = vpop.eup %4031  ;;  %4043 = vpow2.f32 %v3790_v2  ;;  %v5238_v21 = vadd.f32 1.0, %v4030_v1  ;;  %v3818_v1 = vmul.f32 -1.442695, %v427_v4  ;;  %vm5312_vm6 = vcmp.eq.f32.partialorder %v1528_v29, 8.507059e+37 }
  0xfb   :  { %v5240_v38 = vpop.eup %4033  ;;  %v1505_v54 = vmul.f32 %v5234_v60, %v5171_v3  ;;  %4045 = vtanh.f32 %v691_v9  ;;  %vm1510_vm15 = vweird.f32 %v5234_v60  ;;  %v3850_v2 = vmul.f32 -1.442695, %v516_v5 }
  0xfc   :  { %8230 = vst [vmem:[#allocation39_spill] sm:$0xff] %v5240_v38  ;;  %v4036_v58 = vpop.eup %4035  ;;  %4047 = vrcp.f32 %v5231_v0  ;;  %vm5291_vm2 = vmor %vm1509_vm9, %vm1510_vm15  ;;  %vm2132_vm5 = vweird.f32 %v5238_v21  ;;  %v2138_v41 = vand.u32 2147483648, %v5238_v21  ;;  %v937_v36 = vand.u32 2147483648, %v5040_v32 }
  0xfd   :  { %v4038_v33 = vpop.eup %4037  ;;  %v1506_v47 = vsub.f32 1.0, %v1505_v54  ;;  %4049 = vrcp.f32 %v5238_v21  ;;  %v5278_v63 = vadd.f32 1.0, %v4036_v58 }
  0xfe   :  { %v5257_v34 = vpop.eup %4039  ;;  %v2113_v9 = vmul.f32 %v4038_v33, %v5205_v10  ;;  %4051 = vpow2.f32 %v3818_v1  ;;  %vm2118_vm3 = vweird.f32 %v4038_v33  ;;  %v604_v10 = vpop.f32.mrf.mxu3 }
  0xff   :  { %v5268_v48 = vpop.eup %4041  ;;  %v1507_v4 = vmul.f32 %v5234_v60, %v1506_v47  ;;  %v2721_v54 = vmul.f32 %v5257_v34, %v5212_v59  ;;  %4053 = vrcp.f32 %v5278_v63  ;;  %vm2119_vm7 = vmor %vm2117_vm11, %vm2118_vm3  ;;  %vm2726_vm8 = vweird.f32 %v5257_v34 }
 0x100   :  { %v5275_v28 = vpop.eup %4043  ;;  %v2114_v7 = vsub.f32 1.0, %v2113_v9  ;;  %4055 = vpow2.f32 %v3850_v2  ;;  %vm2740_vm3 = vweird.f32 %v5278_v63 }
 0x101   :  { %v5280_v8 = vpop.eup %4045  ;;  %v1508_v47 = vadd.f32 %v5234_v60, %v1507_v4  ;;  %v2722_v4 = vsub.f32 1.0, %v2721_v54 }
 0x102   :  { %v5285_v44 = vpop.eup %4047  ;;  %v2115_v58 = vmul.f32 %v4038_v33, %v2114_v7  ;;  %3730 = vmatmul.msk.bf16.gmra.mxu1 %vm274_vm0, %v4830_v49  ;;  %3778 = vmatmul.msk.bf16.gmra.mxu0 %vm274_vm0, %v4830_v49 }
 0x103   :  { %v4050_v1 = vpop.eup %4049  ;;  %v1512_v3 = vsel %vm5291_vm2, %v5234_v60, %v1508_v47  ;;  %v1520_v7 = vmul.f32 %v5285_v44, %v5231_v0  ;;  %3746 = vmatmul.msk.bf16.gmra.mxu2 %vm274_vm0, %v4830_v49  ;;  %v2136_v60 = vand.u32 2147483647, %v5238_v21  ;;  %v3232_v47 = vld [vmem:[%s8160_s1] sm:$0xff]  ;;  %vm1525_vm9 = vweird.f32 %v5285_v44 }
 0x104   :  { %3762 = vmatmul.msk.bf16.gmra.mxu3 %vm274_vm0, %v4830_v49  ;;  %v2116_v30 = vadd.f32 %v4038_v33, %v2115_v58  ;;  %v2128_v9 = vmul.f32 %v4050_v1, %v5238_v21  ;;  %v1517_v54 = vsel %vm5250_vm10, %v1516_v22, %v1512_v3  ;;  %v3296_v49 = vld [vmem:[#allocation2] sm:$0xff]  ;;  %v1531_v58 = vor.u32 1.1754944e-38, %v1530_v27  ;;  %v4052_v51 = vpop.eup %4051  ;;  %vm1526_vm15 = vmor %vm1524_vm1, %vm1525_vm9 }
 0x105   :  { %v1521_v29 = vsub.f32 1.0, %v1520_v7  ;;  %v2723_v3 = vmul.f32 %v5257_v34, %v2722_v4  ;;  %v5333_v50 = vpop.eup %4053  ;;  %v3264_v7 = vmul.f32 %v3232_v47, %v1517_v54  ;;  %vm2133_vm10 = vweird.f32 %v4050_v1  ;;  %v3297_v54 = vld [vmem:[#allocation2 + $0x8] sm:$0xff] }
 0x106   :  { %v2120_v38 = vsel %vm2119_vm7, %v4038_v33, %v2116_v30  ;;  %v2129_v23 = vsub.f32 1.0, %v2128_v9  ;;  %vm5336_vm11 = vcmp.eq.f32.partialorder %v2136_v60, 8.507059e+37  ;;  %v605_v30 = vadd.f32 %v604_v10, %v5077_v14  ;;  %v3233_v9 = vld [vmem:[%s8160_s1 + $0x8] sm:$0xff] }
 0x107   :  { %v2125_v22 = vsel %vm5261_vm12, %v2124_v25, %v2120_v38  ;;  %v1522_v62 = vmul.f32 %v5285_v44, %v1521_v29  ;;  %v2736_v25 = vmul.f32 %v5333_v50, %v5278_v63  ;;  %v5342_v38 = vadd.f32 1.0, %v4052_v51  ;;  %vm5348_vm12 = vmor %vm931_vm13, %vm932_vm14 }
 0x108   :  { %v3328_v27 = vmul.f32 %v3296_v49, %v2125_v22  ;;  %v2130_v43 = vmul.f32 %v4050_v1, %v2129_v23  ;;  %v428_v23 = vpop.f32.mrf.mxu1  ;;  %vm2134_vm13 = vmor %vm2132_vm5, %vm2133_vm10  ;;  %v2139_v60 = vor.u32 1.1754944e-38, %v2138_v41  ;;  %v3882_v2 = vmul.f32 -1.442695, %v605_v30 }
 0x109   :  { %v1523_v33 = vadd.f32 %v5285_v44, %v1522_v62  ;;  %v2737_v47 = vsub.f32 1.0, %v2736_v25  ;;  %4057 = vrcp.f32 %v5342_v38  ;;  %vm5370_vm14 = vmor %vm2725_vm4, %vm2726_vm8  ;;  %v8245_v22 = vand.u32 2147483647, %v5212_v59 }
 0x10a   :  { %v3360_v4 = vadd.f32 %v3328_v27, %v3264_v7  ;;  %v2131_v62 = vadd.f32 %v4050_v1, %v2130_v43  ;;  %v2724_v43 = vadd.f32 %v5257_v34, %v2723_v3  ;;  %v8248_v10 = vand.u32 2147483648, %v5212_v59 }
 0x10b   :  { %v1527_v51 = vsel %vm1526_vm15, %v5285_v44, %v1523_v33  ;;  %v2738_v29 = vmul.f32 %v5333_v50, %v2737_v47  ;;  %vm5385_vm1 = vcmp.eq.f32.partialorder %v8245_v22, 8.507059e+37  ;;  %v429_v27 = vadd.f32 %v428_v23, %v5046_v57  ;;  %v4056_v33 = vpop.eup %4055  ;;  %v517_v23 = vpop.f32.mrf.mxu2 }
 0x10c   :  { %v3424_v0 = vadd.f32 %v5247_v56, %v3360_v4  ;;  %v1532_v49 = vsel %vm5312_vm6, %v1531_v58, %v1527_v51  ;;  %v2135_v44 = vsel %vm2134_vm13, %v4050_v1, %v2131_v62  ;;  %v934_v56 = vsel %vm5348_vm12, %v5102_v6, %v5227_v39  ;;  %v606_v51 = vpop.f32.mrf.mxu3 }
 0x10d   :  { %v2140_v41 = vsel %vm5336_vm11, %v2139_v60, %v2135_v44  ;;  %v3265_v1 = vmul.f32 %v3233_v9, %v1532_v49  ;;  %v2732_v7 = vor.u32 1.1754944e-38, %v8248_v10  ;;  %v2728_v5 = vsel %vm5370_vm14, %v5257_v34, %v2724_v43 }
 0x10e   :  { %3456 = vst [vmem:[#allocation7] sm:$0xff] %v3424_v0  ;;  %4059 = vtanh.f32 %v3424_v0  ;;  %v3329_v58 = vmul.f32 %v3297_v54, %v2140_v41  ;;  %v3393_v25 = vmul.f32 %v5280_v8, %v5221_v19  ;;  %v2739_v62 = vadd.f32 %v5333_v50, %v2738_v29 }
 0x10f   :  { %4061 = vpow2.f32 %v5243_v17  ;;  %v5397_v4 = vpop.eup %4057  ;;  %vm2741_vm2 = vweird.f32 %v5333_v50  ;;  %v5401_v59 = vadd.f32 1.0, %v4056_v33  ;;  %v3819_v30 = vmul.f32 -1.442695, %v429_v27 }
 0x110   :  { %v3361_v17 = vadd.f32 %v3329_v58, %v3265_v1  ;;  %4063 = vpow2.f32 %v3882_v2  ;;  %v5404_v9 = vadd.f32 1.0, %v5275_v28  ;;  %v1535_v8 = vmul.f32 %v5397_v4, %v5342_v38  ;;  %v431_v54 = vpop.f32.mrf.mxu1  ;;  %vm5424_vm4 = vmor %vm2740_vm3, %vm2741_vm2 }
 0x111   :  { %v2733_v19 = vsel %vm5385_vm1, %v2732_v7, %v2728_v5  ;;  %v2744_v60 = vand.u32 2147483647, %v5278_v63  ;;  %v2746_v28 = vand.u32 2147483648, %v5278_v63  ;;  %4065 = vrcp.f32 %v5401_v59  ;;  %v693_v63 = vpop.f32.mrf.mxu0 }
 0x112   :  { %v3425_v34 = vadd.f32 %v3393_v25, %v3361_v17  ;;  %3731 = vmatmul.msk.bf16.gmra.mxu1 %vm274_vm0, %v4867_v61  ;;  %3779 = vmatmul.msk.bf16.gmra.mxu0 %vm274_vm0, %v4867_v61  ;;  %v1536_v43 = vsub.f32 1.0, %v1535_v8  ;;  %v518_v49 = vadd.f32 %v517_v23, %v5074_v24  ;;  %v607_v44 = vadd.f32 %v606_v51, %v5077_v14 }
 0x113   :  { %3747 = vmatmul.msk.bf16.gmra.mxu2 %vm274_vm0, %v4867_v61  ;;  %v2743_v29 = vsel %vm5424_vm4, %v5333_v50, %v2739_v62  ;;  %v432_v3 = vadd.f32 %v431_v54, %v5046_v57  ;;  %v2747_v10 = vor.u32 1.1754944e-38, %v2746_v28  ;;  %v8251_v27 = vsub.f32 1.0, %v5181_v20 }
 0x114   :  { %3763 = vmatmul.msk.bf16.gmra.mxu3 %vm274_vm0, %v4867_v61  ;;  %v4060_v47 = vpop.eup %4059  ;;  %3457 = vst [vmem:[#allocation7 + $0x10] sm:$0xff] %v3425_v34  ;;  %4067 = vtanh.f32 %v3425_v34  ;;  %v5434_v61 = vmul.f32 %v5268_v48, %v5203_v12  ;;  %v1537_v58 = vmul.f32 %v5397_v4, %v1536_v43  ;;  %v3851_v2 = vmul.f32 -1.442695, %v518_v49 }
 0x115   :  { %v5430_v21 = vpop.eup %4061  ;;  %v3520_v41 = vmul.f32 %v4060_v47, %v2733_v19  ;;  %4069 = vpow2.f32 %v3819_v30  ;;  %v3883_v22 = vmul.f32 -1.442695, %v607_v44  ;;  %v944_v33 = vmul.f32 %v5146_v37, %v8251_v27 }
 0x116   :  { %v4064_v1 = vpop.eup %4063  ;;  %4071 = vrcp.f32 %v5404_v9  ;;  %vm2745_vm5 = vcmp.eq.f32.partialorder %v2744_v60, 8.507059e+37  ;;  %v8252_v50 = vand.u32 2147483647, %v5040_v32  ;;  %v5453_v25 = vor.u32 1.1754944e-38, %v937_v36 }
 0x117   :  { %3552 = vst [vmem:[#allocation7 + $0x8] sm:$0xff] %v3520_v41  ;;  %v5442_v7 = vadd.f32 1.0, %v4064_v1  ;;  %4073 = vpow2.f32 %v3851_v2  ;;  %v3820_v17 = vmul.f32 -1.442695, %v432_v3  ;;  %v4066_v62 = vpop.eup %4065  ;;  %v2748_v30 = vsel %vm2745_vm5, %v2747_v10, %v2743_v29 }
 0x118   :  { %vm5449_vm6 = vcmp.eq.f32.partialorder %v8252_v50, 8.507059e+37  ;;  %vm1539_vm7 = vweird.f32 %v5342_v38  ;;  %v694_v23 = vadd.f32 %v693_v63, %v5113_v35  ;;  %v1538_v51 = vadd.f32 %v5397_v4, %v1537_v58  ;;  %v3234_v50 = vld [vmem:[%s8160_s1 + $0x10] sm:$0xff] }
 0x119   :  { %4075 = vrcp.f32 %v5442_v7  ;;  %vm1540_vm8 = vweird.f32 %v5397_v4  ;;  %v2143_v32 = vmul.f32 %v4066_v62, %v5401_v59  ;;  %v1545_v8 = vand.u32 2147483648, %v5342_v38 }
 0x11a   :  { %v4068_v20 = vpop.eup %4067  ;;  %4077 = vpow2.f32 %v3883_v22  ;;  %v5463_v19 = vadd.f32 %v5146_v37, %v944_v33  ;;  %vm946_vm9 = vweird.f32 %v5085_v26  ;;  %v1543_v60 = vand.u32 2147483647, %v5342_v38  ;;  %vm5473_vm10 = vmor %vm1539_vm7, %vm1540_vm8  ;;  %v695_v38 = vpop.f32.mrf.mxu0 }
 0x11b   :  { %v4070_v36 = vpop.eup %4069  ;;  %v3521_v34 = vmul.f32 %v4068_v20, %v2748_v30  ;;  %v2144_v28 = vsub.f32 1.0, %v2143_v32  ;;  %4079 = vpow2.f32 %v3820_v17  ;;  %v2151_v43 = vand.u32 2147483647, %v5401_v59  ;;  %v3298_v30 = vld [vmem:[#allocation2 + $0x10] sm:$0xff] }
 0x11c   :  { %v5467_v54 = vadd.f32 1.0, %v4070_v36  ;;  %v5469_v47 = vpop.eup %4071  ;;  %4081 = vtanh.f32 %v694_v23  ;;  %v2153_v63 = vand.u32 2147483648, %v5401_v59  ;;  %vm947_vm11 = vweird.f32 %v5146_v37 }
 0x11d   :  { %3553 = vst [vmem:[#allocation7 + $0x18] sm:$0xff] %v3521_v34  ;;  %v4074_v49 = vpop.eup %4073  ;;  %v1542_v44 = vsel %vm5473_vm10, %v5397_v4, %v1538_v51  ;;  %v2145_v41 = vmul.f32 %v4066_v62, %v2144_v28  ;;  %vm2148_vm15 = vweird.f32 %v4066_v62  ;;  %v1546_v1 = vor.u32 1.1754944e-38, %v1545_v8  ;;  %vm5497_vm1 = vmor %vm946_vm9, %vm947_vm11 }
 0x11e   :  { %4083 = vrcp.f32 %v5467_v54  ;;  %v950_v58 = vand.u32 2147483647, %v5085_v26  ;;  %v952_v2 = vand.u32 2147483648, %v5085_v26  ;;  %v5488_v22 = vadd.f32 1.0, %v4074_v49 }
 0x11f   :  { %v5484_v29 = vpop.eup %4075  ;;  %vm1544_vm13 = vcmp.eq.f32.partialorder %v1543_v60, 8.507059e+37  ;;  %v2146_v10 = vadd.f32 %v4066_v62, %v2145_v41  ;;  %vm2147_vm14 = vweird.f32 %v5401_v59  ;;  %v2154_v59 = vor.u32 1.1754944e-38, %v2153_v63 }
 0x120   :  { %v4078_v3 = vpop.eup %4077  ;;  %v2751_v4 = vmul.f32 %v5484_v29, %v5442_v7  ;;  %v1547_v33 = vsel %vm1544_vm13, %v1546_v1, %v1542_v44  ;;  %vm5505_vm2 = vmor %vm2147_vm14, %vm2148_vm15  ;;  %v696_v23 = vadd.f32 %v695_v38, %v5113_v35  ;;  %4085 = vrcp.f32 %v5488_v22 }
 0x121   :  { %v4080_v26 = vpop.eup %4079  ;;  %v2150_v20 = vsel %vm5505_vm2, %v4066_v62, %v2146_v10  ;;  %vm2152_vm3 = vcmp.eq.f32.partialorder %v2151_v43, 8.507059e+37  ;;  %v5513_v32 = vadd.f32 1.0, %v4078_v3  ;;  %v5520_v34 = vadd.f32 1.0, %v5430_v21 }
 0x122   :  { %v2752_v51 = vsub.f32 1.0, %v2751_v4  ;;  %3732 = vmatmul.msk.bf16.gmra.mxu1 %vm274_vm0, %v4754_v40  ;;  %3780 = vmatmul.msk.bf16.gmra.mxu0 %vm274_vm0, %v4754_v40  ;;  %v4082_v36 = vpop.eup %4081  ;;  %v939_v62 = vsel %vm5449_vm6, %v5453_v25, %v934_v56  ;;  %v2155_v8 = vsel %vm2152_vm3, %v2154_v59, %v2150_v20  ;;  %v2759_v60 = vand.u32 2147483647, %v5442_v7  ;;  %v520_v4 = vpop.f32.mrf.mxu2 }
 0x123   :  { %3748 = vmatmul.msk.bf16.gmra.mxu2 %vm274_vm0, %v4754_v40  ;;  %v3266_v28 = vmul.f32 %v3234_v50, %v1547_v33  ;;  %v3330_v0 = vmul.f32 %v3298_v30, %v2155_v8  ;;  %v949_v6 = vsel %vm5497_vm1, %v5146_v37, %v5463_v19  ;;  %4087 = vrcp.f32 %v5513_v32  ;;  %v609_v33 = vpop.f32.mrf.mxu3 }
 0x124   :  { %3764 = vmatmul.msk.bf16.gmra.mxu3 %vm274_vm0, %v4754_v40  ;;  %v4084_v21 = vpop.eup %4083  ;;  %v2753_v39 = vmul.f32 %v5484_v29, %v2752_v51  ;;  %v5542_v56 = vor.u32 1.1754944e-38, %v952_v2  ;;  %v5544_v5 = vadd.f32 1.0, %v4080_v26  ;;  %v3394_v25 = vmul.f32 %v4082_v36, %v939_v62 }
 0x125   :  { %v1550_v15 = vmul.f32 %v4084_v21, %v5467_v54  ;;  %v3362_v40 = vadd.f32 %v3330_v0, %v3266_v28  ;;  %v2761_v43 = vand.u32 2147483648, %v5442_v7  ;;  %vm5547_vm12 = vcmp.eq.f32.partialorder %v950_v58, 8.507059e+37 }
 0x126   :  { %4089 = vtanh.f32 %v696_v23  ;;  %v4086_v49 = vpop.eup %4085  ;;  %vm2755_vm4 = vweird.f32 %v5442_v7  ;;  %vm2756_vm5 = vweird.f32 %v5484_v29  ;;  %vm5553_vm6 = vcmp.eq.f32.partialorder %v2759_v60, 8.507059e+37  ;;  %v433_v60 = vpop.f32.mrf.mxu1 }
 0x127   :  { %v1551_v41 = vsub.f32 1.0, %v1550_v15  ;;  %v3426_v38 = vadd.f32 %v3394_v25, %v3362_v40  ;;  %v1558_v1 = vand.u32 2147483647, %v5467_v54  ;;  %v1560_v2 = vand.u32 2147483648, %v5467_v54  ;;  %vm5568_vm8 = vmor %vm2755_vm4, %vm2756_vm5 }
 0x128   :  { %v2158_v58 = vmul.f32 %v4086_v49, %v5488_v22  ;;  %v2754_v3 = vadd.f32 %v5484_v29, %v2753_v39  ;;  %vm1555_vm7 = vweird.f32 %v4084_v21  ;;  %4091 = vrcp.f32 %v5544_v5 }
 0x129   :  { %v1552_v10 = vmul.f32 %v4084_v21, %v1551_v41  ;;  %v5562_v50 = vpop.eup %4087  ;;  %3458 = vst [vmem:[#allocation7 + $0x20] sm:$0xff] %v3426_v38  ;;  %4093 = vtanh.f32 %v3426_v38  ;;  %v2762_v59 = vor.u32 1.1754944e-38, %v2761_v43  ;;  %vm1554_vm9 = vweird.f32 %v5467_v54  ;;  %v3235_v38 = vld [vmem:[%s8160_s1 + $0x18] sm:$0xff] }
 0x12a   :  { %v2159_v30 = vsub.f32 1.0, %v2158_v58  ;;  %v2166_v26 = vand.u32 2147483647, %v5488_v22  ;;  %v2168_v20 = vand.u32 2147483648, %v5488_v22  ;;  %v2766_v51 = vmul.f32 %v5562_v50, %v5513_v32  ;;  %vm5578_vm10 = vmor %vm1554_vm9, %vm1555_vm7  ;;  %v3299_v58 = vld [vmem:[#allocation2 + $0x18] sm:$0xff] }
 0x12b   :  { %v1553_v23 = vadd.f32 %v4084_v21, %v1552_v10  ;;  %vm2163_vm11 = vweird.f32 %v4086_v49  ;;  %v521_v8 = vadd.f32 %v520_v4, %v5074_v24  ;;  %v610_v54 = vadd.f32 %v609_v33, %v5077_v14 }
 0x12c   :  { %v4090_v36 = vpop.eup %4089  ;;  %v2160_v62 = vmul.f32 %v4086_v49, %v2159_v30  ;;  %v2758_v28 = vsel %vm5568_vm8, %v5484_v29, %v2754_v3  ;;  %vm1559_vm15 = vcmp.eq.f32.partialorder %v1558_v1, 8.507059e+37  ;;  %v1561_v39 = vor.u32 1.1754944e-38, %v1560_v2 }
 0x12d   :  { %v1557_v0 = vsel %vm5578_vm10, %v4084_v21, %v1553_v23  ;;  %vm2162_vm13 = vweird.f32 %v5488_v22  ;;  %v3852_v25 = vmul.f32 -1.442695, %v521_v8  ;;  %v3884_v40 = vmul.f32 -1.442695, %v610_v54 }
 0x12e   :  { %v2161_v15 = vadd.f32 %v4086_v49, %v2160_v62  ;;  %v5590_v43 = vpop.eup %4091  ;;  %v1562_v41 = vsel %vm1559_vm15, %v1561_v39, %v1557_v0  ;;  %vm2164_vm14 = vmor %vm2162_vm13, %vm2163_vm11  ;;  %v2169_v29 = vor.u32 1.1754944e-38, %v2168_v20  ;;  %v2767_v3 = vsub.f32 1.0, %v2766_v51  ;;  %v522_v0 = vpop.f32.mrf.mxu2 }
 0x12f   :  { %v434_v21 = vadd.f32 %v433_v60, %v5046_v57  ;;  %v4094_v1 = vpop.eup %4093  ;;  %v2763_v22 = vsel %vm5553_vm6, %v2762_v59, %v2758_v28  ;;  %vm2167_vm2 = vcmp.eq.f32.partialorder %v2166_v26, 8.507059e+37  ;;  %4095 = vpow2.f32 %v3852_v25 }
 0x130   :  { %v2165_v2 = vsel %vm2164_vm14, %v4086_v49, %v2161_v15  ;;  %v3522_v10 = vmul.f32 %v4094_v1, %v2763_v22  ;;  %v954_v4 = vsel %vm5547_vm12, %v5542_v56, %v949_v6  ;;  %v8269_v17 = vsub.f32 1.0, %v5209_v31  ;;  %v698_v6 = vpop.f32.mrf.mxu0 }
 0x131   :  { %v2170_v33 = vsel %vm2167_vm2, %v2169_v29, %v2165_v2  ;;  %v3267_v44 = vmul.f32 %v3235_v38, %v1562_v41  ;;  %4097 = vpow2.f32 %v3884_v40  ;;  %v3821_v49 = vmul.f32 -1.442695, %v434_v21  ;;  %v611_v41 = vpop.f32.mrf.mxu3 }
 0x132   :  { %v959_v30 = vmul.f32 %v5169_v45, %v8269_v17  ;;  %v3331_v59 = vmul.f32 %v3299_v58, %v2170_v33  ;;  %3733 = vmatmul.msk.bf16.gmra.mxu1 %vm274_vm0, %v4794_v13  ;;  %3781 = vmatmul.msk.bf16.gmra.mxu0 %vm274_vm0, %v4794_v13  ;;  %4099 = vrcp.f32 %v5201_v18  ;;  %3554 = vst [vmem:[#allocation7 + $0x28] sm:$0xff] %v3522_v10  ;;  %vm961_vm1 = vweird.f32 %v5099_v46  ;;  %v436_v10 = vpop.f32.mrf.mxu1 }
 0x133   :  { %v2768_v37 = vmul.f32 %v5562_v50, %v2767_v3  ;;  %v1565_v31 = vmul.f32 %v5590_v43, %v5544_v5  ;;  %3749 = vmatmul.msk.bf16.gmra.mxu2 %vm274_vm0, %v4794_v13  ;;  %v3395_v19 = vmul.f32 %v4090_v36, %v954_v4  ;;  %vm962_vm3 = vweird.f32 %v5169_v45 }
 0x134   :  { %3765 = vmatmul.msk.bf16.gmra.mxu3 %vm274_vm0, %v4794_v13  ;;  %v3363_v27 = vadd.f32 %v3331_v59, %v3267_v44  ;;  %4101 = vpow2.f32 %v3821_v49  ;;  %v5626_v56 = vmul.f32 %v5097_v55, %v5038_v52  ;;  %v5629_v63 = vadd.f32 1.0, %v5140_v53  ;;  %vm5644_vm4 = vmor %vm961_vm1, %vm962_vm3 }
 0x135   :  { %v5632_v23 = vmul.f32 -1.442695, %v4953_v11  ;;  %4103 = vpow2.f32 %v5184_v16  ;;  %v4096_v26 = vpop.eup %4095  ;;  %v973_v13 = vsub.f32 1.0, %v5434_v61  ;;  %v5638_v51 = vadd.f32 %v5169_v45, %v959_v30 }
 0x136   :  { %4105 = vrcp.f32 %v5520_v34  ;;  %v3427_v20 = vadd.f32 %v3395_v19, %v3363_v27  ;;  %v2769_v36 = vadd.f32 %v5562_v50, %v2768_v37  ;;  %vm2771_vm12 = vweird.f32 %v5562_v50 }
 0x137   :  { %v1566_v53 = vsub.f32 1.0, %v1565_v31  ;;  %v5648_v16 = vadd.f32 1.0, %v4096_v26  ;;  %v4098_v61 = vpop.eup %4097  ;;  %v2776_v7 = vand.u32 2147483648, %v5513_v32  ;;  %v965_v62 = vand.u32 2147483647, %v5099_v46  ;;  %v8276_v26 = vld [vmem:[#allocation13_spill] sm:$0xff] }
 0x138   :  { %3459 = vst [vmem:[#allocation7 + $0x30] sm:$0xff] %v3427_v20  ;;  %4107 = vtanh.f32 %v3427_v20  ;;  %v967_v8 = vand.u32 2147483648, %v5099_v46  ;;  %v5653_v54 = vpop.eup %4099  ;;  %v5657_v60 = vmul.f32 %v5469_v47, %v5404_v9  ;;  %vm2770_vm5 = vweird.f32 %v5513_v32  ;;  %v700_v30 = vpop.f32.mrf.mxu0 }
 0x139   :  { %v2774_v28 = vand.u32 2147483647, %v5513_v32  ;;  %4109 = vrcp.f32 %v5648_v16  ;;  %vm5664_vm6 = vmor %vm2770_vm5, %vm2771_vm12  ;;  %v699_v46 = vadd.f32 %v698_v6, %v5113_v35  ;;  %v964_v25 = vsel %vm5644_vm4, %v5169_v45, %v5638_v51 }
 0x13a   :  { %v4102_v39 = vpop.eup %4101  ;;  %v5673_v40 = vadd.f32 1.0, %v4098_v61  ;;  %v523_v32 = vadd.f32 %v522_v0, %v5074_v24  ;;  %v2773_v29 = vsel %vm5664_vm6, %v5562_v50, %v2769_v36  ;;  %v1567_v58 = vmul.f32 %v5590_v43, %v1566_v53 }
 0x13b   :  { %v5676_v38 = vpop.eup %4103  ;;  %v5682_v3 = vadd.f32 1.0, %v4102_v39  ;;  %v612_v21 = vadd.f32 %v611_v41, %v5077_v14  ;;  %v2777_v45 = vor.u32 1.1754944e-38, %v2776_v7  ;;  %vm5687_vm7 = vcmp.eq.f32.partialorder %v965_v62, 8.507059e+37 }
 0x13c   :  { %v5685_v1 = vpop.eup %4105  ;;  %v968_v2 = vor.u32 1.1754944e-38, %v967_v8  ;;  %4111 = vrcp.f32 %v5673_v40  ;;  %vm2775_vm8 = vcmp.eq.f32.partialorder %v2774_v28, 8.507059e+37  ;;  %vm1569_vm9 = vweird.f32 %v5544_v5  ;;  %v8281_v8 = vld [vmem:[#allocation11_spill] sm:$0xff] }
 0x13d   :  { %v1573_v50 = vand.u32 2147483647, %v5544_v5  ;;  %4113 = vrcp.f32 %v5682_v3  ;;  %v2778_v33 = vsel %vm2775_vm8, %v2777_v45, %v2773_v29  ;;  %v1575_v17 = vand.u32 2147483648, %v5544_v5 }
 0x13e   :  { %v4108_v4 = vpop.eup %4107  ;;  %4115 = vtanh.f32 %v699_v46  ;;  %v3853_v44 = vmul.f32 -1.442695, %v523_v32  ;;  %v1568_v37 = vadd.f32 %v5590_v43, %v1567_v58  ;;  %vm1570_vm10 = vweird.f32 %v5590_v43  ;;  %v525_v32 = vpop.f32.mrf.mxu2 }
 0x13f   :  { %v4110_v59 = vpop.eup %4109  ;;  %v3523_v49 = vmul.f32 %v4108_v4, %v2778_v33  ;;  %v3885_v31 = vmul.f32 -1.442695, %v612_v21  ;;  %v5699_v19 = vmul.f32 -1.442695, %v4971_v42  ;;  %v437_v6 = vadd.f32 %v436_v10, %v5046_v57  ;;  %vm5712_vm11 = vmor %vm1569_vm9, %vm1570_vm10  ;;  %v3300_v10 = vld [vmem:[#allocation2 + $0x20] sm:$0xff] }
 0x140   :  { %v2173_v27 = vmul.f32 %v4110_v59, %v5648_v16  ;;  %4117 = vpow2.f32 %v3853_v44  ;;  %v5704_v20 = vmul.f32 -1.442695, %v8276_v26  ;;  %v988_v51 = vsub.f32 1.0, %v5657_v60 }
 0x141   :  { %3555 = vst [vmem:[#allocation7 + $0x38] sm:$0xff] %v3523_v49  ;;  %v974_v36 = vmul.f32 %v5268_v48, %v973_v13  ;;  %4119 = vpow2.f32 %v3885_v31  ;;  %vm5716_vm15 = vcmp.eq.f32.partialorder %v1573_v50, 8.507059e+37  ;;  %v969_v61 = vsel %vm5687_vm7, %v968_v2, %v964_v25  ;;  %v3236_v2 = vld [vmem:[%s8160_s1 + $0x20] sm:$0xff]  ;;  %v438_v31 = vpop.f32.mrf.mxu1 }
 0x142   :  { %v5708_v53 = vpop.eup %4111  ;;  %v2174_v7 = vsub.f32 1.0, %v2173_v27  ;;  %v3822_v62 = vmul.f32 -1.442695, %v437_v6  ;;  %3734 = vmatmul.msk.bf16.gmra.mxu1 %vm274_vm0, %v8281_v8  ;;  %3782 = vmatmul.msk.bf16.gmra.mxu0 %vm274_vm0, %v8281_v8  ;;  %v1572_v13 = vsel %vm5712_vm11, %v5590_v43, %v1568_v37  ;;  %v1576_v28 = vor.u32 1.1754944e-38, %v1575_v17  ;;  %v5759_v37 = vpop.f32.mrf.mxu0 }
 0x143   :  { %v5726_v5 = vpop.eup %4113  ;;  %v2183_v0 = vand.u32 2147483648, %v5648_v16  ;;  %v2781_v39 = vmul.f32 %v5708_v53, %v5673_v40  ;;  %3750 = vmatmul.msk.bf16.gmra.mxu2 %vm274_vm0, %v8281_v8  ;;  %vm2178_vm13 = vweird.f32 %v4110_v59  ;;  %v2181_v25 = vand.u32 2147483647, %v5648_v16 }
 0x144   :  { %3766 = vmatmul.msk.bf16.gmra.mxu3 %vm274_vm0, %v8281_v8  ;;  %v4116_v15 = vpop.eup %4115  ;;  %v2175_v46 = vmul.f32 %v4110_v59, %v2174_v7  ;;  %v1580_v43 = vmul.f32 %v5726_v5, %v5682_v3  ;;  %v701_v41 = vadd.f32 %v700_v30, %v5113_v35  ;;  %v5743_v29 = vadd.f32 %v5268_v48, %v974_v36  ;;  %v614_v30 = vpop.f32.mrf.mxu3 }
 0x145   :  { %vm976_vm14 = vweird.f32 %v5203_v12  ;;  %4121 = vpow2.f32 %v3822_v62  ;;  %v1577_v21 = vsel %vm5716_vm15, %v1576_v28, %v1572_v13  ;;  %vm2177_vm2 = vweird.f32 %v5648_v16 }
 0x146   :  { %v4118_v58 = vpop.eup %4117  ;;  %v2176_v45 = vadd.f32 %v4110_v59, %v2175_v46  ;;  %vm977_vm1 = vweird.f32 %v5268_v48  ;;  %vm2179_vm3 = vmor %vm2177_vm2, %vm2178_vm13  ;;  %v2184_v50 = vor.u32 1.1754944e-38, %v2183_v0  ;;  %v2782_v4 = vsub.f32 1.0, %v2781_v39 }
 0x147   :  { %v4120_v22 = vpop.eup %4119  ;;  %v5754_v33 = vadd.f32 1.0, %v4118_v58  ;;  %v526_v17 = vadd.f32 %v525_v32, %v5074_v24  ;;  %vm2182_vm12 = vcmp.eq.f32.partialorder %v2181_v25, 8.507059e+37  ;;  %v1581_v16 = vsub.f32 1.0, %v1580_v43  ;;  %vm5765_vm4 = vmor %vm976_vm14, %vm977_vm1 }
 0x148   :  { %v2180_v44 = vsel %vm2179_vm3, %v4110_v59, %v2176_v45  ;;  %v5757_v49 = vadd.f32 1.0, %v4120_v22  ;;  %v3396_v27 = vmul.f32 %v4116_v15, %v969_v61  ;;  %v980_v36 = vand.u32 2147483647, %v5203_v12 }
 0x149   :  { %v2185_v6 = vsel %vm2182_vm12, %v2184_v50, %v2180_v44  ;;  %4123 = vrcp.f32 %v5754_v33  ;;  %v3268_v59 = vmul.f32 %v3236_v2, %v1577_v21  ;;  %v982_v11 = vand.u32 2147483648, %v5203_v12 }
 0x14a   :  { %v3332_v42 = vmul.f32 %v3300_v10, %v2185_v6  ;;  %v615_v7 = vadd.f32 %v614_v30, %v5077_v14  ;;  %v2783_v62 = vmul.f32 %v5708_v53, %v2782_v4  ;;  %4125 = vrcp.f32 %v5757_v49  ;;  %v5817_v44 = vpop.f32.mrf.mxu0 }
 0x14b   :  { %v4122_v61 = vpop.eup %4121  ;;  %v3854_v8 = vmul.f32 -1.442695, %v526_v17  ;;  %v439_v13 = vadd.f32 %v438_v31, %v5046_v57  ;;  %v1582_v0 = vmul.f32 %v5726_v5, %v1581_v16  ;;  %v979_v39 = vsel %vm5765_vm4, %v5268_v48, %v5743_v29  ;;  %v8290_v16 = vld [vmem:[#allocation12_spill] sm:$0xff] }
 0x14c   :  { %v3364_v28 = vadd.f32 %v3332_v42, %v3268_v59  ;;  %v989_v12 = vmul.f32 %v5469_v47, %v988_v51  ;;  %vm2785_vm5 = vweird.f32 %v5673_v40  ;;  %vm2786_vm6 = vweird.f32 %v5708_v53 }
 0x14d   :  { %v2789_v15 = vand.u32 2147483647, %v5673_v40  ;;  %4127 = vtanh.f32 %v701_v41  ;;  %vm991_vm7 = vweird.f32 %v5404_v9  ;;  %v2791_v25 = vand.u32 2147483648, %v5673_v40  ;;  %vm5800_vm9 = vmor %vm2785_vm5, %vm2786_vm6  ;;  %v527_v40 = vpop.f32.mrf.mxu2 }
 0x14e   :  { %v3428_v46 = vadd.f32 %v3396_v27, %v3364_v28  ;;  %vm5789_vm8 = vcmp.eq.f32.partialorder %v980_v36, 8.507059e+37  ;;  %v5793_v32 = vadd.f32 1.0, %v4122_v61  ;;  %v3886_v60 = vmul.f32 -1.442695, %v615_v7 }
 0x14f   :  { %v4124_v51 = vpop.eup %4123  ;;  %v2784_v58 = vadd.f32 %v5708_v53, %v2783_v62  ;;  %v983_v21 = vor.u32 1.1754944e-38, %v982_v11  ;;  %4129 = vpow2.f32 %v3854_v8  ;;  %v3823_v45 = vmul.f32 -1.442695, %v439_v13 }
 0x150   :  { %3460 = vst [vmem:[#allocation7 + $0x40] sm:$0xff] %v3428_v46  ;;  %4131 = vtanh.f32 %v3428_v46  ;;  %v1583_v22 = vadd.f32 %v5726_v5, %v1582_v0  ;;  %vm1585_vm10 = vweird.f32 %v5726_v5  ;;  %v2188_v2 = vmul.f32 %v4124_v51, %v5754_v33  ;;  %v5807_v50 = vpop.eup %4125 }
 0x151   :  { %vm1584_vm11 = vweird.f32 %v5682_v3  ;;  %v1588_v10 = vand.u32 2147483647, %v5682_v3  ;;  %v1590_v4 = vand.u32 2147483648, %v5682_v3  ;;  %4133 = vrcp.f32 %v5793_v32 }
 0x152   :  { %vm5813_vm15 = vcmp.eq.f32.partialorder %v2789_v15, 8.507059e+37  ;;  %v2792_v17 = vor.u32 1.1754944e-38, %v2791_v25  ;;  %v2189_v30 = vsub.f32 1.0, %v2188_v2  ;;  %4135 = vpow2.f32 %v3886_v60  ;;  %3735 = vmatmul.msk.bf16.gmra.mxu1 %vm274_vm0, %v8290_v16  ;;  %3783 = vmatmul.msk.bf16.gmra.mxu0 %vm274_vm0, %v8290_v16  ;;  %vm5828_vm13 = vmor %vm1584_vm11, %vm1585_vm10  ;;  %v3301_v25 = vld [vmem:[#allocation2 + $0x28] sm:$0xff] }
 0x153   :  { %v4128_v31 = vpop.eup %4127  ;;  %v2788_v3 = vsel %vm5800_vm9, %v5708_v53, %v2784_v58  ;;  %v2198_v6 = vand.u32 2147483648, %v5754_v33  ;;  %v2796_v36 = vmul.f32 %v5807_v50, %v5757_v49  ;;  %4137 = vpow2.f32 %v3823_v45  ;;  %3751 = vmatmul.msk.bf16.gmra.mxu2 %vm274_vm0, %v8290_v16 }
 0x154   :  { %v1587_v59 = vsel %vm5828_vm13, %v5726_v5, %v1583_v22  ;;  %v2190_v42 = vmul.f32 %v4124_v51, %v2189_v30  ;;  %vm2193_vm14 = vweird.f32 %v4124_v51  ;;  %v2196_v53 = vand.u32 2147483647, %v5754_v33 }
 0x155   :  { %v4130_v11 = vpop.eup %4129  ;;  %vm1589_vm2 = vcmp.eq.f32.partialorder %v1588_v10, 8.507059e+37  ;;  %v1591_v7 = vor.u32 1.1754944e-38, %v1590_v4  ;;  %v5840_v61 = vadd.f32 %v5469_v47, %v989_v12  ;;  %vm992_vm1 = vweird.f32 %v5469_v47  ;;  %v3237_v12 = vld [vmem:[%s8160_s1 + $0x28] sm:$0xff] }
 0x156   :  { %v4132_v62 = vpop.eup %4131  ;;  %v2793_v8 = vsel %vm5813_vm15, %v2792_v17, %v2788_v3  ;;  %v2191_v13 = vadd.f32 %v4124_v51, %v2190_v42  ;;  %vm2192_vm3 = vweird.f32 %v5754_v33  ;;  %v5846_v5 = vadd.f32 1.0, %v4130_v11  ;;  %vm5864_vm6 = vmor %vm991_vm7, %vm992_vm1 }
 0x157   :  { %v5848_v28 = vpop.eup %4133  ;;  %v3524_v0 = vmul.f32 %v4132_v62, %v2793_v8  ;;  %v1592_v15 = vsel %vm1589_vm2, %v1591_v7, %v1587_v59  ;;  %vm2194_vm12 = vmor %vm2192_vm3, %vm2193_vm14  ;;  %v2199_v46 = vor.u32 1.1754944e-38, %v2198_v6  ;;  %v2797_v60 = vsub.f32 1.0, %v2796_v36  ;;  %v616_v59 = vpop.f32.mrf.mxu3  ;;  %3767 = vmatmul.msk.bf16.gmra.mxu3 %vm274_vm0, %v8290_v16 }
 0x158   :  { %v4136_v58 = vpop.eup %4135  ;;  %v5856_v45 = vmul.f32 %v5685_v1, %v5520_v34  ;;  %v2195_v33 = vsel %vm2194_vm12, %v4124_v51, %v2191_v13  ;;  %vm2197_vm5 = vcmp.eq.f32.partialorder %v2196_v53, 8.507059e+37  ;;  %v1595_v41 = vmul.f32 %v5848_v28, %v5793_v32  ;;  %v441_v13 = vpop.f32.mrf.mxu1 }
 0x159   :  { %v4138_v2 = vpop.eup %4137  ;;  %3556 = vst [vmem:[#allocation7 + $0x48] sm:$0xff] %v3524_v0  ;;  %v984_v51 = vsel %vm5789_vm8, %v983_v21, %v979_v39  ;;  %v2200_v10 = vsel %vm2197_vm5, %v2199_v46, %v2195_v33  ;;  %v995_v4 = vand.u32 2147483647, %v5404_v9  ;;  %4139 = vrcp.f32 %v5846_v5 }
 0x15a   :  { %v3269_v17 = vmul.f32 %v3237_v12, %v1592_v15  ;;  %v3333_v30 = vmul.f32 %v3301_v25, %v2200_v10  ;;  %v1596_v3 = vsub.f32 1.0, %v1595_v41  ;;  %v704_v26 = vadd.f32 %v5759_v37, %v5113_v35 }
 0x15b   :  { %v2798_v48 = vmul.f32 %v5807_v50, %v2797_v60  ;;  %v994_v29 = vsel %vm5864_vm6, %v5469_v47, %v5840_v61  ;;  %v5886_v39 = vadd.f32 1.0, %v4136_v58  ;;  %v5888_v43 = vadd.f32 1.0, %v4138_v2 }
 0x15c   :  { %v3397_v21 = vmul.f32 %v4128_v31, %v984_v51  ;;  %v3365_v27 = vadd.f32 %v3333_v30, %v3269_v17  ;;  %v1597_v6 = vmul.f32 %v5848_v28, %v1596_v3  ;;  %v997_v36 = vand.u32 2147483648, %v5404_v9 }
 0x15d   :  { %v2804_v37 = vand.u32 2147483647, %v5757_v49  ;;  %v2806_v42 = vand.u32 2147483648, %v5757_v49  ;;  %v1603_v53 = vand.u32 2147483647, %v5793_v32  ;;  %4141 = vrcp.f32 %v5886_v39 }
 0x15e   :  { %v3429_v11 = vadd.f32 %v3397_v21, %v3365_v27  ;;  %vm2801_vm4 = vweird.f32 %v5807_v50  ;;  %vm1599_vm7 = vweird.f32 %v5793_v32  ;;  %4143 = vtanh.f32 %v704_v26 }
 0x15f   :  { %v4140_v31 = vpop.eup %4139  ;;  %v2799_v7 = vadd.f32 %v5807_v50, %v2798_v48  ;;  %v1598_v62 = vadd.f32 %v5848_v28, %v1597_v6  ;;  %vm1600_vm0 = vweird.f32 %v5848_v28  ;;  %4145 = vrcp.f32 %v5888_v43 }
 0x160   :  { %3461 = vst [vmem:[#allocation7 + $0x50] sm:$0xff] %v3429_v11  ;;  %4147 = vtanh.f32 %v3429_v11  ;;  %vm2800_vm8 = vweird.f32 %v5757_v49  ;;  %v998_v16 = vor.u32 1.1754944e-38, %v997_v36  ;;  %v2203_v8 = vmul.f32 %v4140_v31, %v5846_v5  ;;  %vm5921_vm15 = vmor %vm1599_vm7, %vm1600_vm0 }
 0x161   :  { %vm5906_vm9 = vmor %vm2800_vm8, %vm2801_vm4  ;;  %vm5910_vm10 = vcmp.eq.f32.partialorder %v2804_v37, 8.507059e+37  ;;  %v2807_v12 = vor.u32 1.1754944e-38, %v2806_v42  ;;  %vm5914_vm11 = vcmp.eq.f32.partialorder %v1603_v53, 8.507059e+37  ;;  %v1605_v25 = vand.u32 2147483648, %v5793_v32  ;;  %v3238_v53 = vld [vmem:[%s8160_s1 + $0x30] sm:$0xff] }
 0x162   :  { %v2204_v60 = vsub.f32 1.0, %v2203_v8  ;;  %v2213_v58 = vand.u32 2147483648, %v5846_v5  ;;  %v528_v33 = vadd.f32 %v527_v40, %v5074_v24  ;;  %v617_v41 = vadd.f32 %v616_v59, %v5077_v14  ;;  %v8304_v8 = vld [vmem:[#allocation37_spill] sm:$0xff] }
 0x163   :  { %v5928_v2 = vpop.eup %4141  ;;  %v2803_v51 = vsel %vm5906_vm9, %v5807_v50, %v2799_v7  ;;  %v1602_v32 = vsel %vm5921_vm15, %v5848_v28, %v1598_v62  ;;  %v2211_v10 = vand.u32 2147483647, %v5846_v5  ;;  %v442_v17 = vadd.f32 %v441_v13, %v5046_v57  ;;  %v8303_v62 = vld [vmem:[#allocation32_spill] sm:$0xff] }
 0x164   :  { %v4144_v30 = vpop.eup %4143  ;;  %v2205_v3 = vmul.f32 %v4140_v31, %v2204_v60  ;;  %vm2208_vm13 = vweird.f32 %v4140_v31  ;;  %v2811_v40 = vmul.f32 %v5928_v2, %v5886_v39  ;;  %v3855_v26 = vmul.f32 -1.442695, %v528_v33 }
 0x165   :  { %v5940_v48 = vpop.eup %4145  ;;  %v1606_v21 = vor.u32 1.1754944e-38, %v1605_v25  ;;  %vm2207_vm14 = vweird.f32 %v5846_v5  ;;  %v3887_v50 = vmul.f32 -1.442695, %v617_v41  ;;  %v3824_v27 = vmul.f32 -1.442695, %v442_v17  ;;  %v3302_v5 = vld [vmem:[#allocation2 + $0x30] sm:$0xff] }
 0x166   :  { %v4148_v6 = vpop.eup %4147  ;;  %v2808_v28 = vsel %vm5910_vm10, %v2807_v12, %v2803_v51  ;;  %v2206_v36 = vadd.f32 %v4140_v31, %v2205_v3  ;;  %v2214_v59 = vor.u32 1.1754944e-38, %v2213_v58  ;;  %4149 = vpow2.f32 %v3855_v26  ;;  %vm2209_vm2 = vmor %vm2207_vm14, %vm2208_vm13  ;;  %v8305_v12 = vld [vmem:[#allocation39_spill] sm:$0xff]  ;;  %v530_v3 = vpop.f32.mrf.mxu2  ;;  %v8309_v26 = vld [vmem:[#allocation36_spill] sm:$0xff] }
 0x167   :  { %v3525_v37 = vmul.f32 %v4148_v6, %v2808_v28  ;;  %v1607_v42 = vsel %vm5914_vm11, %v1606_v21, %v1602_v32  ;;  %v2812_v11 = vsub.f32 1.0, %v2811_v40  ;;  %4151 = vpow2.f32 %v3887_v50 }
 0x168   :  { %vm996_vm1 = vcmp.eq.f32.partialorder %v995_v4, 8.507059e+37  ;;  %v2210_v7 = vsel %vm2209_vm2, %v4140_v31, %v2206_v36  ;;  %vm2212_vm3 = vcmp.eq.f32.partialorder %v2211_v10, 8.507059e+37  ;;  %4153 = vpow2.f32 %v3824_v27  ;;  %v8306_v31 = vld [vmem:[#allocation14_spill] sm:$0xff] }
 0x169   :  { %v5955_v13 = vmul.f32 %v8304_v8, %v8303_v62  ;;  %4155 = vpow2.f32 %v5632_v23  ;;  %3557 = vst [vmem:[#allocation7 + $0x58] sm:$0xff] %v3525_v37  ;;  %v2215_v0 = vsel %vm2212_vm3, %v2214_v59, %v2210_v7  ;;  %v1610_v15 = vmul.f32 %v5940_v48, %v5888_v43 }
 0x16a   :  { %4157 = vrcp.f32 %v5629_v63  ;;  %v5962_v46 = vadd.f32 1.0, %v8305_v12  ;;  %v3270_v9 = vmul.f32 %v3238_v53, %v1607_v42  ;;  %v3334_v4 = vmul.f32 %v3302_v5, %v2215_v0 }
 0x16b   :  { %4159 = vpow2.f32 %v5699_v19  ;;  %v3797_v25 = vmul.f32 -1.442695, %v8306_v31  ;;  %v999_v23 = vsel %vm996_vm1, %v998_v16, %v994_v29  ;;  %v2813_v49 = vmul.f32 %v5928_v2, %v2812_v11  ;;  %v8308_v16 = vld [vmem:[#allocation30_spill] sm:$0xff] }
 0x16c   :  { %v4150_v60 = vpop.eup %4149  ;;  %4161 = vpow2.f32 %v5704_v20  ;;  %v1003_v58 = vsub.f32 1.0, %v5856_v45  ;;  %v3398_v33 = vmul.f32 %v4144_v30, %v999_v23  ;;  %v3366_v41 = vadd.f32 %v3334_v4, %v3270_v9  ;;  %v8307_v45 = vld [vmem:[#allocation23_spill] sm:$0xff]  ;;  %v619_v23 = vpop.f32.mrf.mxu3 }
 0x16d   :  { %v4152_v51 = vpop.eup %4151  ;;  %vm2815_vm12 = vweird.f32 %v5886_v39  ;;  %vm2816_vm5 = vweird.f32 %v5928_v2  ;;  %v1611_v19 = vsub.f32 1.0, %v1610_v15  ;;  %v5976_v22 = vadd.f32 1.0, %v4150_v60 }
 0x16e   :  { %v4154_v32 = vpop.eup %4153  ;;  %4163 = vrcp.f32 %v5962_v46  ;;  %v3430_v47 = vadd.f32 %v3398_v33, %v3366_v41  ;;  %v2821_v61 = vand.u32 2147483648, %v5886_v39  ;;  %v5980_v29 = vadd.f32 1.0, %v4152_v51  ;;  %vm6002_vm6 = vmor %vm2815_vm12, %vm2816_vm5 }
 0x16f   :  { %v5982_v20 = vpop.eup %4155  ;;  %v5986_v10 = vmul.f32 %v8308_v16, %v8307_v45  ;;  %v2814_v17 = vadd.f32 %v5928_v2, %v2813_v49  ;;  %v2819_v30 = vand.u32 2147483647, %v5886_v39  ;;  %4165 = vrcp.f32 %v5976_v22 }
 0x170   :  { %v5991_v40 = vpop.eup %4157  ;;  %v1138_v21 = vsub.f32 1.0, %v8309_v26  ;;  %v1033_v50 = vsub.f32 1.0, %v5626_v56  ;;  %v5996_v27 = vadd.f32 1.0, %v5676_v38  ;;  %3462 = vst [vmem:[#allocation7 + $0x60] sm:$0xff] %v3430_v47  ;;  %4167 = vtanh.f32 %v3430_v47 }
 0x171   :  { %v6006_v28 = vpop.eup %4159  ;;  %v1612_v36 = vmul.f32 %v5940_v48, %v1611_v19  ;;  %v1004_v59 = vmul.f32 %v5685_v1, %v1003_v58  ;;  %4169 = vrcp.f32 %v5980_v29  ;;  %v6011_v38 = vadd.f32 1.0, %v4154_v32 }
 0x172   :  { %v6013_v37 = vpop.eup %4161  ;;  %v1048_v42 = vsub.f32 1.0, %v5955_v13  ;;  %4171 = vpow2.f32 %v3797_v25  ;;  %v2822_v39 = vor.u32 1.1754944e-38, %v2821_v61  ;;  %v531_v53 = vadd.f32 %v530_v3, %v5074_v24 }
 0x173   :  { %v6019_v5 = vmul.f32 %v5991_v40, %v5629_v63  ;;  %v2818_v11 = vsel %vm6002_vm6, %v5928_v2, %v2814_v17  ;;  %vm2820_vm4 = vcmp.eq.f32.partialorder %v2819_v30, 8.507059e+37  ;;  %4173 = vrcp.f32 %v6011_v38 }
 0x174   :  { %v6025_v7 = vpop.eup %4163  ;;  %v706_v0 = vadd.f32 %v5817_v44, %v5113_v35  ;;  %vm1006_vm7 = vweird.f32 %v5520_v34  ;;  %vm1007_vm0 = vweird.f32 %v5685_v1  ;;  %v3856_v15 = vmul.f32 -1.442695, %v531_v53 }
 0x175   :  { %v4166_v12 = vpop.eup %4165  ;;  %4175 = vrcp.f32 %v5996_v27  ;;  %v1613_v9 = vadd.f32 %v5940_v48, %v1612_v36  ;;  %vm1615_vm8 = vweird.f32 %v5940_v48  ;;  %v6035_v2 = vadd.f32 %v5685_v1, %v1004_v59  ;;  %vm6047_vm10 = vmor %vm1006_vm7, %vm1007_vm0 }
 0x176   :  { %v4168_v4 = vpop.eup %4167  ;;  %v2823_v31 = vsel %vm2820_vm4, %v2822_v39, %v2818_v11  ;;  %v1010_v25 = vand.u32 2147483647, %v5520_v34  ;;  %v2218_v44 = vmul.f32 %v4166_v12, %v5976_v22  ;;  %4177 = vpow2.f32 %v3856_v15  ;;  %v8316_v11 = vld [vmem:[#allocation31_spill] sm:$0xff]  ;;  %v8318_v15 = vld [vmem:[#allocation28_spill] sm:$0xff] }
 0x177   :  { %v6039_v49 = vpop.eup %4169  ;;  %v3526_v60 = vmul.f32 %v4168_v4, %v2823_v31  ;;  %vm1614_vm9 = vweird.f32 %v5888_v43  ;;  %v1620_v58 = vand.u32 2147483648, %v5888_v43  ;;  %v620_v41 = vadd.f32 %v619_v23, %v5077_v14 }
 0x178   :  { %v4172_v51 = vpop.eup %4171  ;;  %vm6054_vm11 = vmor %vm1614_vm9, %vm1615_vm8  ;;  %v1618_v32 = vand.u32 2147483647, %v5888_v43  ;;  %v1012_v47 = vand.u32 2147483648, %v5520_v34  ;;  %4179 = vtanh.f32 %v706_v0  ;;  %v2219_v61 = vsub.f32 1.0, %v2218_v44 }
 0x179   :  { %v6060_v17 = vpop.eup %4173  ;;  %3558 = vst [vmem:[#allocation7 + $0x68] sm:$0xff] %v3526_v60  ;;  %v1617_v30 = vsel %vm6054_vm11, %v5940_v48, %v1613_v9  ;;  %v2228_v3 = vand.u32 2147483648, %v5976_v22  ;;  %v2826_v6 = vmul.f32 %v6039_v49, %v5980_v29  ;;  %v3888_v36 = vmul.f32 -1.442695, %v620_v41  ;;  %v3239_v60 = vld [vmem:[%s8160_s1 + $0x38] sm:$0xff] }
 0x17a   :  { %v2220_v59 = vmul.f32 %v4166_v12, %v2219_v61  ;;  %vm2223_vm15 = vweird.f32 %v4166_v12  ;;  %v2226_v43 = vand.u32 2147483647, %v5976_v22  ;;  %v1625_v34 = vmul.f32 %v6060_v17, %v6011_v38 }
 0x17b   :  { %v6071_v39 = vpop.eup %4175  ;;  %v1621_v53 = vor.u32 1.1754944e-38, %v1620_v58  ;;  %v1009_v48 = vsel %vm6047_vm10, %v5685_v1, %v6035_v2  ;;  %v8317_v0 = vsub.f32 1.0, %v8316_v11  ;;  %4181 = vpow2.f32 %v3888_v36  ;;  %v3303_v1 = vld [vmem:[#allocation2 + $0x38] sm:$0xff]  ;;  %v8322_v11 = vld [vmem:[#allocation20_spill] sm:$0xff] }
 0x17c   :  { %v4178_v4 = vpop.eup %4177  ;;  %vm1619_vm13 = vcmp.eq.f32.partialorder %v1618_v32, 8.507059e+37  ;;  %v1013_v31 = vor.u32 1.1754944e-38, %v1012_v47  ;;  %v2221_v44 = vadd.f32 %v4166_v12, %v2220_v59  ;;  %vm2222_vm14 = vweird.f32 %v5976_v22  ;;  %v708_v47 = vpop.f32.mrf.mxu0 }
 0x17d   :  { %v1019_v9 = vmul.f32 %v8318_v15, %v8317_v0  ;;  %v1622_v23 = vsel %vm1619_vm13, %v1621_v53, %v1617_v30  ;;  %vm2224_vm2 = vmor %vm2222_vm14, %vm2223_vm15  ;;  %v2229_v58 = vor.u32 1.1754944e-38, %v2228_v3  ;;  %v2827_v2 = vsub.f32 1.0, %v2826_v6  ;;  %v8321_v30 = vld [vmem:[#allocation17_spill] sm:$0xff]  ;;  %v443_v3 = vpop.f32.mrf.mxu1 }
 0x17e   :  { %v6085_v33 = vadd.f32 1.0, %v4178_v4  ;;  %v4180_v41 = vpop.eup %4179  ;;  %vm6087_vm1 = vcmp.eq.f32.partialorder %v1010_v25, 8.507059e+37  ;;  %v2225_v32 = vsel %vm2224_vm2, %v4166_v12, %v2221_v44  ;;  %vm2227_vm3 = vcmp.eq.f32.partialorder %v2226_v43, 8.507059e+37  ;;  %v532_v12 = vpop.f32.mrf.mxu2 }
 0x17f   :  { %v1626_v22 = vsub.f32 1.0, %v1625_v34  ;;  %v6091_v61 = vadd.f32 1.0, %v4172_v51  ;;  %v6094_v36 = vmul.f32 -1.442695, %v8321_v30  ;;  %v2230_v59 = vsel %vm2227_vm3, %v2229_v58, %v2225_v32 }
 0x180   :  { %4183 = vrcp.f32 %v6085_v33  ;;  %v3271_v6 = vmul.f32 %v3239_v60, %v1622_v23  ;;  %v3335_v53 = vmul.f32 %v3303_v1, %v2230_v59  ;;  %v6098_v25 = vadd.f32 %v8318_v15, %v1019_v9 }
 0x181   :  { %v1025_v0 = vand.u32 2147483647, %v8322_v11  ;;  %v4182_v43 = vpop.eup %4181  ;;  %v1014_v51 = vsel %vm6087_vm1, %v1013_v31, %v1009_v48  ;;  %v2828_v34 = vmul.f32 %v6039_v49, %v2827_v2  ;;  %v709_v4 = vadd.f32 %v708_v47, %v5113_v35 }
 0x182   :  { %vm1021_vm12 = vweird.f32 %v8322_v11  ;;  %vm1022_vm5 = vweird.f32 %v8318_v15  ;;  %v444_v44 = vadd.f32 %v443_v3, %v5046_v57  ;;  %v3399_v23 = vmul.f32 %v4180_v41, %v1014_v51 }
 0x183   :  { %v3367_v9 = vadd.f32 %v3335_v53, %v3271_v6  ;;  %v1627_v60 = vmul.f32 %v6060_v17, %v1626_v22  ;;  %v6109_v58 = vadd.f32 1.0, %v4182_v43  ;;  %v2834_v1 = vand.u32 2147483647, %v5980_v29  ;;  %vm6163_vm14 = vmor %vm1021_vm12, %vm1022_vm5 }
 0x184   :  { %v2836_v48 = vand.u32 2147483648, %v5980_v29  ;;  %v3825_v31 = vmul.f32 -1.442695, %v444_v44  ;;  %v533_v2 = vadd.f32 %v532_v12, %v5074_v24  ;;  %vm1629_vm6 = vweird.f32 %v6011_v38  ;;  %v3240_v12 = vld [vmem:[%s8160_s1 + $0x40] sm:$0xff] }
 0x185   :  { %v3431_v19 = vadd.f32 %v3399_v23, %v3367_v9  ;;  %v1633_v32 = vand.u32 2147483647, %v6011_v38  ;;  %4185 = vrcp.f32 %v6109_v58  ;;  %v2829_v47 = vadd.f32 %v6039_v49, %v2828_v34  ;;  %v621_v34 = vpop.f32.mrf.mxu3 }
 0x186   :  { %v4184_v41 = vpop.eup %4183  ;;  %vm2831_vm4 = vweird.f32 %v6039_v49  ;;  %4187 = vpow2.f32 %v3825_v31  ;;  %v3857_v22 = vmul.f32 -1.442695, %v533_v2  ;;  %v1628_v30 = vadd.f32 %v6060_v17, %v1627_v60 }
 0x187   :  { %3463 = vst [vmem:[#allocation7 + $0x70] sm:$0xff] %v3431_v19  ;;  %4189 = vtanh.f32 %v3431_v19  ;;  %vm1630_vm7 = vweird.f32 %v6060_v17  ;;  %v2233_v59 = vmul.f32 %v4184_v41, %v6085_v33  ;;  %vm2830_vm0 = vweird.f32 %v5980_v29 }
 0x188   :  { %v1635_v3 = vand.u32 2147483648, %v6011_v38  ;;  %v1027_v6 = vand.u32 2147483648, %v8322_v11  ;;  %4191 = vpow2.f32 %v3857_v22  ;;  %vm6125_vm8 = vmor %vm2830_vm0, %vm2831_vm4  ;;  %vm6129_vm9 = vcmp.eq.f32.partialorder %v2834_v1, 8.507059e+37 }
 0x189   :  { %4193 = vtanh.f32 %v709_v4  ;;  %v2234_v43 = vsub.f32 1.0, %v2233_v59  ;;  %v2243_v51 = vand.u32 2147483648, %v6085_v33  ;;  %v2833_v29 = vsel %vm6125_vm8, %v6039_v49, %v2829_v47  ;;  %vm6139_vm10 = vmor %vm1629_vm6, %vm1630_vm7 }
 0x18a   :  { %v2837_v44 = vor.u32 1.1754944e-38, %v2836_v48  ;;  %vm6143_vm11 = vcmp.eq.f32.partialorder %v1633_v32, 8.507059e+37  ;;  %v622_v4 = vadd.f32 %v621_v34, %v5077_v14  ;;  %v1632_v1 = vsel %vm6139_vm10, %v6060_v17, %v1628_v30 }
 0x18b   :  { %v6148_v60 = vpop.eup %4185  ;;  %v2235_v49 = vmul.f32 %v4184_v41, %v2234_v43  ;;  %vm2238_vm15 = vweird.f32 %v4184_v41  ;;  %v2241_v38 = vand.u32 2147483647, %v6085_v33  ;;  %v1636_v31 = vor.u32 1.1754944e-38, %v1635_v3  ;;  %v3304_v43 = vld [vmem:[#allocation2 + $0x40] sm:$0xff] }
 0x18c   :  { %v4188_v48 = vpop.eup %4187  ;;  %vm2237_vm13 = vweird.f32 %v6085_v33  ;;  %v2841_v2 = vmul.f32 %v6148_v60, %v6109_v58  ;;  %v3889_v19 = vmul.f32 -1.442695, %v622_v4  ;;  %v2838_v47 = vsel %vm6129_vm9, %v2837_v44, %v2833_v29  ;;  %v710_v29 = vpop.f32.mrf.mxu0 }
 0x18d   :  { %v4190_v32 = vpop.eup %4189  ;;  %v2236_v22 = vadd.f32 %v4184_v41, %v2235_v49  ;;  %v2244_v30 = vor.u32 1.1754944e-38, %v2243_v51  ;;  %v6167_v59 = vadd.f32 1.0, %v4188_v48  ;;  %v1637_v53 = vsel %vm6143_vm11, %v1636_v31, %v1632_v1  ;;  %vm2239_vm2 = vmor %vm2237_vm13, %vm2238_vm15 }
 0x18e   :  { %v4192_v33 = vpop.eup %4191  ;;  %v3527_v3 = vmul.f32 %v4190_v32, %v2838_v47  ;;  %v2842_v34 = vsub.f32 1.0, %v2841_v2  ;;  %4195 = vpow2.f32 %v3889_v19  ;;  %v1024_v51 = vsel %vm6163_vm14, %v8318_v15, %v6098_v25 }
 0x18f   :  { %v4194_v44 = vpop.eup %4193  ;;  %v2240_v23 = vsel %vm2239_vm2, %v4184_v41, %v2236_v22  ;;  %vm2242_vm1 = vcmp.eq.f32.partialorder %v2241_v38, 8.507059e+37  ;;  %4197 = vrcp.f32 %v6167_v59  ;;  %v1028_v9 = vor.u32 1.1754944e-38, %v1027_v6  ;;  %v446_v38 = vpop.f32.mrf.mxu1 }
 0x190   :  { %4199 = vrcp.f32 %v6091_v61  ;;  %3559 = vst [vmem:[#allocation7 + $0x78] sm:$0xff] %v3527_v3  ;;  %v2245_v4 = vsel %vm2242_vm1, %v2244_v30, %v2240_v23  ;;  %v6181_v1 = vadd.f32 1.0, %v4192_v33  ;;  %v3272_v49 = vmul.f32 %v3240_v12, %v1637_v53 }
 0x191   :  { %vm1026_vm3 = vcmp.eq.f32.partialorder %v1025_v0, 8.507059e+37  ;;  %v3336_v48 = vmul.f32 %v3304_v43, %v2245_v4  ;;  %v711_v31 = vadd.f32 %v710_v29, %v5113_v35  ;;  %v1063_v15 = vsub.f32 1.0, %v6019_v5  ;;  %v535_v0 = vpop.f32.mrf.mxu2 }
 0x192   :  { %v1029_v25 = vsel %vm1026_vm3, %v1028_v9, %v1024_v51  ;;  %v2843_v41 = vmul.f32 %v6148_v60, %v2842_v34  ;;  %4201 = vrcp.f32 %v6181_v1  ;;  %v1034_v19 = vmul.f32 %v5097_v55, %v1033_v50 }
 0x193   :  { %v3400_v2 = vmul.f32 %v4194_v44, %v1029_v25  ;;  %v3368_v6 = vadd.f32 %v3336_v48, %v3272_v49  ;;  %v447_v11 = vadd.f32 %v446_v38, %v5046_v57  ;;  %4203 = vpow2.f32 %v6094_v36 }
 0x194   :  { %v4196_v32 = vpop.eup %4195  ;;  %vm2845_vm12 = vweird.f32 %v6109_v58  ;;  %vm2846_vm5 = vweird.f32 %v6148_v60  ;;  %v536_v47 = vadd.f32 %v535_v0, %v5074_v24  ;;  %v2849_v30 = vand.u32 2147483647, %v6109_v58  ;;  %v624_v0 = vpop.f32.mrf.mxu3 }
 0x195   :  { %v4198_v17 = vpop.eup %4197  ;;  %v3432_v22 = vadd.f32 %v3400_v2, %v3368_v6  ;;  %v2851_v56 = vand.u32 2147483648, %v6109_v58  ;;  %4205 = vtanh.f32 %v711_v31  ;;  %v2844_v33 = vadd.f32 %v6148_v60, %v2843_v41  ;;  %vm6213_vm6 = vmor %vm2845_vm12, %vm2846_vm5 }
 0x196   :  { %v6199_v50 = vpop.eup %4199  ;;  %v1640_v3 = vmul.f32 %v4198_v17, %v6167_v59  ;;  %v6203_v36 = vadd.f32 1.0, %v4196_v32  ;;  %v3826_v53 = vmul.f32 -1.442695, %v447_v11  ;;  %v6207_v12 = vmul.f32 %v6071_v39, %v5996_v27 }
 0x197   :  { %3464 = vst [vmem:[#allocation7 + $0x80] sm:$0xff] %v3432_v22  ;;  %4207 = vtanh.f32 %v3432_v22  ;;  %v6218_v34 = vadd.f32 %v5097_v55, %v1034_v19  ;;  %v3858_v29 = vmul.f32 -1.442695, %v536_v47  ;;  %vm1036_vm4 = vweird.f32 %v5038_v52 }
 0x198   :  { %v4202_v44 = vpop.eup %4201  ;;  %v1641_v51 = vsub.f32 1.0, %v1640_v3  ;;  %vm1037_vm7 = vweird.f32 %v5097_v55  ;;  %4209 = vrcp.f32 %v6203_v36  ;;  %vm6223_vm0 = vcmp.eq.f32.partialorder %v2849_v30, 8.507059e+37 }
 0x199   :  { %v2852_v58 = vor.u32 1.1754944e-38, %v2851_v56  ;;  %v2248_v9 = vmul.f32 %v4202_v44, %v6181_v1  ;;  %4211 = vpow2.f32 %v3826_v53  ;;  %v6228_v4 = vpop.eup %4203  ;;  %v2848_v49 = vsel %vm6213_vm6, %v6148_v60, %v2844_v33  ;;  %vm6258_vm13 = vmor %vm1036_vm4, %vm1037_vm7 }
 0x19a   :  { %v1642_v48 = vmul.f32 %v4198_v17, %v1641_v51  ;;  %vm1645_vm8 = vweird.f32 %v4198_v17  ;;  %v1650_v31 = vand.u32 2147483648, %v6167_v59  ;;  %v1648_v41 = vand.u32 2147483647, %v6167_v59 }
 0x19b   :  { %v4206_v25 = vpop.eup %4205  ;;  %v1040_v38 = vand.u32 2147483647, %v5038_v52  ;;  %v2249_v2 = vsub.f32 1.0, %v2248_v9  ;;  %4213 = vpow2.f32 %v3858_v29  ;;  %vm1644_vm9 = vweird.f32 %v6167_v59  ;;  %v3241_v29 = vld [vmem:[%s8160_s1 + $0x48] sm:$0xff] }
 0x19c   :  { %v1643_v6 = vadd.f32 %v4198_v17, %v1642_v48  ;;  %v2256_v19 = vand.u32 2147483647, %v6181_v1  ;;  %v2258_v11 = vand.u32 2147483648, %v6181_v1  ;;  %v2853_v32 = vsel %vm6223_vm0, %v2852_v58, %v2848_v49  ;;  %vm6241_vm10 = vmor %vm1644_vm9, %vm1645_vm8  ;;  %v3305_v49 = vld [vmem:[#allocation2 + $0x48] sm:$0xff] }
 0x19d   :  { %v4208_v60 = vpop.eup %4207  ;;  %v2250_v22 = vmul.f32 %v4202_v44, %v2249_v2  ;;  %vm2253_vm11 = vweird.f32 %v4202_v44  ;;  %v625_v30 = vadd.f32 %v624_v0, %v5077_v14  ;;  %v1651_v3 = vor.u32 1.1754944e-38, %v1650_v31 }
 0x19e   :  { %v6246_v56 = vpop.eup %4209  ;;  %v3528_v59 = vmul.f32 %v4208_v60, %v2853_v32  ;;  %v1647_v33 = vsel %vm6241_vm10, %v4198_v17, %v1643_v6  ;;  %v1042_v53 = vand.u32 2147483648, %v5038_v52  ;;  %vm1649_vm15 = vcmp.eq.f32.partialorder %v1648_v41, 8.507059e+37  ;;  %v8341_v6 = vld [vmem:[#allocation21_spill] sm:$0xff] }
 0x19f   :  { %v4212_v43 = vpop.eup %4211  ;;  %v2251_v23 = vadd.f32 %v4202_v44, %v2250_v22  ;;  %vm2252_vm14 = vweird.f32 %v6181_v1  ;;  %v2856_v17 = vmul.f32 %v6246_v56, %v6203_v36  ;;  %v1652_v58 = vsel %vm1649_vm15, %v1651_v3, %v1647_v33  ;;  %v448_v33 = vpop.f32.mrf.mxu1 }
 0x1a0   :  { %3560 = vst [vmem:[#allocation7 + $0x88] sm:$0xff] %v3528_v59  ;;  %vm2254_vm2 = vmor %vm2252_vm14, %vm2253_vm11  ;;  %v2259_v9 = vor.u32 1.1754944e-38, %v2258_v11  ;;  %v6266_v48 = vadd.f32 1.0, %v4212_v43  ;;  %v3890_v31 = vmul.f32 -1.442695, %v625_v30  ;;  %v1039_v41 = vsel %vm6258_vm13, %v5097_v55, %v6218_v34 }
 0x1a1   :  { %v4214_v52 = vpop.eup %4213  ;;  %v2255_v2 = vsel %vm2254_vm2, %v4202_v44, %v2251_v23  ;;  %vm2257_vm1 = vcmp.eq.f32.partialorder %v2256_v19, 8.507059e+37  ;;  %v2857_v1 = vsub.f32 1.0, %v2856_v17  ;;  %v3799_v0 = vmul.f32 -1.442695, %v8341_v6 }
 0x1a2   :  { %v1043_v60 = vor.u32 1.1754944e-38, %v1042_v53  ;;  %v2260_v32 = vsel %vm2257_vm1, %v2259_v9, %v2255_v2  ;;  %4215 = vrcp.f32 %v6266_v48  ;;  %v3273_v11 = vmul.f32 %v3241_v29, %v1652_v58  ;;  %v537_v53 = vpop.f32.mrf.mxu2  ;;  %v713_v29 = vpop.f32.mrf.mxu0 }
 0x1a3   :  { %vm1041_vm3 = vcmp.eq.f32.partialorder %v1040_v38, 8.507059e+37  ;;  %v3337_v47 = vmul.f32 %v3305_v49, %v2260_v32  ;;  %v6274_v22 = vadd.f32 1.0, %v4214_v52  ;;  %v2858_v59 = vmul.f32 %v6246_v56, %v2857_v1 }
 0x1a4   :  { %v1044_v30 = vsel %vm1041_vm3, %v1043_v60, %v1039_v41  ;;  %v1049_v55 = vmul.f32 %v8304_v8, %v1048_v42  ;;  %4217 = vpow2.f32 %v3890_v31  ;;  %v1078_v34 = vsub.f32 1.0, %v6207_v12 }
 0x1a5   :  { %v3401_v44 = vmul.f32 %v4206_v25, %v1044_v30  ;;  %v3369_v19 = vadd.f32 %v3337_v47, %v3273_v11  ;;  %4219 = vrcp.f32 %v6274_v22  ;;  %v6284_v38 = vmul.f32 %v6199_v50, %v6091_v61 }
 0x1a6   :  { %v6287_v3 = vadd.f32 1.0, %v6228_v4  ;;  %4221 = vpow2.f32 %v3799_v0  ;;  %v449_v13 = vadd.f32 %v448_v33, %v5046_v57  ;;  %v2866_v43 = vand.u32 2147483648, %v6203_v36 }
 0x1a7   :  { %v3433_v42 = vadd.f32 %v3401_v44, %v3369_v19  ;;  %vm1051_vm12 = vweird.f32 %v8303_v62  ;;  %v538_v25 = vadd.f32 %v537_v53, %v5074_v24  ;;  %v2859_v23 = vadd.f32 %v6246_v56, %v2858_v59  ;;  %v626_v44 = vpop.f32.mrf.mxu3 }
 0x1a8   :  { %v4216_v51 = vpop.eup %4215  ;;  %vm2861_vm5 = vweird.f32 %v6246_v56  ;;  %v6296_v4 = vadd.f32 %v8304_v8, %v1049_v55  ;;  %v3827_v17 = vmul.f32 -1.442695, %v449_v13  ;;  %vm1052_vm6 = vweird.f32 %v8304_v8 }
 0x1a9   :  { %3465 = vst [vmem:[#allocation7 + $0x90] sm:$0xff] %v3433_v42  ;;  %4223 = vtanh.f32 %v3433_v42  ;;  %v1655_v58 = vmul.f32 %v4216_v51, %v6266_v48  ;;  %v3859_v9 = vmul.f32 -1.442695, %v538_v25  ;;  %vm2860_vm4 = vweird.f32 %v6203_v36  ;;  %vm6336_vm13 = vmor %vm1051_vm12, %vm1052_vm6 }
 0x1aa   :  { %v4218_v49 = vpop.eup %4217  ;;  %v2864_v31 = vand.u32 2147483647, %v6203_v36  ;;  %v714_v52 = vadd.f32 %v713_v29, %v5113_v35  ;;  %4225 = vpow2.f32 %v3827_v17  ;;  %vm6303_vm7 = vmor %vm2860_vm4, %vm2861_vm5  ;;  %v2867_v1 = vor.u32 1.1754944e-38, %v2866_v43 }
 0x1ab   :  { %v4220_v41 = vpop.eup %4219  ;;  %v1656_v6 = vsub.f32 1.0, %v1655_v58  ;;  %v1057_v0 = vand.u32 2147483648, %v8303_v62  ;;  %v6308_v60 = vadd.f32 1.0, %v4218_v49  ;;  %v2863_v11 = vsel %vm6303_vm7, %v6246_v56, %v2859_v23 }
 0x1ac   :  { %v4222_v32 = vpop.eup %4221  ;;  %vm1659_vm0 = vweird.f32 %v6266_v48  ;;  %v2263_v36 = vmul.f32 %v4220_v41, %v6274_v22  ;;  %4227 = vpow2.f32 %v3859_v9  ;;  %vm1660_vm8 = vweird.f32 %v4216_v51 }
 0x1ad   :  { %v1657_v47 = vmul.f32 %v4216_v51, %v1656_v6  ;;  %v1665_v30 = vand.u32 2147483648, %v6266_v48  ;;  %4229 = vrcp.f32 %v6308_v60  ;;  %vm2865_vm9 = vcmp.eq.f32.partialorder %v2864_v31, 8.507059e+37  ;;  %vm6323_vm10 = vmor %vm1659_vm0, %vm1660_vm8  ;;  %v3242_v6 = vld [vmem:[%s8160_s1 + $0x50] sm:$0xff] }
 0x1ae   :  { %v1663_v59 = vand.u32 2147483647, %v6266_v48  ;;  %4231 = vtanh.f32 %v714_v52  ;;  %v2264_v55 = vsub.f32 1.0, %v2263_v36  ;;  %v2868_v33 = vsel %vm2865_vm9, %v2867_v1, %v2863_v11  ;;  %v3306_v36 = vld [vmem:[#allocation2 + $0x50] sm:$0xff] }
 0x1af   :  { %v4224_v19 = vpop.eup %4223  ;;  %v1658_v56 = vadd.f32 %v4216_v51, %v1657_v47  ;;  %v2273_v13 = vand.u32 2147483648, %v6274_v22  ;;  %v627_v53 = vadd.f32 %v626_v44, %v5077_v14  ;;  %vm2268_vm11 = vweird.f32 %v4220_v41 }
 0x1b0   :  { %v4226_v42 = vpop.eup %4225  ;;  %v3529_v43 = vmul.f32 %v4224_v19, %v2868_v33  ;;  %v2265_v25 = vmul.f32 %v4220_v41, %v2264_v55  ;;  %v2271_v23 = vand.u32 2147483647, %v6274_v22  ;;  %v1666_v58 = vor.u32 1.1754944e-38, %v1665_v30 }
 0x1b1   :  { %v1662_v17 = vsel %vm6323_vm10, %v4216_v51, %v1658_v56  ;;  %v6330_v9 = vadd.f32 1.0, %v4226_v42  ;;  %v3891_v49 = vmul.f32 -1.442695, %v627_v53  ;;  %vm1664_vm15 = vcmp.eq.f32.partialorder %v1663_v59, 8.507059e+37 }
 0x1b2   :  { %v4228_v31 = vpop.eup %4227  ;;  %3561 = vst [vmem:[#allocation7 + $0x98] sm:$0xff] %v3529_v43  ;;  %v1055_v52 = vand.u32 2147483647, %v8303_v62  ;;  %v2266_v2 = vadd.f32 %v4220_v41, %v2265_v25  ;;  %vm2267_vm14 = vweird.f32 %v6274_v22  ;;  %v1667_v1 = vsel %vm1664_vm15, %v1666_v58, %v1662_v17  ;;  %v540_v43 = vpop.f32.mrf.mxu2 }
 0x1b3   :  { %v6342_v51 = vpop.eup %4229  ;;  %vm2269_vm2 = vmor %vm2267_vm14, %vm2268_vm11  ;;  %v2274_v11 = vor.u32 1.1754944e-38, %v2273_v13  ;;  %4233 = vrcp.f32 %v6330_v9  ;;  %v1064_v62 = vmul.f32 %v5991_v40, %v1063_v15  ;;  %v1054_v22 = vsel %vm6336_vm13, %v8304_v8, %v6296_v4  ;;  %v451_v8 = vpop.f32.mrf.mxu1 }
 0x1b4   :  { %v4232_v47 = vpop.eup %4231  ;;  %v2270_v30 = vsel %vm2269_vm2, %v4220_v41, %v2266_v2  ;;  %vm2272_vm1 = vcmp.eq.f32.partialorder %v2271_v23, 8.507059e+37  ;;  %v2871_v59 = vmul.f32 %v6342_v51, %v6308_v60  ;;  %v1058_v55 = vor.u32 1.1754944e-38, %v1057_v0  ;;  %v715_v58 = vpop.f32.mrf.mxu0 }
 0x1b5   :  { %v2275_v44 = vsel %vm2272_vm1, %v2274_v11, %v2270_v30  ;;  %v6358_v19 = vadd.f32 1.0, %v4228_v31  ;;  %4235 = vpow2.f32 %v3891_v49  ;;  %v3274_v33 = vmul.f32 %v3242_v6, %v1667_v1 }
 0x1b6   :  { %vm1056_vm3 = vcmp.eq.f32.partialorder %v1055_v52, 8.507059e+37  ;;  %v3338_v5 = vmul.f32 %v3306_v36, %v2275_v44  ;;  %v2872_v15 = vsub.f32 1.0, %v2871_v59  ;;  %v6360_v56 = vadd.f32 1.0, %v4222_v32 }
 0x1b7   :  { %v1059_v13 = vsel %vm1056_vm3, %v1058_v55, %v1054_v22  ;;  %v6363_v53 = vadd.f32 %v5991_v40, %v1064_v62  ;;  %4237 = vrcp.f32 %v6358_v19  ;;  %v452_v42 = vadd.f32 %v451_v8, %v5046_v57 }
 0x1b8   :  { %v3402_v4 = vmul.f32 %v4232_v47, %v1059_v13  ;;  %v3370_v41 = vadd.f32 %v3338_v5, %v3274_v33  ;;  %v2873_v0 = vmul.f32 %v6342_v51, %v2872_v15  ;;  %vm2875_vm12 = vweird.f32 %v6308_v60  ;;  %v629_v13 = vpop.f32.mrf.mxu3 }
 0x1b9   :  { %v6368_v29 = vpop.eup %4233  ;;  %vm2876_vm5 = vweird.f32 %v6342_v51  ;;  %v2881_v32 = vand.u32 2147483648, %v6308_v60  ;;  %v541_v25 = vadd.f32 %v540_v43, %v5074_v24  ;;  %vm1066_vm6 = vweird.f32 %v5629_v63 }
 0x1ba   :  { %v3434_v23 = vadd.f32 %v3402_v4, %v3370_v41  ;;  %v1670_v17 = vmul.f32 %v6368_v29, %v6330_v9  ;;  %vm1067_vm4 = vweird.f32 %v5991_v40  ;;  %v2874_v31 = vadd.f32 %v6342_v51, %v2873_v0  ;;  %vm6384_vm7 = vmor %vm2875_vm12, %vm2876_vm5 }
 0x1bb   :  { %v4236_v49 = vpop.eup %4235  ;;  %v2879_v48 = vand.u32 2147483647, %v6308_v60  ;;  %v3828_v52 = vmul.f32 -1.442695, %v452_v42  ;;  %v3860_v2 = vmul.f32 -1.442695, %v541_v25  ;;  %v716_v22 = vadd.f32 %v715_v58, %v5113_v35  ;;  %vm6418_vm11 = vmor %vm1066_vm6, %vm1067_vm4 }
 0x1bc   :  { %3466 = vst [vmem:[#allocation7 + $0xa0] sm:$0xff] %v3434_v23  ;;  %4239 = vtanh.f32 %v3434_v23  ;;  %v1671_v6 = vsub.f32 1.0, %v1670_v17  ;;  %v1070_v11 = vand.u32 2147483647, %v5629_v63  ;;  %v6389_v36 = vadd.f32 1.0, %v4236_v49 }
 0x1bd   :  { %v4238_v62 = vpop.eup %4237  ;;  %v2882_v47 = vor.u32 1.1754944e-38, %v2881_v32  ;;  %v1072_v30 = vand.u32 2147483648, %v5629_v63  ;;  %4241 = vpow2.f32 %v3828_v52  ;;  %vm1675_vm0 = vweird.f32 %v6368_v29 }
 0x1be   :  { %v1672_v59 = vmul.f32 %v6368_v29, %v1671_v6  ;;  %v2278_v60 = vmul.f32 %v4238_v62, %v6358_v19  ;;  %4243 = vrcp.f32 %v6389_v36  ;;  %v2878_v55 = vsel %vm6384_vm7, %v6342_v51, %v2874_v31  ;;  %v718_v6 = vpop.f32.mrf.mxu0 }
 0x1bf   :  { %vm2880_vm8 = vcmp.eq.f32.partialorder %v2879_v48, 8.507059e+37  ;;  %v1680_v44 = vand.u32 2147483648, %v6330_v9  ;;  %4245 = vpow2.f32 %v3860_v2  ;;  %vm1674_vm9 = vweird.f32 %v6330_v9  ;;  %v3243_v2 = vld [vmem:[%s8160_s1 + $0x58] sm:$0xff] }
 0x1c0   :  { %v1673_v33 = vadd.f32 %v6368_v29, %v1672_v59  ;;  %v1678_v5 = vand.u32 2147483647, %v6330_v9  ;;  %v2279_v15 = vsub.f32 1.0, %v2278_v60  ;;  %vm6404_vm10 = vmor %vm1674_vm9, %vm1675_vm0  ;;  %4247 = vtanh.f32 %v716_v22 }
 0x1c1   :  { %v2286_v4 = vand.u32 2147483647, %v6358_v19  ;;  %v2288_v51 = vand.u32 2147483648, %v6358_v19  ;;  %v630_v41 = vadd.f32 %v629_v13, %v5077_v14  ;;  %v2883_v42 = vsel %vm2880_vm8, %v2882_v47, %v2878_v55  ;;  %v8354_v13 = vld [vmem:[#allocation26_spill] sm:$0xff] }
 0x1c2   :  { %v4240_v0 = vpop.eup %4239  ;;  %v1677_v43 = vsel %vm6404_vm10, %v6368_v29, %v1673_v33  ;;  %v2280_v32 = vmul.f32 %v4238_v62, %v2279_v15  ;;  %vm2283_vm15 = vweird.f32 %v4238_v62  ;;  %v1681_v17 = vor.u32 1.1754944e-38, %v1680_v44 }
 0x1c3   :  { %v4242_v25 = vpop.eup %4241  ;;  %v3530_v23 = vmul.f32 %v4240_v0, %v2883_v42  ;;  %v1069_v58 = vsel %vm6418_vm11, %v5991_v40, %v6363_v53  ;;  %v3892_v49 = vmul.f32 -1.442695, %v630_v41  ;;  %vm1679_vm13 = vcmp.eq.f32.partialorder %v1678_v5, 8.507059e+37  ;;  %v3307_v40 = vld [vmem:[#allocation2 + $0x58] sm:$0xff] }
 0x1c4   :  { %v6426_v29 = vpop.eup %4243  ;;  %v2281_v31 = vadd.f32 %v4238_v62, %v2280_v32  ;;  %vm2282_vm14 = vweird.f32 %v6358_v19  ;;  %v6429_v63 = vadd.f32 1.0, %v4242_v25  ;;  %v1682_v52 = vsel %vm1679_vm13, %v1681_v17, %v1677_v43 }
 0x1c5   :  { %v4246_v48 = vpop.eup %4245  ;;  %3562 = vst [vmem:[#allocation7 + $0xa8] sm:$0xff] %v3530_v23  ;;  %vm2284_vm2 = vmor %vm2282_vm14, %vm2283_vm15  ;;  %v2289_v1 = vor.u32 1.1754944e-38, %v2288_v51  ;;  %v2886_v53 = vmul.f32 %v6426_v29, %v6389_v36  ;;  %4249 = vpow2.f32 %v3892_v49  ;;  %vm2287_vm1 = vcmp.eq.f32.partialorder %v2286_v4, 8.507059e+37 }
 0x1c6   :  { %v2285_v47 = vsel %vm2284_vm2, %v4238_v62, %v2281_v31  ;;  %4251 = vrcp.f32 %v6429_v63  ;;  %v1079_v19 = vmul.f32 %v6071_v39, %v1078_v34  ;;  %v4248_v22 = vpop.eup %4247  ;;  %v1073_v59 = vor.u32 1.1754944e-38, %v1072_v30  ;;  %v8355_v62 = vld [vmem:[#allocation33_spill] sm:$0xff]  ;;  %v453_v34 = vpop.f32.mrf.mxu1 }
 0x1c7   :  { %v2290_v60 = vsel %vm2287_vm1, %v2289_v1, %v2285_v47  ;;  %v2887_v55 = vsub.f32 1.0, %v2886_v53  ;;  %v6441_v44 = vadd.f32 1.0, %v4246_v48  ;;  %v3275_v33 = vmul.f32 %v3243_v2, %v1682_v52  ;;  %v3308_v53 = vld [vmem:[#allocation2 + $0x60] sm:$0xff] }
 0x1c8   :  { %vm1071_vm3 = vcmp.eq.f32.partialorder %v1070_v11, 8.507059e+37  ;;  %v3339_v5 = vmul.f32 %v3307_v40, %v2290_v60  ;;  %v719_v15 = vadd.f32 %v718_v6, %v5113_v35  ;;  %v6446_v8 = vmul.f32 %v8355_v62, %v8354_v13  ;;  %v542_v11 = vpop.f32.mrf.mxu2 }
 0x1c9   :  { %v1074_v4 = vsel %vm1071_vm3, %v1073_v59, %v1069_v58  ;;  %v2888_v12 = vmul.f32 %v6426_v29, %v2887_v55  ;;  %4253 = vrcp.f32 %v6441_v44  ;;  %v454_v41 = vadd.f32 %v453_v34, %v5046_v57  ;;  %v631_v34 = vpop.f32.mrf.mxu3 }
 0x1ca   :  { %4255 = vrcp.f32 %v6287_v3  ;;  %v3403_v30 = vmul.f32 %v4248_v22, %v1074_v4  ;;  %v3371_v51 = vadd.f32 %v3339_v5, %v3275_v33  ;;  %v1093_v42 = vsub.f32 1.0, %v6284_v38 }
 0x1cb   :  { %v4250_v0 = vpop.eup %4249  ;;  %4257 = vrcp.f32 %v6360_v56  ;;  %v6455_v43 = vadd.f32 %v6071_v39, %v1079_v19  ;;  %v543_v9 = vadd.f32 %v542_v11, %v5074_v24  ;;  %vm1081_vm12 = vweird.f32 %v5996_v27 }
 0x1cc   :  { %v4252_v32 = vpop.eup %4251  ;;  %v3435_v25 = vadd.f32 %v3403_v30, %v3371_v51  ;;  %4259 = vtanh.f32 %v719_v15  ;;  %v6459_v23 = vadd.f32 1.0, %v4250_v0  ;;  %v2889_v17 = vadd.f32 %v6426_v29, %v2888_v12 }
 0x1cd   :  { %vm2891_vm5 = vweird.f32 %v6426_v29  ;;  %v1685_v58 = vmul.f32 %v4252_v32, %v6429_v63  ;;  %v3829_v49 = vmul.f32 -1.442695, %v454_v41  ;;  %vm2890_vm6 = vweird.f32 %v6389_v36 }
 0x1ce   :  { %3467 = vst [vmem:[#allocation7 + $0xb0] sm:$0xff] %v3435_v25  ;;  %4261 = vtanh.f32 %v3435_v25  ;;  %v2896_v31 = vand.u32 2147483648, %v6389_v36  ;;  %vm1082_vm4 = vweird.f32 %v6071_v39  ;;  %v2894_v52 = vand.u32 2147483647, %v6389_v36  ;;  %vm6471_vm7 = vmor %vm2890_vm6, %vm2891_vm5 }
 0x1cf   :  { %v4254_v48 = vpop.eup %4253  ;;  %v1686_v2 = vsub.f32 1.0, %v1685_v58  ;;  %4263 = vrcp.f32 %v6459_v23  ;;  %v3861_v1 = vmul.f32 -1.442695, %v543_v9  ;;  %vm1689_vm0 = vweird.f32 %v6429_v63  ;;  %vm6506_vm13 = vmor %vm1081_vm12, %vm1082_vm4 }
 0x1d0   :  { %v6469_v40 = vpop.eup %4255  ;;  %v1085_v6 = vand.u32 2147483647, %v5996_v27  ;;  %v2293_v47 = vmul.f32 %v4254_v48, %v6441_v44  ;;  %4265 = vpow2.f32 %v3829_v49  ;;  %v2893_v36 = vsel %vm6471_vm7, %v6426_v29, %v2889_v17 }
 0x1d1   :  { %v6478_v19 = vpop.eup %4257  ;;  %v1687_v22 = vmul.f32 %v4252_v32, %v1686_v2  ;;  %vm1690_vm8 = vweird.f32 %v4252_v32  ;;  %v1695_v59 = vand.u32 2147483648, %v6429_v63  ;;  %v2897_v55 = vor.u32 1.1754944e-38, %v2896_v31 }
 0x1d2   :  { %v4260_v60 = vpop.eup %4259  ;;  %v1693_v33 = vand.u32 2147483647, %v6429_v63  ;;  %v2294_v5 = vsub.f32 1.0, %v2293_v47  ;;  %4267 = vpow2.f32 %v3861_v1  ;;  %vm2895_vm9 = vcmp.eq.f32.partialorder %v2894_v52, 8.507059e+37  ;;  %vm6489_vm10 = vmor %vm1689_vm0, %vm1690_vm8  ;;  %v3244_v63 = vld [vmem:[%s8160_s1 + $0x60] sm:$0xff] }
 0x1d3   :  { %v1688_v15 = vadd.f32 %v4252_v32, %v1687_v22  ;;  %v2301_v4 = vand.u32 2147483647, %v6441_v44  ;;  %v2303_v12 = vand.u32 2147483648, %v6441_v44  ;;  %v2898_v51 = vsel %vm2895_vm9, %v2897_v55, %v2893_v36 }
 0x1d4   :  { %v4262_v30 = vpop.eup %4261  ;;  %v2295_v41 = vmul.f32 %v4254_v48, %v2294_v5  ;;  %vm2298_vm11 = vweird.f32 %v4254_v48  ;;  %v632_v11 = vadd.f32 %v631_v34, %v5077_v14  ;;  %v1696_v17 = vor.u32 1.1754944e-38, %v1695_v59 }
 0x1d5   :  { %v6494_v0 = vpop.eup %4263  ;;  %v3531_v9 = vmul.f32 %v4262_v30, %v2898_v51  ;;  %v1692_v25 = vsel %vm6489_vm10, %v4252_v32, %v1688_v15  ;;  %v1087_v58 = vand.u32 2147483648, %v5996_v27  ;;  %vm1694_vm15 = vcmp.eq.f32.partialorder %v1693_v33, 8.507059e+37  ;;  %v8362_v30 = vld [vmem:[#allocation35_spill] sm:$0xff]  ;;  %v8363_v51 = vld [vmem:[#allocation38_spill] sm:$0xff] }
 0x1d6   :  { %v4266_v49 = vpop.eup %4265  ;;  %v2296_v52 = vadd.f32 %v4254_v48, %v2295_v41  ;;  %vm2297_vm14 = vweird.f32 %v6441_v44  ;;  %v2901_v32 = vmul.f32 %v6494_v0, %v6459_v23  ;;  %v1697_v2 = vsel %vm1694_vm15, %v1696_v17, %v1692_v25  ;;  %v545_v25 = vpop.f32.mrf.mxu2 }
 0x1d7   :  { %3563 = vst [vmem:[#allocation7 + $0xb8] sm:$0xff] %v3531_v9  ;;  %vm2299_vm2 = vmor %vm2297_vm14, %vm2298_vm11  ;;  %v2304_v1 = vor.u32 1.1754944e-38, %v2303_v12  ;;  %v6514_v47 = vadd.f32 1.0, %v4266_v49  ;;  %v3893_v36 = vmul.f32 -1.442695, %v632_v11  ;;  %v1084_v22 = vsel %vm6506_vm13, %v6071_v39, %v6455_v43 }
 0x1d8   :  { %v4268_v27 = vpop.eup %4267  ;;  %v2300_v59 = vsel %vm2299_vm2, %v4254_v48, %v2296_v52  ;;  %vm2302_vm1 = vcmp.eq.f32.partialorder %v2301_v4, 8.507059e+37  ;;  %v2902_v44 = vsub.f32 1.0, %v2901_v32  ;;  %v6522_v55 = vmul.f32 %v6469_v40, %v6287_v3 }
 0x1d9   :  { %v1088_v33 = vor.u32 1.1754944e-38, %v1087_v58  ;;  %v2305_v5 = vsel %vm2302_vm1, %v2304_v1, %v2300_v59  ;;  %4269 = vrcp.f32 %v6514_v47  ;;  %v3276_v15 = vmul.f32 %v3244_v63, %v1697_v2 }
 0x1da   :  { %vm1086_vm3 = vcmp.eq.f32.partialorder %v1085_v6, 8.507059e+37  ;;  %v3340_v12 = vmul.f32 %v3308_v53, %v2305_v5  ;;  %v6525_v34 = vadd.f32 1.0, %v4268_v27  ;;  %v6529_v29 = vmul.f32 %v8363_v51, %v8362_v30  ;;  %v456_v6 = vpop.f32.mrf.mxu1 }
 0x1db   :  { %v1089_v39 = vsel %vm1086_vm3, %v1088_v33, %v1084_v22  ;;  %v2903_v43 = vmul.f32 %v6494_v0, %v2902_v44  ;;  %4271 = vpow2.f32 %v3893_v36  ;;  %v1094_v41 = vmul.f32 %v6199_v50, %v1093_v42  ;;  %v720_v42 = vpop.f32.mrf.mxu0 }
 0x1dc   :  { %v3404_v48 = vmul.f32 %v4260_v60, %v1089_v39  ;;  %v3372_v4 = vadd.f32 %v3340_v12, %v3276_v15  ;;  %4273 = vrcp.f32 %v6525_v34  ;;  %v1108_v11 = vsub.f32 1.0, %v6522_v55 }
 0x1dd   :  { %vm2905_vm12 = vweird.f32 %v6459_v23  ;;  %vm2906_vm5 = vweird.f32 %v6494_v0  ;;  %v457_v9 = vadd.f32 %v456_v6, %v5046_v57  ;;  %v6542_v60 = vmul.f32 %v6478_v19, %v6360_v56 }
 0x1de   :  { %v3436_v17 = vadd.f32 %v3404_v48, %v3372_v4  ;;  %v2911_v38 = vand.u32 2147483648, %v6459_v23  ;;  %v546_v58 = vadd.f32 %v545_v25, %v5074_v24  ;;  %v2904_v63 = vadd.f32 %v6494_v0, %v2903_v43  ;;  %vm6553_vm4 = vmor %vm2905_vm12, %vm2906_vm5 }
 0x1df   :  { %v4270_v49 = vpop.eup %4269  ;;  %v2909_v31 = vand.u32 2147483647, %v6459_v23  ;;  %vm1096_vm6 = vweird.f32 %v6091_v61  ;;  %v3830_v52 = vmul.f32 -1.442695, %v457_v9  ;;  %v6559_v1 = vadd.f32 %v6199_v50, %v1094_v41  ;;  %v634_v41 = vpop.f32.mrf.mxu3 }
 0x1e0   :  { %3468 = vst [vmem:[#allocation7 + $0xc0] sm:$0xff] %v3436_v17  ;;  %4275 = vtanh.f32 %v3436_v17  ;;  %v1700_v2 = vmul.f32 %v4270_v49, %v6514_v47  ;;  %v3862_v53 = vmul.f32 -1.442695, %v546_v58  ;;  %v721_v27 = vadd.f32 %v720_v42, %v5113_v35 }
 0x1e1   :  { %v4272_v36 = vpop.eup %4271  ;;  %vm1097_vm7 = vweird.f32 %v6199_v50  ;;  %v1100_v22 = vand.u32 2147483647, %v6091_v61  ;;  %4277 = vpow2.f32 %v3830_v52  ;;  %v2912_v23 = vor.u32 1.1754944e-38, %v2911_v38 }
 0x1e2   :  { %v4274_v59 = vpop.eup %4273  ;;  %v1701_v44 = vsub.f32 1.0, %v1700_v2  ;;  %v1102_v33 = vand.u32 2147483648, %v6091_v61  ;;  %v6565_v5 = vadd.f32 1.0, %v4272_v36  ;;  %v2908_v15 = vsel %vm6553_vm4, %v6494_v0, %v2904_v63  ;;  %vm6589_vm15 = vmor %vm1096_vm6, %vm1097_vm7 }
 0x1e3   :  { %vm2910_vm0 = vcmp.eq.f32.partialorder %v2909_v31, 8.507059e+37  ;;  %v2308_v12 = vmul.f32 %v4274_v59, %v6525_v34  ;;  %4279 = vpow2.f32 %v3862_v53  ;;  %vm1705_vm8 = vweird.f32 %v4270_v49 }
 0x1e4   :  { %v1702_v39 = vmul.f32 %v4270_v49, %v1701_v44  ;;  %v1710_v43 = vand.u32 2147483648, %v6514_v47  ;;  %4281 = vrcp.f32 %v6565_v5  ;;  %vm1704_vm9 = vweird.f32 %v6514_v47  ;;  %v3245_v44 = vld [vmem:[%s8160_s1 + $0x68] sm:$0xff] }
 0x1e5   :  { %v1708_v48 = vand.u32 2147483647, %v6514_v47  ;;  %4283 = vtanh.f32 %v721_v27  ;;  %v2309_v4 = vsub.f32 1.0, %v2308_v12  ;;  %v2913_v9 = vsel %vm2910_vm0, %v2912_v23, %v2908_v15  ;;  %vm6578_vm10 = vmor %vm1704_vm9, %vm1705_vm8 }
 0x1e6   :  { %v4276_v6 = vpop.eup %4275  ;;  %v1703_v0 = vadd.f32 %v4270_v49, %v1702_v39  ;;  %v2318_v25 = vand.u32 2147483648, %v6525_v34  ;;  %v635_v17 = vadd.f32 %v634_v41, %v5077_v14  ;;  %vm2313_vm11 = vweird.f32 %v4274_v59  ;;  %v3309_v39 = vld [vmem:[#allocation2 + $0x68] sm:$0xff] }
 0x1e7   :  { %v4278_v38 = vpop.eup %4277  ;;  %v3532_v42 = vmul.f32 %v4276_v6, %v2913_v9  ;;  %v2310_v63 = vmul.f32 %v4274_v59, %v2309_v4  ;;  %v2316_v47 = vand.u32 2147483647, %v6525_v34  ;;  %v1711_v52 = vor.u32 1.1754944e-38, %v1710_v43 }
 0x1e8   :  { %v1707_v31 = vsel %vm6578_vm10, %v4270_v49, %v1703_v0  ;;  %v6593_v2 = vadd.f32 1.0, %v4278_v38  ;;  %v3894_v53 = vmul.f32 -1.442695, %v635_v17  ;;  %vm1709_vm13 = vcmp.eq.f32.partialorder %v1708_v48, 8.507059e+37  ;;  %v8372_v17 = vld [vmem:[#allocation15_spill] sm:$0xff] }
 0x1e9   :  { %v4280_v36 = vpop.eup %4279  ;;  %3564 = vst [vmem:[#allocation7 + $0xc8] sm:$0xff] %v3532_v42  ;;  %v1099_v49 = vsel %vm6589_vm15, %v6199_v50, %v6559_v1  ;;  %v2311_v27 = vadd.f32 %v4274_v59, %v2310_v63  ;;  %vm2312_vm14 = vweird.f32 %v6525_v34  ;;  %v1712_v61 = vsel %vm1709_vm13, %v1711_v52, %v1707_v31  ;;  %v723_v50 = vpop.f32.mrf.mxu0 }
 0x1ea   :  { %v6600_v23 = vpop.eup %4281  ;;  %vm6605_vm2 = vcmp.eq.f32.partialorder %v1100_v22, 8.507059e+37  ;;  %vm2314_vm1 = vmor %vm2312_vm14, %vm2313_vm11  ;;  %v2319_v12 = vor.u32 1.1754944e-38, %v2318_v25  ;;  %4285 = vrcp.f32 %v6593_v2  ;;  %vm2317_vm3 = vcmp.eq.f32.partialorder %v2316_v47, 8.507059e+37  ;;  %v547_v47 = vpop.f32.mrf.mxu2 }
 0x1eb   :  { %v4284_v1 = vpop.eup %4283  ;;  %v2315_v34 = vsel %vm2314_vm1, %v4274_v59, %v2311_v27  ;;  %v2916_v43 = vmul.f32 %v6600_v23, %v6565_v5  ;;  %v1109_v22 = vmul.f32 %v6469_v40, %v1108_v11  ;;  %v1103_v48 = vor.u32 1.1754944e-38, %v1102_v33  ;;  %v458_v11 = vpop.f32.mrf.mxu1 }
 0x1ec   :  { %v2320_v4 = vsel %vm2317_vm3, %v2319_v12, %v2315_v34  ;;  %v6616_v41 = vadd.f32 1.0, %v4280_v36  ;;  %4287 = vpow2.f32 %v3894_v53  ;;  %v3277_v6 = vmul.f32 %v3245_v44, %v1712_v61  ;;  %v3246_v34 = vld [vmem:[%s8160_s1 + $0x70] sm:$0xff] }
 0x1ed   :  { %v3341_v9 = vmul.f32 %v3309_v39, %v2320_v4  ;;  %v2917_v0 = vsub.f32 1.0, %v2916_v43  ;;  %v724_v25 = vadd.f32 %v723_v50, %v5113_v35  ;;  %v6620_v59 = vadd.f32 1.0, %v5982_v20 }
 0x1ee   :  { %v6623_v38 = vmul.f32 -1.442695, %v8372_v17  ;;  %v1104_v55 = vsel %vm6605_vm2, %v1103_v48, %v1099_v49  ;;  %4289 = vrcp.f32 %v6616_v41  ;;  %v459_v63 = vadd.f32 %v458_v11, %v5046_v57 }
 0x1ef   :  { %v3405_v33 = vmul.f32 %v4284_v1, %v1104_v55  ;;  %v3373_v42 = vadd.f32 %v3341_v9, %v3277_v6  ;;  %v2918_v58 = vmul.f32 %v6600_v23, %v2917_v0  ;;  %v1123_v20 = vsub.f32 1.0, %v6542_v60  ;;  %v636_v55 = vpop.f32.mrf.mxu3 }
 0x1f0   :  { %v6630_v31 = vpop.eup %4285  ;;  %v6634_v52 = vadd.f32 %v6469_v40, %v1109_v22  ;;  %vm1111_vm12 = vweird.f32 %v6287_v3  ;;  %v548_v32 = vadd.f32 %v547_v47, %v5074_v24  ;;  %vm1112_vm5 = vweird.f32 %v6469_v40 }
 0x1f1   :  { %v3437_v53 = vadd.f32 %v3405_v33, %v3373_v42  ;;  %v1715_v36 = vmul.f32 %v6630_v31, %v6593_v2  ;;  %4291 = vtanh.f32 %v724_v25  ;;  %v2919_v27 = vadd.f32 %v6600_v23, %v2918_v58  ;;  %vm6683_vm13 = vmor %vm1111_vm12, %vm1112_vm5 }
 0x1f2   :  { %v4288_v49 = vpop.eup %4287  ;;  %vm2921_vm6 = vweird.f32 %v6600_v23  ;;  %v3831_v61 = vmul.f32 -1.442695, %v459_v63  ;;  %v3863_v44 = vmul.f32 -1.442695, %v548_v32  ;;  %v2926_v15 = vand.u32 2147483648, %v6565_v5 }
 0x1f3   :  { %3469 = vst [vmem:[#allocation7 + $0xd0] sm:$0xff] %v3437_v53  ;;  %4293 = vtanh.f32 %v3437_v53  ;;  %v1716_v12 = vsub.f32 1.0, %v1715_v36  ;;  %v6644_v39 = vadd.f32 1.0, %v4288_v49  ;;  %vm2920_vm4 = vweird.f32 %v6565_v5 }
 0x1f4   :  { %v4290_v50 = vpop.eup %4289  ;;  %v2924_v1 = vand.u32 2147483647, %v6565_v5  ;;  %vm1719_vm7 = vweird.f32 %v6593_v2  ;;  %4295 = vpow2.f32 %v3831_v61  ;;  %vm6649_vm0 = vmor %vm2920_vm4, %vm2921_vm6  ;;  %vm1720_vm8 = vweird.f32 %v6630_v31 }
 0x1f5   :  { %v1717_v43 = vmul.f32 %v6630_v31, %v1716_v12  ;;  %v2323_v22 = vmul.f32 %v4290_v50, %v6616_v41  ;;  %4297 = vrcp.f32 %v6644_v39  ;;  %v2923_v48 = vsel %vm6649_vm0, %v6600_v23, %v2919_v27  ;;  %vm6666_vm10 = vmor %vm1719_vm7, %vm1720_vm8 }
 0x1f6   :  { %v1725_v5 = vand.u32 2147483648, %v6593_v2  ;;  %v1115_v4 = vand.u32 2147483647, %v6287_v3  ;;  %4299 = vpow2.f32 %v3863_v44  ;;  %v2927_v9 = vor.u32 1.1754944e-38, %v2926_v15 }
 0x1f7   :  { %v4292_v6 = vpop.eup %4291  ;;  %v1718_v0 = vadd.f32 %v6630_v31, %v1717_v43  ;;  %v1723_v25 = vand.u32 2147483647, %v6593_v2  ;;  %v2324_v17 = vsub.f32 1.0, %v2323_v22  ;;  %vm2925_vm9 = vcmp.eq.f32.partialorder %v2924_v1, 8.507059e+37 }
 0x1f8   :  { %v2331_v23 = vand.u32 2147483647, %v6616_v41  ;;  %v2333_v33 = vand.u32 2147483648, %v6616_v41  ;;  %v637_v42 = vadd.f32 %v636_v55, %v5077_v14  ;;  %v2928_v63 = vsel %vm2925_vm9, %v2927_v9, %v2923_v48 }
 0x1f9   :  { %v4294_v58 = vpop.eup %4293  ;;  %v1722_v47 = vsel %vm6666_vm10, %v6630_v31, %v1718_v0  ;;  %v2325_v32 = vmul.f32 %v4290_v50, %v2324_v17  ;;  %vm2328_vm11 = vweird.f32 %v4290_v50  ;;  %v1726_v36 = vor.u32 1.1754944e-38, %v1725_v5  ;;  %v725_v5 = vpop.f32.mrf.mxu0 }
 0x1fa   :  { %v4296_v53 = vpop.eup %4295  ;;  %v3533_v2 = vmul.f32 %v4294_v58, %v2928_v63  ;;  %v1117_v49 = vand.u32 2147483648, %v6287_v3  ;;  %v3895_v27 = vmul.f32 -1.442695, %v637_v42  ;;  %vm1724_vm15 = vcmp.eq.f32.partialorder %v1723_v25, 8.507059e+37  ;;  %v3310_v3 = vld [vmem:[#allocation2 + $0x70] sm:$0xff] }
 0x1fb   :  { %v6677_v61 = vpop.eup %4297  ;;  %v2326_v31 = vadd.f32 %v4290_v50, %v2325_v32  ;;  %vm2327_vm14 = vweird.f32 %v6616_v41  ;;  %v6688_v15 = vadd.f32 1.0, %v4296_v53  ;;  %v1727_v1 = vsel %vm1724_vm15, %v1726_v36, %v1722_v47  ;;  %v550_v47 = vpop.f32.mrf.mxu2 }
 0x1fc   :  { %v4300_v12 = vpop.eup %4299  ;;  %3565 = vst [vmem:[#allocation7 + $0xd8] sm:$0xff] %v3533_v2  ;;  %vm2329_vm2 = vmor %vm2327_vm14, %vm2328_vm11  ;;  %v2334_v43 = vor.u32 1.1754944e-38, %v2333_v33  ;;  %v2931_v22 = vmul.f32 %v6677_v61, %v6644_v39  ;;  %4301 = vpow2.f32 %v3895_v27  ;;  %v1114_v41 = vsel %vm6683_vm13, %v6469_v40, %v6634_v52  ;;  %v461_v52 = vpop.f32.mrf.mxu1 }
 0x1fd   :  { %v2330_v48 = vsel %vm2329_vm2, %v4290_v50, %v2326_v31  ;;  %vm2332_vm1 = vcmp.eq.f32.partialorder %v2331_v23, 8.507059e+37  ;;  %4303 = vrcp.f32 %v6688_v15  ;;  %v1118_v9 = vor.u32 1.1754944e-38, %v1117_v49  ;;  %v3311_v31 = vld [vmem:[#allocation2 + $0x78] sm:$0xff] }
 0x1fe   :  { %v2335_v0 = vsel %vm2332_vm1, %v2334_v43, %v2330_v48  ;;  %v2932_v25 = vsub.f32 1.0, %v2931_v22  ;;  %v6701_v17 = vadd.f32 1.0, %v4300_v12  ;;  %4305 = vrcp.f32 %v6620_v59 }
 0x1ff   :  { %v3278_v55 = vmul.f32 %v3246_v34, %v1727_v1  ;;  %vm1116_vm3 = vcmp.eq.f32.partialorder %v1115_v4, 8.507059e+37  ;;  %v3342_v11 = vmul.f32 %v3310_v3, %v2335_v0  ;;  %v726_v40 = vadd.f32 %v725_v5, %v5113_v35 }
 0x200   :  { %v1119_v33 = vsel %vm1116_vm3, %v1118_v9, %v1114_v41  ;;  %v2933_v42 = vmul.f32 %v6677_v61, %v2932_v25  ;;  %4307 = vrcp.f32 %v6701_v17  ;;  %v1124_v58 = vmul.f32 %v6478_v19, %v1123_v20 }
 0x201   :  { %v3406_v50 = vmul.f32 %v4292_v6, %v1119_v33  ;;  %v3374_v23 = vadd.f32 %v3342_v11, %v3278_v55  ;;  %v462_v63 = vadd.f32 %v461_v52, %v5046_v57  ;;  %4309 = vpow2.f32 %v6623_v38 }
 0x202   :  { %v4302_v32 = vpop.eup %4301  ;;  %vm2935_vm12 = vweird.f32 %v6644_v39  ;;  %vm2936_vm5 = vweird.f32 %v6677_v61  ;;  %v551_v4 = vadd.f32 %v550_v47, %v5074_v24  ;;  %v2939_v6 = vand.u32 2147483647, %v6644_v39 }
 0x203   :  { %v4304_v53 = vpop.eup %4303  ;;  %v3438_v2 = vadd.f32 %v3406_v50, %v3374_v23  ;;  %v2941_v60 = vand.u32 2147483648, %v6644_v39  ;;  %v6717_v36 = vadd.f32 1.0, %v4302_v32  ;;  %v2934_v20 = vadd.f32 %v6677_v61, %v2933_v42  ;;  %vm6730_vm6 = vmor %vm2935_vm12, %vm2936_vm5 }
 0x204   :  { %v1730_v49 = vmul.f32 %v4304_v53, %v6688_v15  ;;  %4311 = vtanh.f32 %v726_v40  ;;  %v3832_v38 = vmul.f32 -1.442695, %v462_v63  ;;  %v6721_v27 = vpop.eup %4305  ;;  %v6724_v44 = vadd.f32 1.0, %v6006_v28  ;;  %v639_v40 = vpop.f32.mrf.mxu3 }
 0x205   :  { %3470 = vst [vmem:[#allocation7 + $0xe0] sm:$0xff] %v3438_v2  ;;  %4313 = vtanh.f32 %v3438_v2  ;;  %v6735_v12 = vadd.f32 %v6478_v19, %v1124_v58  ;;  %vm1126_vm4 = vweird.f32 %v6360_v56  ;;  %vm1127_vm7 = vweird.f32 %v6478_v19 }
 0x206   :  { %v4308_v1 = vpop.eup %4307  ;;  %v1731_v34 = vsub.f32 1.0, %v1730_v49  ;;  %4315 = vrcp.f32 %v6717_v36  ;;  %v3864_v28 = vmul.f32 -1.442695, %v551_v4  ;;  %vm6740_vm0 = vcmp.eq.f32.partialorder %v2939_v6, 8.507059e+37  ;;  %v3247_v6 = vld [vmem:[%s8160_s1 + $0x78] sm:$0xff]  ;;  %vm6775_vm13 = vmor %vm1126_vm4, %vm1127_vm7 }
 0x207   :  { %v2942_v39 = vor.u32 1.1754944e-38, %v2941_v60  ;;  %v2338_v3 = vmul.f32 %v4308_v1, %v6701_v17  ;;  %4317 = vpow2.f32 %v3832_v38  ;;  %v6745_v22 = vpop.eup %4309  ;;  %v2938_v41 = vsel %vm6730_vm6, %v6677_v61, %v2934_v20 }
 0x208   :  { %v1732_v48 = vmul.f32 %v4304_v53, %v1731_v34  ;;  %vm1735_vm8 = vweird.f32 %v4304_v53  ;;  %v1740_v5 = vand.u32 2147483648, %v6688_v15  ;;  %v1738_v9 = vand.u32 2147483647, %v6688_v15 }
 0x209   :  { %v1130_v0 = vand.u32 2147483647, %v6360_v56  ;;  %v2339_v25 = vsub.f32 1.0, %v2338_v3  ;;  %4319 = vpow2.f32 %v3864_v28  ;;  %vm1734_vm9 = vweird.f32 %v6688_v15 }
 0x20a   :  { %v4312_v55 = vpop.eup %4311  ;;  %v1733_v11 = vadd.f32 %v4304_v53, %v1732_v48  ;;  %v2346_v33 = vand.u32 2147483647, %v6701_v17  ;;  %v2348_v42 = vand.u32 2147483648, %v6701_v17  ;;  %v2943_v52 = vsel %vm6740_vm0, %v2942_v39, %v2938_v41  ;;  %vm6758_vm10 = vmor %vm1734_vm9, %vm1735_vm8 }
 0x20b   :  { %v4314_v61 = vpop.eup %4313  ;;  %v2340_v23 = vmul.f32 %v4308_v1, %v2339_v25  ;;  %vm2343_vm11 = vweird.f32 %v4308_v1  ;;  %v640_v58 = vadd.f32 %v639_v40, %v5077_v14  ;;  %v1741_v32 = vor.u32 1.1754944e-38, %v1740_v5 }
 0x20c   :  { %v6763_v63 = vpop.eup %4315  ;;  %v3534_v15 = vmul.f32 %v4314_v61, %v2943_v52  ;;  %v1737_v47 = vsel %vm6758_vm10, %v4304_v53, %v1733_v11  ;;  %v1132_v4 = vand.u32 2147483648, %v6360_v56  ;;  %vm1739_vm15 = vcmp.eq.f32.partialorder %v1738_v9, 8.507059e+37  ;;  %v8387_v9 = vld [vmem:[#allocation29_spill] sm:$0xff] }
 0x20d   :  { %v4318_v2 = vpop.eup %4317  ;;  %v2341_v20 = vadd.f32 %v4308_v1, %v2340_v23  ;;  %vm2342_vm14 = vweird.f32 %v6701_v17  ;;  %v2946_v53 = vmul.f32 %v6763_v63, %v6717_v36  ;;  %v1742_v49 = vsel %vm1739_vm15, %v1741_v32, %v1737_v47  ;;  %v728_v23 = vpop.f32.mrf.mxu0 }
 0x20e   :  { %3566 = vst [vmem:[#allocation7 + $0xe8] sm:$0xff] %v3534_v15  ;;  %vm2344_vm2 = vmor %vm2342_vm14, %vm2343_vm11  ;;  %v2349_v38 = vor.u32 1.1754944e-38, %v2348_v42  ;;  %v6783_v34 = vadd.f32 1.0, %v4318_v2  ;;  %v3896_v28 = vmul.f32 -1.442695, %v640_v58  ;;  %v1129_v43 = vsel %vm6775_vm13, %v6478_v19, %v6735_v12  ;;  %v8388_v2 = vld [vmem:[#allocation22_spill] sm:$0xff] }
 0x20f   :  { %v4320_v56 = vpop.eup %4319  ;;  %v2345_v39 = vsel %vm2344_vm2, %v4308_v1, %v2341_v20  ;;  %vm2347_vm1 = vcmp.eq.f32.partialorder %v2346_v33, 8.507059e+37  ;;  %v2947_v17 = vsub.f32 1.0, %v2946_v53  ;;  %vm1131_vm3 = vcmp.eq.f32.partialorder %v1130_v0, 8.507059e+37  ;;  %v463_v0 = vpop.f32.mrf.mxu1 }
 0x210   :  { %v1133_v3 = vor.u32 1.1754944e-38, %v1132_v4  ;;  %v2350_v41 = vsel %vm2347_vm1, %v2349_v38, %v2345_v39  ;;  %4321 = vrcp.f32 %v6783_v34  ;;  %v3279_v48 = vmul.f32 %v3247_v6, %v1742_v49 }
 0x211   :  { %v3343_v5 = vmul.f32 %v3311_v31, %v2350_v41  ;;  %v1139_v25 = vmul.f32 %v8387_v9, %v1138_v21  ;;  %v6793_v11 = vadd.f32 1.0, %v4320_v56  ;;  %v2948_v40 = vmul.f32 %v6763_v63, %v2947_v17  ;;  %v552_v21 = vpop.f32.mrf.mxu2  ;;  %v3248_v31 = vld [vmem:[%s8160_s1 + $0x80] sm:$0xff] }
 0x212   :  { %v1134_v42 = vsel %vm1131_vm3, %v1133_v3, %v1129_v43  ;;  %4323 = vpow2.f32 %v3896_v28  ;;  %v1258_v19 = vsub.f32 1.0, %v5986_v10  ;;  %v1153_v33 = vsub.f32 1.0, %v6446_v8 }
 0x213   :  { %v3407_v12 = vmul.f32 %v4312_v55, %v1134_v42  ;;  %v3375_v1 = vadd.f32 %v3343_v5, %v3279_v48  ;;  %4325 = vrcp.f32 %v6793_v11  ;;  %v1168_v61 = vsub.f32 1.0, %v6529_v29  ;;  %v641_v42 = vpop.f32.mrf.mxu3 }
 0x214   :  { %4327 = vrcp.f32 %v6724_v44  ;;  %v464_v26 = vadd.f32 %v463_v0, %v5046_v57  ;;  %v2956_v50 = vand.u32 2147483648, %v6717_v36  ;;  %v6804_v58 = vadd.f32 %v8387_v9, %v1139_v25 }
 0x215   :  { %v3439_v52 = vadd.f32 %v3407_v12, %v3375_v1  ;;  %v553_v55 = vadd.f32 %v552_v21, %v5074_v24  ;;  %v2949_v47 = vadd.f32 %v6763_v63, %v2948_v40  ;;  %vm2951_vm12 = vweird.f32 %v6763_v63 }
 0x216   :  { %v4322_v15 = vpop.eup %4321  ;;  %vm1142_vm5 = vweird.f32 %v8387_v9  ;;  %v3833_v32 = vmul.f32 -1.442695, %v464_v26  ;;  %vm1141_vm6 = vweird.f32 %v8388_v2  ;;  %v1145_v6 = vand.u32 2147483647, %v8388_v2 }
 0x217   :  { %3471 = vst [vmem:[#allocation7 + $0xf0] sm:$0xff] %v3439_v52  ;;  %4329 = vtanh.f32 %v3439_v52  ;;  %v1745_v4 = vmul.f32 %v4322_v15, %v6783_v34  ;;  %v3865_v60 = vmul.f32 -1.442695, %v553_v55  ;;  %vm2950_vm4 = vweird.f32 %v6717_v36  ;;  %vm6857_vm13 = vmor %vm1141_vm6, %vm1142_vm5 }
 0x218   :  { %v4324_v20 = vpop.eup %4323  ;;  %v2954_v53 = vand.u32 2147483647, %v6717_v36  ;;  %v729_v49 = vadd.f32 %v728_v23, %v5113_v35  ;;  %4331 = vpow2.f32 %v3833_v32  ;;  %vm6818_vm7 = vmor %vm2950_vm4, %vm2951_vm12  ;;  %v2957_v28 = vor.u32 1.1754944e-38, %v2956_v50 }
 0x219   :  { %v4326_v38 = vpop.eup %4325  ;;  %v1746_v56 = vsub.f32 1.0, %v1745_v4  ;;  %v1147_v43 = vand.u32 2147483648, %v8388_v2  ;;  %v6823_v39 = vadd.f32 1.0, %v4324_v20  ;;  %v2953_v36 = vsel %vm6818_vm7, %v6763_v63, %v2949_v47 }
 0x21a   :  { %v6825_v17 = vpop.eup %4327  ;;  %vm1749_vm0 = vweird.f32 %v6783_v34  ;;  %v2353_v3 = vmul.f32 %v4326_v38, %v6793_v11  ;;  %4333 = vpow2.f32 %v3865_v60  ;;  %vm1750_vm8 = vweird.f32 %v4322_v15 }
 0x21b   :  { %v1747_v41 = vmul.f32 %v4322_v15, %v1746_v56  ;;  %v1755_v48 = vand.u32 2147483648, %v6783_v34  ;;  %4335 = vrcp.f32 %v6823_v39  ;;  %vm2955_vm9 = vcmp.eq.f32.partialorder %v2954_v53, 8.507059e+37  ;;  %vm6840_vm10 = vmor %vm1749_vm0, %vm1750_vm8  ;;  %v3312_v56 = vld [vmem:[#allocation2 + $0x80] sm:$0xff] }
 0x21c   :  { %v1753_v5 = vand.u32 2147483647, %v6783_v34  ;;  %4337 = vtanh.f32 %v729_v49  ;;  %v2354_v25 = vsub.f32 1.0, %v2353_v3  ;;  %v2958_v12 = vsel %vm2955_vm9, %v2957_v28, %v2953_v36 }
 0x21d   :  { %v4330_v40 = vpop.eup %4329  ;;  %v1748_v63 = vadd.f32 %v4322_v15, %v1747_v41  ;;  %v2363_v1 = vand.u32 2147483648, %v6793_v11  ;;  %v642_v0 = vadd.f32 %v641_v42, %v5077_v14  ;;  %vm2358_vm11 = vweird.f32 %v4326_v38 }
 0x21e   :  { %v4332_v26 = vpop.eup %4331  ;;  %v3535_v21 = vmul.f32 %v4330_v40, %v2958_v12  ;;  %v2355_v50 = vmul.f32 %v4326_v38, %v2354_v25  ;;  %v2361_v23 = vand.u32 2147483647, %v6793_v11  ;;  %v1756_v47 = vor.u32 1.1754944e-38, %v1755_v48 }
 0x21f   :  { %v1752_v55 = vsel %vm6840_vm10, %v4322_v15, %v1748_v63  ;;  %v6847_v32 = vadd.f32 1.0, %v4332_v26  ;;  %v3897_v4 = vmul.f32 -1.442695, %v642_v0  ;;  %v6851_v20 = vmul.f32 %v6025_v7, %v5962_v46 }
 0x220   :  { %v4334_v60 = vpop.eup %4333  ;;  %3567 = vst [vmem:[#allocation7 + $0xf8] sm:$0xff] %v3535_v21  ;;  %vm1754_vm15 = vcmp.eq.f32.partialorder %v1753_v5, 8.507059e+37  ;;  %v2356_v15 = vadd.f32 %v4326_v38, %v2355_v50  ;;  %vm2357_vm14 = vweird.f32 %v6793_v11  ;;  %v1144_v28 = vsel %vm6857_vm13, %v8387_v9, %v6804_v58  ;;  %v555_v21 = vpop.f32.mrf.mxu2 }
 0x221   :  { %v6862_v53 = vpop.eup %4335  ;;  %v1757_v49 = vsel %vm1754_vm15, %v1756_v47, %v1752_v55  ;;  %vm2359_vm2 = vmor %vm2357_vm14, %vm2358_vm11  ;;  %v2364_v2 = vor.u32 1.1754944e-38, %v2363_v1  ;;  %4339 = vrcp.f32 %v6847_v32  ;;  %vm1146_vm1 = vcmp.eq.f32.partialorder %v1145_v6, 8.507059e+37  ;;  %v8395_v6 = vld [vmem:[#allocation18_spill] sm:$0xff]  ;;  %v730_v55 = vpop.f32.mrf.mxu0 }
 0x222   :  { %v4338_v36 = vpop.eup %4337  ;;  %v2360_v11 = vsel %vm2359_vm2, %v4326_v38, %v2356_v15  ;;  %vm2362_vm3 = vcmp.eq.f32.partialorder %v2361_v23, 8.507059e+37  ;;  %v2961_v3 = vmul.f32 %v6862_v53, %v6823_v39  ;;  %v1148_v41 = vor.u32 1.1754944e-38, %v1147_v43  ;;  %v466_v43 = vpop.f32.mrf.mxu1 }
 0x223   :  { %v2365_v48 = vsel %vm2362_vm3, %v2364_v2, %v2360_v11  ;;  %v6875_v5 = vadd.f32 1.0, %v4334_v60  ;;  %4341 = vpow2.f32 %v3897_v4  ;;  %v3280_v25 = vmul.f32 %v3248_v31, %v1757_v49 }
 0x224   :  { %v3344_v9 = vmul.f32 %v3312_v56, %v2365_v48  ;;  %v2962_v58 = vsub.f32 1.0, %v2961_v3  ;;  %v1154_v42 = vmul.f32 %v8355_v62, %v1153_v33  ;;  %v6881_v40 = vadd.f32 1.0, %v6745_v22 }
 0x225   :  { %v6884_v38 = vmul.f32 -1.442695, %v8395_v6  ;;  %v1149_v12 = vsel %vm1146_vm1, %v1148_v41, %v1144_v28  ;;  %4343 = vrcp.f32 %v6875_v5  ;;  %v467_v26 = vadd.f32 %v466_v43, %v5046_v57  ;;  %v644_v6 = vpop.f32.mrf.mxu3 }
 0x226   :  { %v3408_v63 = vmul.f32 %v4338_v36, %v1149_v12  ;;  %v3376_v1 = vadd.f32 %v3344_v9, %v3280_v25  ;;  %v2963_v0 = vmul.f32 %v6862_v53, %v2962_v58  ;;  %vm2965_vm12 = vweird.f32 %v6823_v39 }
 0x227   :  { %v6889_v8 = vpop.eup %4339  ;;  %vm2966_vm5 = vweird.f32 %v6862_v53  ;;  %v2971_v22 = vand.u32 2147483648, %v6823_v39  ;;  %v556_v33 = vadd.f32 %v555_v21, %v5074_v24  ;;  %v6897_v52 = vmul.f32 %v6825_v17, %v6724_v44 }
 0x228   :  { %v3440_v50 = vadd.f32 %v3408_v63, %v3376_v1  ;;  %v1760_v23 = vmul.f32 %v6889_v8, %v6847_v32  ;;  %v6902_v47 = vadd.f32 %v8355_v62, %v1154_v42  ;;  %v2964_v60 = vadd.f32 %v6862_v53, %v2963_v0  ;;  %vm6911_vm4 = vmor %vm2965_vm12, %vm2966_vm5 }
 0x229   :  { %v4342_v4 = vpop.eup %4341  ;;  %v2969_v34 = vand.u32 2147483647, %v6823_v39  ;;  %vm1156_vm6 = vweird.f32 %v8354_v13  ;;  %v3834_v15 = vmul.f32 -1.442695, %v467_v26  ;;  %v3866_v49 = vmul.f32 -1.442695, %v556_v33 }
 0x22a   :  { %3472 = vst [vmem:[#allocation7 + $0x100] sm:$0xff] %v3440_v50  ;;  %4345 = vtanh.f32 %v3440_v50  ;;  %v1761_v28 = vsub.f32 1.0, %v1760_v23  ;;  %vm1157_vm7 = vweird.f32 %v8355_v62  ;;  %v6916_v2 = vadd.f32 1.0, %v4342_v4 }
 0x22b   :  { %v4344_v56 = vpop.eup %4343  ;;  %v2972_v36 = vor.u32 1.1754944e-38, %v2971_v22  ;;  %v731_v11 = vadd.f32 %v730_v55, %v5113_v35  ;;  %v1160_v3 = vand.u32 2147483647, %v8354_v13  ;;  %4347 = vpow2.f32 %v3834_v15  ;;  %vm6948_vm13 = vmor %vm1156_vm6, %vm1157_vm7 }
 0x22c   :  { %v1762_v41 = vmul.f32 %v6889_v8, %v1761_v28  ;;  %vm1765_vm0 = vweird.f32 %v6889_v8  ;;  %v2368_v39 = vmul.f32 %v4344_v56, %v6875_v5  ;;  %4349 = vrcp.f32 %v6916_v2 }
 0x22d   :  { %v2968_v48 = vsel %vm6911_vm4, %v6862_v53, %v2964_v60  ;;  %vm2970_vm8 = vcmp.eq.f32.partialorder %v2969_v34, 8.507059e+37  ;;  %v1770_v25 = vand.u32 2147483648, %v6847_v32  ;;  %4351 = vpow2.f32 %v3866_v49  ;;  %v3249_v49 = vld [vmem:[%s8160_s1 + $0x88] sm:$0xff] }
 0x22e   :  { %v1763_v9 = vadd.f32 %v6889_v8, %v1762_v41  ;;  %vm1764_vm9 = vweird.f32 %v6847_v32  ;;  %v1768_v58 = vand.u32 2147483647, %v6847_v32  ;;  %v2369_v42 = vsub.f32 1.0, %v2368_v39 }
 0x22f   :  { %vm6931_vm10 = vmor %vm1764_vm9, %vm1765_vm0  ;;  %4353 = vtanh.f32 %v731_v11  ;;  %v2376_v43 = vand.u32 2147483647, %v6875_v5  ;;  %v2378_v53 = vand.u32 2147483648, %v6875_v5  ;;  %v645_v63 = vadd.f32 %v644_v6, %v5077_v14 }
 0x230   :  { %v4346_v1 = vpop.eup %4345  ;;  %v2973_v0 = vsel %vm2970_vm8, %v2972_v36, %v2968_v48  ;;  %v1767_v26 = vsel %vm6931_vm10, %v6889_v8, %v1763_v9  ;;  %v2370_v32 = vmul.f32 %v4344_v56, %v2369_v42  ;;  %vm2373_vm11 = vweird.f32 %v4344_v56  ;;  %v733_v36 = vpop.f32.mrf.mxu0 }
 0x231   :  { %v4348_v21 = vpop.eup %4347  ;;  %v3536_v22 = vmul.f32 %v4346_v1, %v2973_v0  ;;  %v1771_v33 = vor.u32 1.1754944e-38, %v1770_v25  ;;  %v1162_v50 = vand.u32 2147483648, %v8354_v13  ;;  %v3898_v23 = vmul.f32 -1.442695, %v645_v63  ;;  %v3313_v13 = vld [vmem:[#allocation2 + $0x88] sm:$0xff]  ;;  %v557_v1 = vpop.f32.mrf.mxu2 }
 0x232   :  { %v6942_v55 = vpop.eup %4349  ;;  %vm1769_vm15 = vcmp.eq.f32.partialorder %v1768_v58, 8.507059e+37  ;;  %v2371_v8 = vadd.f32 %v4344_v56, %v2370_v32  ;;  %vm2372_vm14 = vweird.f32 %v6875_v5  ;;  %v6953_v60 = vadd.f32 1.0, %v4348_v21 }
 0x233   :  { %v4352_v34 = vpop.eup %4351  ;;  %3568 = vst [vmem:[#allocation7 + $0x108] sm:$0xff] %v3536_v22  ;;  %v1772_v15 = vsel %vm1769_vm15, %v1771_v33, %v1767_v26  ;;  %vm2374_vm2 = vmor %vm2372_vm14, %vm2373_vm11  ;;  %v2379_v31 = vor.u32 1.1754944e-38, %v2378_v53  ;;  %v2976_v28 = vmul.f32 %v6942_v55, %v6916_v2  ;;  %4355 = vpow2.f32 %v3898_v23 }
 0x234   :  { %v1159_v5 = vsel %vm6948_vm13, %v8355_v62, %v6902_v47  ;;  %v2375_v11 = vsel %vm2374_vm2, %v4344_v56, %v2371_v8  ;;  %vm2377_vm1 = vcmp.eq.f32.partialorder %v2376_v43, 8.507059e+37  ;;  %4357 = vrcp.f32 %v6953_v60  ;;  %v468_v47 = vpop.f32.mrf.mxu1 }
 0x235   :  { %v4354_v41 = vpop.eup %4353  ;;  %v1163_v39 = vor.u32 1.1754944e-38, %v1162_v50  ;;  %v2380_v48 = vsel %vm2377_vm1, %v2379_v31, %v2375_v11  ;;  %v2977_v25 = vsub.f32 1.0, %v2976_v28  ;;  %v6966_v9 = vadd.f32 1.0, %v4352_v34 }
 0x236   :  { %v3281_v58 = vmul.f32 %v3249_v49, %v1772_v15  ;;  %vm1161_vm3 = vcmp.eq.f32.partialorder %v1160_v3, 8.507059e+37  ;;  %v3345_v42 = vmul.f32 %v3313_v13, %v2380_v48  ;;  %v734_v6 = vadd.f32 %v733_v36, %v5113_v35 }
 0x237   :  { %v1183_v12 = vsub.f32 1.0, %v6851_v20  ;;  %v1164_v53 = vsel %vm1161_vm3, %v1163_v39, %v1159_v5  ;;  %v2978_v62 = vmul.f32 %v6942_v55, %v2977_v25  ;;  %4359 = vrcp.f32 %v6966_v9 }
 0x238   :  { %4361 = vrcp.f32 %v6881_v40  ;;  %v3409_v56 = vmul.f32 %v4354_v41, %v1164_v53  ;;  %v3377_v43 = vadd.f32 %v3345_v42, %v3281_v58  ;;  %v469_v63 = vadd.f32 %v468_v47, %v5046_v57  ;;  %v646_v53 = vpop.f32.mrf.mxu3 }
 0x239   :  { %v4356_v0 = vpop.eup %4355  ;;  %v1198_v3 = vsub.f32 1.0, %v6897_v52  ;;  %4363 = vpow2.f32 %v6884_v38  ;;  %v1169_v26 = vmul.f32 %v8363_v51, %v1168_v61  ;;  %v558_v32 = vadd.f32 %v557_v1, %v5074_v24 }
 0x23a   :  { %v4358_v21 = vpop.eup %4357  ;;  %v3441_v22 = vadd.f32 %v3409_v56, %v3377_v43  ;;  %vm1172_vm12 = vweird.f32 %v8363_v51  ;;  %4365 = vtanh.f32 %v734_v6  ;;  %v6981_v33 = vadd.f32 1.0, %v4356_v0 }
 0x23b   :  { %v2979_v50 = vadd.f32 %v6942_v55, %v2978_v62  ;;  %vm2981_vm5 = vweird.f32 %v6942_v55  ;;  %v1775_v23 = vmul.f32 %v4358_v21, %v6953_v60  ;;  %vm1171_vm6 = vweird.f32 %v8362_v30 }
 0x23c   :  { %v3835_v29 = vmul.f32 -1.442695, %v469_v63  ;;  %3473 = vst [vmem:[#allocation7 + $0x110] sm:$0xff] %v3441_v22  ;;  %4367 = vtanh.f32 %v3441_v22  ;;  %vm2980_vm4 = vweird.f32 %v6916_v2  ;;  %v2986_v61 = vand.u32 2147483648, %v6916_v2  ;;  %vm7029_vm13 = vmor %vm1171_vm6, %vm1172_vm12 }
 0x23d   :  { %v1175_v38 = vand.u32 2147483647, %v8362_v30  ;;  %v4360_v4 = vpop.eup %4359  ;;  %v2984_v8 = vand.u32 2147483647, %v6916_v2  ;;  %v1776_v34 = vsub.f32 1.0, %v1775_v23  ;;  %4369 = vrcp.f32 %v6981_v33  ;;  %vm6996_vm7 = vmor %vm2980_vm4, %vm2981_vm5 }
 0x23e   :  { %v3867_v15 = vmul.f32 -1.442695, %v558_v32  ;;  %v6992_v49 = vpop.eup %4361  ;;  %vm1779_vm0 = vweird.f32 %v6953_v60  ;;  %v1170_v13 = vadd.f32 %v8363_v51, %v1169_v26  ;;  %v2383_v28 = vmul.f32 %v4360_v4, %v6966_v9 }
 0x23f   :  { %4371 = vpow2.f32 %v3835_v29  ;;  %v4364_v2 = vpop.eup %4363  ;;  %v2983_v36 = vsel %vm6996_vm7, %v6942_v55, %v2979_v50  ;;  %v1777_v5 = vmul.f32 %v4358_v21, %v1776_v34  ;;  %vm1780_vm8 = vweird.f32 %v4358_v21 }
 0x240   :  { %v1785_v11 = vand.u32 2147483648, %v6953_v60  ;;  %v4366_v41 = vpop.eup %4365  ;;  %v2987_v39 = vor.u32 1.1754944e-38, %v2986_v61  ;;  %v1783_v48 = vand.u32 2147483647, %v6953_v60  ;;  %v2384_v25 = vsub.f32 1.0, %v2383_v28  ;;  %vm7012_vm10 = vmor %vm1779_vm0, %vm1780_vm8  ;;  %v3250_v60 = vld [vmem:[%s8160_s1 + $0x90] sm:$0xff] }
 0x241   :  { %4373 = vpow2.f32 %v3867_v15  ;;  %vm2985_vm9 = vcmp.eq.f32.partialorder %v2984_v8, 8.507059e+37  ;;  %v1778_v58 = vadd.f32 %v4358_v21, %v1777_v5  ;;  %v2391_v42 = vand.u32 2147483647, %v6966_v9  ;;  %v3314_v8 = vld [vmem:[#allocation2 + $0x90] sm:$0xff] }
 0x242   :  { %v2393_v6 = vand.u32 2147483648, %v6966_v9  ;;  %v4368_v62 = vpop.eup %4367  ;;  %v2988_v47 = vsel %vm2985_vm9, %v2987_v39, %v2983_v36  ;;  %v2385_v56 = vmul.f32 %v4360_v4, %v2384_v25  ;;  %vm2388_vm11 = vweird.f32 %v4360_v4  ;;  %v8408_v36 = vld [vmem:[#allocation24_spill] sm:$0xff] }
 0x243   :  { %v647_v43 = vadd.f32 %v646_v53, %v5077_v14  ;;  %v7017_v63 = vpop.eup %4369  ;;  %v3537_v1 = vmul.f32 %v4368_v62, %v2988_v47  ;;  %v1782_v0 = vsel %vm7012_vm10, %v4358_v21, %v1778_v58  ;;  %v1786_v26 = vor.u32 1.1754944e-38, %v1785_v11  ;;  %v560_v47 = vpop.f32.mrf.mxu2 }
 0x244   :  { %v1177_v32 = vand.u32 2147483648, %v8362_v30  ;;  %vm1784_vm15 = vcmp.eq.f32.partialorder %v1783_v48, 8.507059e+37  ;;  %v2386_v23 = vadd.f32 %v4360_v4, %v2385_v56  ;;  %vm2387_vm14 = vweird.f32 %v6966_v9  ;;  %v735_v56 = vpop.f32.mrf.mxu0 }
 0x245   :  { %v4372_v22 = vpop.eup %4371  ;;  %v2991_v21 = vmul.f32 %v7017_v63, %v6981_v33  ;;  %3569 = vst [vmem:[#allocation7 + $0x118] sm:$0xff] %v3537_v1  ;;  %v1787_v29 = vsel %vm1784_vm15, %v1786_v26, %v1782_v0  ;;  %vm2389_vm2 = vmor %vm2387_vm14, %vm2388_vm11  ;;  %v2394_v61 = vor.u32 1.1754944e-38, %v2393_v6  ;;  %v3899_v15 = vmul.f32 -1.442695, %v647_v43 }
 0x246   :  { %v7037_v34 = vadd.f32 1.0, %v4372_v22  ;;  %v1174_v31 = vsel %vm7029_vm13, %v8363_v51, %v1170_v13  ;;  %v2390_v28 = vsel %vm2389_vm2, %v4360_v4, %v2386_v23  ;;  %vm2392_vm1 = vcmp.eq.f32.partialorder %v2391_v42, 8.507059e+37 }
 0x247   :  { %v4374_v30 = vpop.eup %4373  ;;  %v2992_v9 = vsub.f32 1.0, %v2991_v21  ;;  %v3807_v5 = vmul.f32 -1.442695, %v8408_v36  ;;  %v1178_v11 = vor.u32 1.1754944e-38, %v1177_v32  ;;  %v2395_v39 = vsel %vm2392_vm1, %v2394_v61, %v2390_v28 }
 0x248   :  { %4375 = vrcp.f32 %v7037_v34  ;;  %v3282_v48 = vmul.f32 %v3250_v60, %v1787_v29  ;;  %vm1176_vm3 = vcmp.eq.f32.partialorder %v1175_v38, 8.507059e+37  ;;  %v3346_v25 = vmul.f32 %v3314_v8, %v2395_v39  ;;  %v471_v38 = vpop.f32.mrf.mxu1  ;;  %v649_v39 = vpop.f32.mrf.mxu3 }
 0x249   :  { %v7044_v58 = vadd.f32 1.0, %v4374_v30  ;;  %v1179_v6 = vsel %vm1176_vm3, %v1178_v11, %v1174_v31  ;;  %v2993_v53 = vmul.f32 %v7017_v63, %v2992_v9  ;;  %v1184_v51 = vmul.f32 %v6025_v7, %v1183_v12 }
 0x24a   :  { %4377 = vpow2.f32 %v3899_v15  ;;  %v7052_v4 = vmul.f32 %v6992_v49, %v6881_v40  ;;  %v3410_v13 = vmul.f32 %v4366_v41, %v1179_v6  ;;  %v3378_v42 = vadd.f32 %v3346_v25, %v3282_v48 }
 0x24b   :  { %4379 = vrcp.f32 %v7044_v58  ;;  %v7055_v62 = vadd.f32 1.0, %v4364_v2  ;;  %vm2995_vm12 = vweird.f32 %v6981_v33  ;;  %vm2996_vm5 = vweird.f32 %v7017_v63 }
 0x24c   :  { %v472_v20 = vadd.f32 %v471_v38, %v5046_v57  ;;  %4381 = vpow2.f32 %v3807_v5  ;;  %v3442_v12 = vadd.f32 %v3410_v13, %v3378_v42  ;;  %v3001_v55 = vand.u32 2147483648, %v6981_v33  ;;  %vm7071_vm6 = vmor %vm2995_vm12, %vm2996_vm5 }
 0x24d   :  { %v561_v41 = vadd.f32 %v560_v47, %v5074_v24  ;;  %v2994_v1 = vadd.f32 %v7017_v63, %v2993_v53  ;;  %v2999_v2 = vand.u32 2147483647, %v6981_v33  ;;  %v7065_v0 = vadd.f32 %v6025_v7, %v1184_v51 }
 0x24e   :  { %v4376_v43 = vpop.eup %4375  ;;  %v3836_v26 = vmul.f32 -1.442695, %v472_v20  ;;  %3474 = vst [vmem:[#allocation7 + $0x120] sm:$0xff] %v3442_v12  ;;  %4383 = vtanh.f32 %v3442_v12  ;;  %vm1186_vm4 = vweird.f32 %v5962_v46  ;;  %v736_v23 = vadd.f32 %v735_v56, %v5113_v35 }
 0x24f   :  { %v1790_v22 = vmul.f32 %v4376_v43, %v7037_v34  ;;  %v3868_v60 = vmul.f32 -1.442695, %v561_v41  ;;  %vm1187_vm7 = vweird.f32 %v6025_v7  ;;  %v1190_v21 = vand.u32 2147483647, %v5962_v46 }
 0x250   :  { %v4378_v50 = vpop.eup %4377  ;;  %4385 = vpow2.f32 %v3836_v26  ;;  %v3002_v61 = vor.u32 1.1754944e-38, %v3001_v55  ;;  %v1192_v8 = vand.u32 2147483648, %v5962_v46  ;;  %v2998_v30 = vsel %vm7071_vm6, %v7017_v63, %v2994_v1  ;;  %vm7107_vm15 = vmor %vm1186_vm4, %vm1187_vm7  ;;  %v3251_v26 = vld [vmem:[%s8160_s1 + $0x98] sm:$0xff]  ;;  %v473_v52 = vpop.f32.mrf.mxu1 }
 0x251   :  { %v4380_v29 = vpop.eup %4379  ;;  %v1791_v33 = vsub.f32 1.0, %v1790_v22  ;;  %v7081_v15 = vadd.f32 1.0, %v4378_v50  ;;  %vm3000_vm0 = vcmp.eq.f32.partialorder %v2999_v2, 8.507059e+37  ;;  %4387 = vpow2.f32 %v3868_v60  ;;  %v3315_v60 = vld [vmem:[#allocation2 + $0x98] sm:$0xff] }
 0x252   :  { %v2398_v31 = vmul.f32 %v4380_v29, %v7044_v58  ;;  %v7087_v28 = vpop.eup %4381  ;;  %vm1795_vm8 = vweird.f32 %v4376_v43  ;;  %v1800_v36 = vand.u32 2147483648, %v7037_v34  ;;  %vm1794_vm9 = vweird.f32 %v7037_v34 }
 0x253   :  { %v1792_v9 = vmul.f32 %v4376_v43, %v1791_v33  ;;  %4389 = vrcp.f32 %v7081_v15  ;;  %v1798_v5 = vand.u32 2147483647, %v7037_v34  ;;  %v3003_v48 = vsel %vm3000_vm0, %v3002_v61, %v2998_v30  ;;  %vm7096_vm10 = vmor %vm1794_vm9, %vm1795_vm8 }
 0x254   :  { %4391 = vtanh.f32 %v736_v23  ;;  %v2399_v11 = vsub.f32 1.0, %v2398_v31  ;;  %v4384_v63 = vpop.eup %4383  ;;  %v2408_v6 = vand.u32 2147483648, %v7044_v58  ;;  %v650_v53 = vadd.f32 %v649_v39, %v5077_v14 }
 0x255   :  { %v1793_v25 = vadd.f32 %v4376_v43, %v1792_v9  ;;  %v3538_v13 = vmul.f32 %v4384_v63, %v3003_v48  ;;  %vm2403_vm11 = vweird.f32 %v4380_v29  ;;  %v2406_v34 = vand.u32 2147483647, %v7044_v58 }
 0x256   :  { %v4386_v51 = vpop.eup %4385  ;;  %v2400_v38 = vmul.f32 %v4380_v29, %v2399_v11  ;;  %v1801_v47 = vor.u32 1.1754944e-38, %v1800_v36  ;;  %v3900_v56 = vmul.f32 -1.442695, %v650_v53  ;;  %vm1799_vm13 = vcmp.eq.f32.partialorder %v1798_v5, 8.507059e+37  ;;  %v8417_v5 = vld [vmem:[#allocation27_spill] sm:$0xff] }
 0x257   :  { %v1797_v20 = vsel %vm7096_vm10, %v4376_v43, %v1793_v25  ;;  %v7111_v55 = vadd.f32 1.0, %v4386_v51  ;;  %v4388_v41 = vpop.eup %4387  ;;  %3570 = vst [vmem:[#allocation7 + $0x128] sm:$0xff] %v3538_v13  ;;  %v1189_v43 = vsel %vm7107_vm15, %v6025_v7, %v7065_v0  ;;  %vm2402_vm14 = vweird.f32 %v7044_v58  ;;  %v738_v7 = vpop.f32.mrf.mxu0 }
 0x258   :  { %v2401_v1 = vadd.f32 %v4380_v29, %v2400_v38  ;;  %v1802_v46 = vsel %vm1799_vm13, %v1801_v47, %v1797_v20  ;;  %vm7123_vm2 = vcmp.eq.f32.partialorder %v1190_v21, 8.507059e+37  ;;  %vm2404_vm1 = vmor %vm2402_vm14, %vm2403_vm11  ;;  %v2409_v22 = vor.u32 1.1754944e-38, %v2408_v6  ;;  %v562_v6 = vpop.f32.mrf.mxu2 }
 0x259   :  { %v7118_v2 = vpop.eup %4389  ;;  %4393 = vrcp.f32 %v7111_v55  ;;  %v1193_v58 = vor.u32 1.1754944e-38, %v1192_v8  ;;  %vm2407_vm3 = vcmp.eq.f32.partialorder %v2406_v34, 8.507059e+37  ;;  %v1199_v21 = vmul.f32 %v6825_v17, %v1198_v3  ;;  %v8418_v8 = vld [vmem:[#allocation34_spill] sm:$0xff] }
 0x25a   :  { %v4392_v0 = vpop.eup %4391  ;;  %v2405_v50 = vsel %vm2404_vm1, %v4380_v29, %v2401_v1  ;;  %v3006_v23 = vmul.f32 %v7118_v2, %v7081_v15  ;;  %v7134_v33 = vadd.f32 1.0, %v4388_v41  ;;  %4395 = vpow2.f32 %v3900_v56 }
 0x25b   :  { %v2410_v61 = vsel %vm2407_vm3, %v2409_v22, %v2405_v50  ;;  %v3283_v30 = vmul.f32 %v3251_v26, %v1802_v46  ;;  %v739_v36 = vadd.f32 %v738_v7, %v5113_v35  ;;  %v7139_v29 = vmul.f32 %v8418_v8, %v8417_v5 }
 0x25c   :  { %v3347_v31 = vmul.f32 %v3315_v60, %v2410_v61  ;;  %v3007_v9 = vsub.f32 1.0, %v3006_v23  ;;  %v1213_v11 = vsub.f32 1.0, %v7052_v4  ;;  %v1194_v39 = vsel %vm7123_vm2, %v1193_v58, %v1189_v43 }
 0x25d   :  { %4397 = vrcp.f32 %v7134_v33  ;;  %v3411_v3 = vmul.f32 %v4392_v0, %v1194_v39  ;;  %v474_v25 = vadd.f32 %v473_v52, %v5046_v57  ;;  %v7151_v51 = vadd.f32 1.0, %v7087_v28 }
 0x25e   :  { %v3379_v63 = vadd.f32 %v3347_v31, %v3283_v30  ;;  %v3008_v48 = vmul.f32 %v7118_v2, %v3007_v9  ;;  %4399 = vrcp.f32 %v7055_v62  ;;  %v7154_v13 = vadd.f32 %v6825_v17, %v1199_v21  ;;  %v651_v30 = vpop.f32.mrf.mxu3 }
 0x25f   :  { %v7147_v53 = vpop.eup %4393  ;;  %v563_v42 = vadd.f32 %v562_v6, %v5074_v24  ;;  %vm1202_vm12 = vweird.f32 %v6825_v17  ;;  %4401 = vtanh.f32 %v739_v36  ;;  %vm3011_vm5 = vweird.f32 %v7118_v2  ;;  %v740_v26 = vpop.f32.mrf.mxu0 }
 0x260   :  { %v3443_v38 = vadd.f32 %v3411_v3, %v3379_v63  ;;  %v1805_v34 = vmul.f32 %v7147_v53, %v7111_v55  ;;  %v4396_v20 = vpop.eup %4395  ;;  %v3009_v47 = vadd.f32 %v7118_v2, %v3008_v48  ;;  %vm1201_vm6 = vweird.f32 %v6724_v44 }
 0x261   :  { %v3837_v28 = vmul.f32 -1.442695, %v474_v25  ;;  %v3869_v12 = vmul.f32 -1.442695, %v563_v42  ;;  %v3016_v56 = vand.u32 2147483648, %v7081_v15  ;;  %v7164_v43 = vadd.f32 1.0, %v4396_v20  ;;  %vm7207_vm13 = vmor %vm1201_vm6, %vm1202_vm12 }
 0x262   :  { %3475 = vst [vmem:[#allocation7 + $0x130] sm:$0xff] %v3443_v38  ;;  %4403 = vtanh.f32 %v3443_v38  ;;  %v1806_v41 = vsub.f32 1.0, %v1805_v34  ;;  %vm3010_vm4 = vweird.f32 %v7081_v15  ;;  %v3014_v46 = vand.u32 2147483647, %v7081_v15 }
 0x263   :  { %v4398_v1 = vpop.eup %4397  ;;  %vm1809_vm7 = vweird.f32 %v7111_v55  ;;  %4405 = vpow2.f32 %v3837_v28  ;;  %vm7169_vm0 = vmor %vm3010_vm4, %vm3011_vm5  ;;  %vm1810_vm8 = vweird.f32 %v7147_v53  ;;  %v1815_v7 = vand.u32 2147483648, %v7111_v55 }
 0x264   :  { %v1807_v32 = vmul.f32 %v7147_v53, %v1806_v41  ;;  %v2413_v22 = vmul.f32 %v4398_v1, %v7134_v33  ;;  %4407 = vrcp.f32 %v7164_v43  ;;  %v7177_v60 = vpop.eup %4399  ;;  %v3013_v15 = vsel %vm7169_vm0, %v7118_v2, %v3009_v47  ;;  %vm7190_vm10 = vmor %vm1809_vm7, %vm1810_vm8 }
 0x265   :  { %v1205_v0 = vand.u32 2147483647, %v6724_v44  ;;  %4409 = vpow2.f32 %v3869_v12  ;;  %v4402_v58 = vpop.eup %4401  ;;  %v3017_v50 = vor.u32 1.1754944e-38, %v3016_v56  ;;  %v1813_v61 = vand.u32 2147483647, %v7111_v55  ;;  %v3252_v12 = vld [vmem:[%s8160_s1 + $0xa0] sm:$0xff] }
 0x266   :  { %v1808_v23 = vadd.f32 %v7147_v53, %v1807_v32  ;;  %v2414_v21 = vsub.f32 1.0, %v2413_v22  ;;  %vm3015_vm9 = vcmp.eq.f32.partialorder %v3014_v46, 8.507059e+37  ;;  %v2421_v31 = vand.u32 2147483647, %v7134_v33 }
 0x267   :  { %v2423_v9 = vand.u32 2147483648, %v7134_v33  ;;  %v652_v36 = vadd.f32 %v651_v30, %v5077_v14  ;;  %v3018_v52 = vsel %vm3015_vm9, %v3017_v50, %v3013_v15  ;;  %vm2418_vm11 = vweird.f32 %v4398_v1 }
 0x268   :  { %v4404_v39 = vpop.eup %4403  ;;  %v1812_v3 = vsel %vm7190_vm10, %v7147_v53, %v1808_v23  ;;  %v2415_v63 = vmul.f32 %v4398_v1, %v2414_v21  ;;  %v1816_v25 = vor.u32 1.1754944e-38, %v1815_v7  ;;  %v1207_v6 = vand.u32 2147483648, %v6724_v44  ;;  %v3316_v44 = vld [vmem:[#allocation2 + $0xa0] sm:$0xff] }
 0x269   :  { %v4406_v48 = vpop.eup %4405  ;;  %v3539_v55 = vmul.f32 %v4404_v39, %v3018_v52  ;;  %v3901_v42 = vmul.f32 -1.442695, %v652_v36  ;;  %vm1814_vm15 = vcmp.eq.f32.partialorder %v1813_v61, 8.507059e+37  ;;  %vm2417_vm14 = vweird.f32 %v7134_v33  ;;  %v565_v36 = vpop.f32.mrf.mxu2 }
 0x26a   :  { %v7201_v38 = vpop.eup %4407  ;;  %v2416_v53 = vadd.f32 %v4398_v1, %v2415_v63  ;;  %v7212_v20 = vadd.f32 1.0, %v4406_v48  ;;  %v1817_v28 = vsel %vm1814_vm15, %v1816_v25, %v1812_v3  ;;  %vm2419_vm2 = vmor %vm2417_vm14, %vm2418_vm11  ;;  %v2424_v56 = vor.u32 1.1754944e-38, %v2423_v9 }
 0x26b   :  { %v4410_v47 = vpop.eup %4409  ;;  %3571 = vst [vmem:[#allocation7 + $0x138] sm:$0xff] %v3539_v55  ;;  %v3021_v41 = vmul.f32 %v7201_v38, %v7164_v43  ;;  %4411 = vpow2.f32 %v3901_v42  ;;  %v1204_v33 = vsel %vm7207_vm13, %v6825_v17, %v7154_v13  ;;  %vm2422_vm1 = vcmp.eq.f32.partialorder %v2421_v31, 8.507059e+37 }
 0x26c   :  { %v2420_v46 = vsel %vm2419_vm2, %v4398_v1, %v2416_v53  ;;  %4413 = vrcp.f32 %v7212_v20  ;;  %v1208_v32 = vor.u32 1.1754944e-38, %v1207_v6  ;;  %v7225_v7 = vadd.f32 1.0, %v4410_v47  ;;  %v476_v1 = vpop.f32.mrf.mxu1 }
 0x26d   :  { %v2425_v22 = vsel %vm2422_vm1, %v2424_v56, %v2420_v46  ;;  %v3022_v15 = vsub.f32 1.0, %v3021_v41  ;;  %v7229_v50 = vmul.f32 %v7177_v60, %v7055_v62  ;;  %v3284_v23 = vmul.f32 %v3252_v12, %v1817_v28 }
 0x26e   :  { %vm1206_vm3 = vcmp.eq.f32.partialorder %v1205_v0, 8.507059e+37  ;;  %v3348_v61 = vmul.f32 %v3316_v44, %v2425_v22  ;;  %v741_v13 = vadd.f32 %v740_v26, %v5113_v35  ;;  %4415 = vrcp.f32 %v7225_v7 }
 0x26f   :  { %v1209_v21 = vsel %vm1206_vm3, %v1208_v32, %v1204_v33  ;;  %v3023_v17 = vmul.f32 %v7201_v38, %v3022_v15  ;;  %v1214_v31 = vmul.f32 %v6992_v49, %v1213_v11  ;;  %v477_v9 = vadd.f32 %v476_v1, %v5046_v57 }
 0x270   :  { %v3412_v30 = vmul.f32 %v4402_v58, %v1209_v21  ;;  %v3380_v2 = vadd.f32 %v3348_v61, %v3284_v23  ;;  %4417 = vrcp.f32 %v7151_v51  ;;  %vm3025_vm12 = vweird.f32 %v7164_v43  ;;  %v654_v21 = vpop.f32.mrf.mxu3 }
 0x271   :  { %v4412_v39 = vpop.eup %4411  ;;  %vm3026_vm5 = vweird.f32 %v7201_v38  ;;  %v566_v0 = vadd.f32 %v565_v36, %v5074_v24  ;;  %v3029_v58 = vand.u32 2147483647, %v7164_v43  ;;  %v3031_v4 = vand.u32 2147483648, %v7164_v43 }
 0x272   :  { %v4414_v52 = vpop.eup %4413  ;;  %v3444_v3 = vadd.f32 %v3412_v30, %v3380_v2  ;;  %v7244_v63 = vadd.f32 1.0, %v4412_v39  ;;  %v3024_v11 = vadd.f32 %v7201_v38, %v3023_v17  ;;  %4419 = vtanh.f32 %v741_v13  ;;  %vm7251_vm6 = vmor %vm3025_vm12, %vm3026_vm5  ;;  %v567_v13 = vpop.f32.mrf.mxu2 }
 0x273   :  { %v1820_v48 = vmul.f32 %v4414_v52, %v7212_v20  ;;  %v3838_v55 = vmul.f32 -1.442695, %v477_v9  ;;  %v1228_v25 = vsub.f32 1.0, %v7229_v50  ;;  %v7256_v42 = vadd.f32 %v6992_v49, %v1214_v31  ;;  %v743_v50 = vpop.f32.mrf.mxu0 }
 0x274   :  { %3476 = vst [vmem:[#allocation7 + $0x140] sm:$0xff] %v3444_v3  ;;  %4421 = vtanh.f32 %v3444_v3  ;;  %vm1216_vm4 = vweird.f32 %v6881_v40  ;;  %v4416_v34 = vpop.eup %4415  ;;  %vm1217_vm7 = vweird.f32 %v6992_v49  ;;  %v3870_v47 = vmul.f32 -1.442695, %v566_v0  ;;  %v3253_v0 = vld [vmem:[%s8160_s1 + $0xa8] sm:$0xff] }
 0x275   :  { %v1821_v53 = vsub.f32 1.0, %v1820_v48  ;;  %4423 = vrcp.f32 %v7244_v63  ;;  %vm7261_vm0 = vcmp.eq.f32.partialorder %v3029_v58, 8.507059e+37  ;;  %v3032_v43 = vor.u32 1.1754944e-38, %v3031_v4  ;;  %vm7296_vm13 = vmor %vm1216_vm4, %vm1217_vm7  ;;  %v3317_v48 = vld [vmem:[#allocation2 + $0xa8] sm:$0xff] }
 0x276   :  { %v2428_v12 = vmul.f32 %v4416_v34, %v7225_v7  ;;  %4425 = vpow2.f32 %v3838_v55  ;;  %v7266_v56 = vpop.eup %4417  ;;  %v3028_v44 = vsel %vm7251_vm6, %v7201_v38, %v3024_v11  ;;  %vm1825_vm8 = vweird.f32 %v4414_v52 }
 0x277   :  { %v1822_v41 = vmul.f32 %v4414_v52, %v1821_v53  ;;  %v1830_v33 = vand.u32 2147483648, %v7212_v20  ;;  %v1828_v46 = vand.u32 2147483647, %v7212_v20  ;;  %v1220_v26 = vand.u32 2147483647, %v6881_v40 }
 0x278   :  { %v2429_v32 = vsub.f32 1.0, %v2428_v12  ;;  %4427 = vpow2.f32 %v3870_v47  ;;  %v4420_v22 = vpop.eup %4419  ;;  %vm1824_vm9 = vweird.f32 %v7212_v20  ;;  %v2436_v23 = vand.u32 2147483647, %v7225_v7 }
 0x279   :  { %v1823_v15 = vadd.f32 %v4414_v52, %v1822_v41  ;;  %v2438_v61 = vand.u32 2147483648, %v7225_v7  ;;  %v3033_v17 = vsel %vm7261_vm0, %v3032_v43, %v3028_v44  ;;  %vm7279_vm10 = vmor %vm1824_vm9, %vm1825_vm8  ;;  %vm2433_vm11 = vweird.f32 %v4416_v34 }
 0x27a   :  { %v4422_v38 = vpop.eup %4421  ;;  %v2430_v1 = vmul.f32 %v4416_v34, %v2429_v32  ;;  %v655_v30 = vadd.f32 %v654_v21, %v5077_v14  ;;  %v1831_v9 = vor.u32 1.1754944e-38, %v1830_v33  ;;  %v1222_v36 = vand.u32 2147483648, %v6881_v40 }
 0x27b   :  { %v7284_v2 = vpop.eup %4423  ;;  %v3540_v20 = vmul.f32 %v4422_v38, %v3033_v17  ;;  %v1827_v31 = vsel %vm7279_vm10, %v4414_v52, %v1823_v15  ;;  %vm1829_vm15 = vcmp.eq.f32.partialorder %v1828_v46, 8.507059e+37  ;;  %vm2432_vm14 = vweird.f32 %v7225_v7 }
 0x27c   :  { %v4426_v39 = vpop.eup %4425  ;;  %v2431_v58 = vadd.f32 %v4416_v34, %v2430_v1  ;;  %v3036_v52 = vmul.f32 %v7284_v2, %v7244_v63  ;;  %v1832_v4 = vsel %vm1829_vm15, %v1831_v9, %v1827_v31  ;;  %vm2434_vm2 = vmor %vm2432_vm14, %vm2433_vm11  ;;  %v2439_v11 = vor.u32 1.1754944e-38, %v2438_v61  ;;  %v8433_v61 = vld [vmem:[#allocation16_spill] sm:$0xff] }
 0x27d   :  { %3572 = vst [vmem:[#allocation7 + $0x148] sm:$0xff] %v3540_v20  ;;  %v7304_v55 = vadd.f32 1.0, %v4426_v39  ;;  %v3902_v6 = vmul.f32 -1.442695, %v655_v30  ;;  %v1219_v53 = vsel %vm7296_vm13, %v6992_v49, %v7256_v42  ;;  %vm2437_vm1 = vcmp.eq.f32.partialorder %v2436_v23, 8.507059e+37 }
 0x27e   :  { %v4428_v40 = vpop.eup %4427  ;;  %v2435_v47 = vsel %vm2434_vm2, %v4416_v34, %v2431_v58  ;;  %v3037_v7 = vsub.f32 1.0, %v3036_v52  ;;  %v7312_v28 = vmul.f32 %v7266_v56, %v7151_v51  ;;  %v1223_v43 = vor.u32 1.1754944e-38, %v1222_v36 }
 0x27f   :  { %v2440_v12 = vsel %vm2437_vm1, %v2439_v11, %v2435_v47  ;;  %4429 = vrcp.f32 %v7304_v55  ;;  %v3285_v44 = vmul.f32 %v3253_v0, %v1832_v4  ;;  %vm1221_vm3 = vcmp.eq.f32.partialorder %v1220_v26, 8.507059e+37  ;;  %v478_v26 = vpop.f32.mrf.mxu1 }
 0x280   :  { %v3349_v41 = vmul.f32 %v3317_v48, %v2440_v12  ;;  %v7315_v33 = vadd.f32 1.0, %v4428_v40  ;;  %v7319_v46 = vmul.f32 %v5653_v54, %v5201_v18  ;;  %v1224_v49 = vsel %vm1221_vm3, %v1223_v43, %v1219_v53 }
 0x281   :  { %v3038_v42 = vmul.f32 %v7284_v2, %v3037_v7  ;;  %4431 = vpow2.f32 %v3902_v6  ;;  %v3413_v34 = vmul.f32 %v4420_v22, %v1224_v49  ;;  %v1229_v15 = vmul.f32 %v7177_v60, %v1228_v25 }
 0x282   :  { %v3381_v32 = vadd.f32 %v3349_v41, %v3285_v44  ;;  %4433 = vrcp.f32 %v7315_v33  ;;  %v7327_v23 = vadd.f32 1.0, %v6013_v37  ;;  %v7330_v21 = vmul.f32 -1.442695, %v8433_v61  ;;  %v656_v44 = vpop.f32.mrf.mxu3 }
 0x283   :  { %v1243_v38 = vsub.f32 1.0, %v7312_v28  ;;  %v479_v17 = vadd.f32 %v478_v26, %v5046_v57  ;;  %v3046_v1 = vand.u32 2147483648, %v7244_v63  ;;  %vm1232_vm12 = vweird.f32 %v7177_v60 }
 0x284   :  { %v3445_v22 = vadd.f32 %v3413_v34, %v3381_v32  ;;  %v568_v25 = vadd.f32 %v567_v13, %v5074_v24  ;;  %v3039_v37 = vadd.f32 %v7284_v2, %v3038_v42  ;;  %vm3041_vm5 = vweird.f32 %v7284_v2 }
 0x285   :  { %v4430_v30 = vpop.eup %4429  ;;  %v1235_v20 = vand.u32 2147483647, %v7055_v62  ;;  %v3839_v31 = vmul.f32 -1.442695, %v479_v17  ;;  %v7342_v36 = vadd.f32 %v7177_v60, %v1229_v15  ;;  %vm1231_vm6 = vweird.f32 %v7055_v62 }
 0x286   :  { %3477 = vst [vmem:[#allocation7 + $0x150] sm:$0xff] %v3445_v22  ;;  %4435 = vtanh.f32 %v3445_v22  ;;  %v1835_v9 = vmul.f32 %v4430_v30, %v7304_v55  ;;  %v3871_v39 = vmul.f32 -1.442695, %v568_v25  ;;  %vm3040_vm4 = vweird.f32 %v7244_v63  ;;  %vm7383_vm13 = vmor %vm1231_vm6, %vm1232_vm12 }
 0x287   :  { %v4432_v0 = vpop.eup %4431  ;;  %v3044_v3 = vand.u32 2147483647, %v7244_v63  ;;  %v744_v58 = vadd.f32 %v743_v50, %v5113_v35  ;;  %4437 = vpow2.f32 %v3839_v31  ;;  %vm7350_vm7 = vmor %vm3040_vm4, %vm3041_vm5  ;;  %v3047_v11 = vor.u32 1.1754944e-38, %v3046_v1 }
 0x288   :  { %v4434_v52 = vpop.eup %4433  ;;  %v1836_v48 = vsub.f32 1.0, %v1835_v9  ;;  %v1237_v6 = vand.u32 2147483648, %v7055_v62  ;;  %v7355_v40 = vadd.f32 1.0, %v4432_v0  ;;  %v3043_v63 = vsel %vm7350_vm7, %v7284_v2, %v3039_v37 }
 0x289   :  { %vm1839_vm0 = vweird.f32 %v7304_v55  ;;  %v2443_v53 = vmul.f32 %v4434_v52, %v7315_v33  ;;  %4439 = vpow2.f32 %v3871_v39  ;;  %vm1840_vm8 = vweird.f32 %v4430_v30  ;;  %v3254_v39 = vld [vmem:[%s8160_s1 + $0xb0] sm:$0xff] }
 0x28a   :  { %v1837_v47 = vmul.f32 %v4430_v30, %v1836_v48  ;;  %v1845_v7 = vand.u32 2147483648, %v7304_v55  ;;  %4441 = vrcp.f32 %v7355_v40  ;;  %vm3045_vm9 = vcmp.eq.f32.partialorder %v3044_v3, 8.507059e+37  ;;  %vm7370_vm10 = vmor %vm1839_vm0, %vm1840_vm8 }
 0x28b   :  { %v1843_v43 = vand.u32 2147483647, %v7304_v55  ;;  %4443 = vtanh.f32 %v744_v58  ;;  %v2444_v12 = vsub.f32 1.0, %v2443_v53  ;;  %v3048_v49 = vsel %vm3045_vm9, %v3047_v11, %v3043_v63 }
 0x28c   :  { %v4436_v41 = vpop.eup %4435  ;;  %v1838_v2 = vadd.f32 %v4430_v30, %v1837_v47  ;;  %v2453_v42 = vand.u32 2147483648, %v7315_v33  ;;  %v657_v34 = vadd.f32 %v656_v44, %v5077_v14  ;;  %vm2448_vm11 = vweird.f32 %v4434_v52 }
 0x28d   :  { %v4438_v32 = vpop.eup %4437  ;;  %v3541_v15 = vmul.f32 %v4436_v41, %v3048_v49  ;;  %v2445_v61 = vmul.f32 %v4434_v52, %v2444_v12  ;;  %v2451_v17 = vand.u32 2147483647, %v7315_v33  ;;  %v1846_v22 = vor.u32 1.1754944e-38, %v1845_v7 }
 0x28e   :  { %v1842_v13 = vsel %vm7370_vm10, %v4430_v30, %v1838_v2  ;;  %v7377_v1 = vadd.f32 1.0, %v4438_v32  ;;  %v3903_v50 = vmul.f32 -1.442695, %v657_v34  ;;  %vm1844_vm15 = vcmp.eq.f32.partialorder %v1843_v43, 8.507059e+37  ;;  %v570_v43 = vpop.f32.mrf.mxu2 }
 0x28f   :  { %v4440_v25 = vpop.eup %4439  ;;  %3573 = vst [vmem:[#allocation7 + $0x158] sm:$0xff] %v3541_v15  ;;  %v2446_v37 = vadd.f32 %v4434_v52, %v2445_v61  ;;  %vm2447_vm14 = vweird.f32 %v7315_v33  ;;  %v1244_v30 = vmul.f32 %v7266_v56, %v1243_v38  ;;  %v1847_v9 = vsel %vm1844_vm15, %v1846_v22, %v1842_v13  ;;  %v3318_v33 = vld [vmem:[#allocation2 + $0xb0] sm:$0xff] }
 0x290   :  { %v7391_v31 = vpop.eup %4441  ;;  %v1234_v0 = vsel %vm7383_vm13, %v7177_v60, %v7342_v36  ;;  %vm2449_vm2 = vmor %vm2447_vm14, %vm2448_vm11  ;;  %v2454_v3 = vor.u32 1.1754944e-38, %v2453_v42  ;;  %4445 = vrcp.f32 %v7377_v1  ;;  %v1238_v38 = vor.u32 1.1754944e-38, %v1237_v6  ;;  %v745_v42 = vpop.f32.mrf.mxu0 }
 0x291   :  { %v4444_v28 = vpop.eup %4443  ;;  %v2450_v58 = vsel %vm2449_vm2, %v4434_v52, %v2446_v37  ;;  %vm2452_vm1 = vcmp.eq.f32.partialorder %v2451_v17, 8.507059e+37  ;;  %v3051_v4 = vmul.f32 %v7391_v31, %v7355_v40  ;;  %vm1236_vm3 = vcmp.eq.f32.partialorder %v1235_v20, 8.507059e+37  ;;  %v481_v52 = vpop.f32.mrf.mxu1 }
 0x292   :  { %v2455_v11 = vsel %vm2452_vm1, %v2454_v3, %v2450_v58  ;;  %v7406_v48 = vadd.f32 1.0, %v4440_v25  ;;  %4447 = vpow2.f32 %v3903_v50  ;;  %v3286_v60 = vmul.f32 %v3254_v39, %v1847_v9 }
 0x293   :  { %v1239_v36 = vsel %vm1236_vm3, %v1238_v38, %v1234_v0  ;;  %v3350_v63 = vmul.f32 %v3318_v33, %v2455_v11  ;;  %v3052_v53 = vsub.f32 1.0, %v3051_v4  ;;  %v7409_v47 = vadd.f32 %v7266_v56, %v1244_v30  ;;  %v659_v4 = vpop.f32.mrf.mxu3 }
 0x294   :  { %vm1246_vm12 = vweird.f32 %v7151_v51  ;;  %vm1247_vm5 = vweird.f32 %v7266_v56  ;;  %4449 = vrcp.f32 %v7406_v48  ;;  %v3414_v62 = vmul.f32 %v4444_v28, %v1239_v36 }
 0x295   :  { %v3382_v20 = vadd.f32 %v3350_v63, %v3286_v60  ;;  %v3053_v6 = vmul.f32 %v7391_v31, %v3052_v53  ;;  %v482_v7 = vadd.f32 %v481_v52, %v5046_v57  ;;  %vm3055_vm6 = vweird.f32 %v7355_v40  ;;  %vm7432_vm7 = vmor %vm1246_vm12, %vm1247_vm5 }
 0x296   :  { %v7416_v12 = vpop.eup %4445  ;;  %vm3056_vm4 = vweird.f32 %v7391_v31  ;;  %v3061_v44 = vand.u32 2147483648, %v7355_v40  ;;  %v571_v41 = vadd.f32 %v570_v43, %v5074_v24  ;;  %v1250_v34 = vand.u32 2147483647, %v7151_v51 }
 0x297   :  { %v3446_v49 = vadd.f32 %v3414_v62, %v3382_v20  ;;  %v1850_v2 = vmul.f32 %v7416_v12, %v7377_v1  ;;  %v1252_v32 = vand.u32 2147483648, %v7151_v51  ;;  %v3054_v26 = vadd.f32 %v7391_v31, %v3053_v6  ;;  %vm7440_vm0 = vmor %vm3055_vm6, %vm3056_vm4 }
 0x298   :  { %v4448_v15 = vpop.eup %4447  ;;  %v3059_v61 = vand.u32 2147483647, %v7355_v40  ;;  %v3840_v13 = vmul.f32 -1.442695, %v482_v7  ;;  %v3872_v22 = vmul.f32 -1.442695, %v571_v41  ;;  %v1249_v55 = vsel %vm7432_vm7, %v7266_v56, %v7409_v47  ;;  %v572_v47 = vpop.f32.mrf.mxu2 }
 0x299   :  { %3478 = vst [vmem:[#allocation7 + $0x160] sm:$0xff] %v3446_v49  ;;  %4451 = vtanh.f32 %v3446_v49  ;;  %v1851_v25 = vsub.f32 1.0, %v1850_v2  ;;  %v7448_v37 = vadd.f32 1.0, %v4448_v15  ;;  %v3062_v9 = vor.u32 1.1754944e-38, %v3061_v44 }
 0x29a   :  { %v4450_v30 = vpop.eup %4449  ;;  %v746_v39 = vadd.f32 %v745_v42, %v5113_v35  ;;  %4453 = vpow2.f32 %v3840_v13  ;;  %v1259_v40 = vmul.f32 %v8308_v16, %v1258_v19  ;;  %vm1855_vm8 = vweird.f32 %v7416_v12 }
 0x29b   :  { %v1852_v0 = vmul.f32 %v7416_v12, %v1851_v25  ;;  %v2458_v3 = vmul.f32 %v4450_v30, %v7406_v48  ;;  %4455 = vrcp.f32 %v7448_v37  ;;  %v3058_v33 = vsel %vm7440_vm0, %v7391_v31, %v3054_v26  ;;  %v748_v26 = vpop.f32.mrf.mxu0 }
 0x29c   :  { %vm3060_vm9 = vcmp.eq.f32.partialorder %v3059_v61, 8.507059e+37  ;;  %v1860_v28 = vand.u32 2147483648, %v7377_v1  ;;  %4457 = vpow2.f32 %v3872_v22  ;;  %vm1854_vm10 = vweird.f32 %v7377_v1 }
 0x29d   :  { %v1853_v10 = vadd.f32 %v7416_v12, %v1852_v0  ;;  %v1858_v19 = vand.u32 2147483647, %v7377_v1  ;;  %vm7465_vm11 = vcmp.eq.f32.partialorder %v1250_v34, 8.507059e+37  ;;  %v2459_v58 = vsub.f32 1.0, %v2458_v3  ;;  %vm7469_vm15 = vmor %vm1854_vm10, %vm1855_vm8  ;;  %v3319_v34 = vld [vmem:[#allocation2 + $0xb8] sm:$0xff] }
 0x29e   :  { %4459 = vtanh.f32 %v746_v39  ;;  %v2466_v31 = vand.u32 2147483647, %v7406_v48  ;;  %v2468_v60 = vand.u32 2147483648, %v7406_v48  ;;  %v660_v36 = vadd.f32 %v659_v4, %v5077_v14 }
 0x29f   :  { %v4452_v63 = vpop.eup %4451  ;;  %v3063_v53 = vsel %vm3060_vm9, %v3062_v9, %v3058_v33  ;;  %v1857_v1 = vsel %vm7469_vm15, %v7416_v12, %v1853_v10  ;;  %v2460_v52 = vmul.f32 %v4450_v30, %v2459_v58  ;;  %vm2463_vm13 = vweird.f32 %v4450_v30  ;;  %v3255_v12 = vld [vmem:[%s8160_s1 + $0xb8] sm:$0xff] }
 0x2a0   :  { %v4454_v62 = vpop.eup %4453  ;;  %v3542_v20 = vmul.f32 %v4452_v63, %v3063_v53  ;;  %v1861_v6 = vor.u32 1.1754944e-38, %v1860_v28  ;;  %vm1261_vm14 = vweird.f32 %v8307_v45  ;;  %v3904_v7 = vmul.f32 -1.442695, %v660_v36 }
 0x2a1   :  { %v7480_v43 = vpop.eup %4455  ;;  %vm1859_vm2 = vcmp.eq.f32.partialorder %v1858_v19, 8.507059e+37  ;;  %v2461_v44 = vadd.f32 %v4450_v30, %v2460_v52  ;;  %vm2462_vm1 = vweird.f32 %v7406_v48  ;;  %v7483_v41 = vadd.f32 1.0, %v4454_v62 }
 0x2a2   :  { %v4458_v49 = vpop.eup %4457  ;;  %3574 = vst [vmem:[#allocation7 + $0x168] sm:$0xff] %v3542_v20  ;;  %v1862_v2 = vsel %vm1859_vm2, %v1861_v6, %v1857_v1  ;;  %vm2464_vm3 = vmor %vm2462_vm1, %vm2463_vm13  ;;  %v2469_v42 = vor.u32 1.1754944e-38, %v2468_v60  ;;  %v3066_v15 = vmul.f32 %v7480_v43, %v7448_v37  ;;  %4461 = vpow2.f32 %v3904_v7 }
 0x2a3   :  { %v2465_v61 = vsel %vm2464_vm3, %v4450_v30, %v2461_v44  ;;  %vm2467_vm12 = vcmp.eq.f32.partialorder %v2466_v31, 8.507059e+37  ;;  %4463 = vrcp.f32 %v7483_v41  ;;  %vm1262_vm5 = vweird.f32 %v8308_v16 }
 0x2a4   :  { %v4460_v48 = vpop.eup %4459  ;;  %v1253_v13 = vor.u32 1.1754944e-38, %v1252_v32  ;;  %v2470_v22 = vsel %vm2467_vm12, %v2469_v42, %v2465_v61  ;;  %v3067_v50 = vsub.f32 1.0, %v3066_v15  ;;  %v7495_v25 = vadd.f32 1.0, %v4458_v49  ;;  %vm7512_vm6 = vmor %vm1261_vm14, %vm1262_vm5 }
 0x2a5   :  { %v3287_v9 = vmul.f32 %v3255_v12, %v1862_v2  ;;  %v3351_v39 = vmul.f32 %v3319_v34, %v2470_v22  ;;  %v749_v0 = vadd.f32 %v748_v26, %v5113_v35  ;;  %v7499_v3 = vadd.f32 %v8308_v16, %v1259_v40  ;;  %v483_v40 = vpop.f32.mrf.mxu1  ;;  %v661_v22 = vpop.f32.mrf.mxu3 }
 0x2a6   :  { %v1273_v30 = vsub.f32 1.0, %v7139_v29  ;;  %v1254_v51 = vsel %vm7465_vm11, %v1253_v13, %v1249_v55  ;;  %v3068_v32 = vmul.f32 %v7480_v43, %v3067_v50  ;;  %4465 = vrcp.f32 %v7495_v25 }
 0x2a7   :  { %4467 = vrcp.f32 %v7327_v23  ;;  %v3415_v17 = vmul.f32 %v4460_v48, %v1254_v51  ;;  %v3383_v28 = vadd.f32 %v3351_v39, %v3287_v9  ;;  %v484_v56 = vadd.f32 %v483_v40, %v5046_v57 }
 0x2a8   :  { %v4462_v10 = vpop.eup %4461  ;;  %v1288_v55 = vsub.f32 1.0, %v7319_v46  ;;  %v7522_v19 = vmul.f32 %v6721_v27, %v6620_v59  ;;  %4469 = vpow2.f32 %v7330_v21  ;;  %v573_v38 = vadd.f32 %v572_v47, %v5074_v24 }
 0x2a9   :  { %v4464_v58 = vpop.eup %4463  ;;  %v3447_v4 = vadd.f32 %v3415_v17, %v3383_v28  ;;  %v1264_v11 = vsel %vm7512_vm6, %v8308_v16, %v7499_v3  ;;  %4471 = vtanh.f32 %v749_v0  ;;  %v7530_v31 = vadd.f32 1.0, %v4462_v10  ;;  %v575_v3 = vpop.f32.mrf.mxu2 }
 0x2aa   :  { %v3069_v60 = vadd.f32 %v7480_v43, %v3068_v32  ;;  %vm3071_vm4 = vweird.f32 %v7480_v43  ;;  %v1865_v36 = vmul.f32 %v4464_v58, %v7483_v41  ;;  %v3841_v63 = vmul.f32 -1.442695, %v484_v56 }
 0x2ab   :  { %3479 = vst [vmem:[#allocation7 + $0x170] sm:$0xff] %v3447_v4  ;;  %4473 = vtanh.f32 %v3447_v4  ;;  %vm3070_vm7 = vweird.f32 %v7448_v37  ;;  %v3076_v21 = vand.u32 2147483648, %v7448_v37  ;;  %v1265_v53 = vand.u32 2147483647, %v8307_v45 }
 0x2ac   :  { %v4466_v1 = vpop.eup %4465  ;;  %v3074_v52 = vand.u32 2147483647, %v7448_v37  ;;  %v1866_v62 = vsub.f32 1.0, %v1865_v36  ;;  %4475 = vrcp.f32 %v7530_v31  ;;  %v3873_v20 = vmul.f32 -1.442695, %v573_v38  ;;  %vm7542_vm0 = vmor %vm3070_vm7, %vm3071_vm4 }
 0x2ad   :  { %v7540_v6 = vpop.eup %4467  ;;  %vm1869_vm8 = vweird.f32 %v7483_v41  ;;  %v1267_v44 = vand.u32 2147483648, %v8307_v45  ;;  %v2473_v49 = vmul.f32 %v4466_v1, %v7495_v25  ;;  %4477 = vpow2.f32 %v3841_v63 }
 0x2ae   :  { %v4470_v2 = vpop.eup %4469  ;;  %v3073_v37 = vsel %vm7542_vm0, %v7480_v43, %v3069_v60  ;;  %v1867_v12 = vmul.f32 %v4464_v58, %v1866_v62  ;;  %vm1870_vm9 = vweird.f32 %v4464_v58  ;;  %v1875_v42 = vand.u32 2147483648, %v7483_v41 }
 0x2af   :  { %v4472_v34 = vpop.eup %4471  ;;  %v3077_v15 = vor.u32 1.1754944e-38, %v3076_v21  ;;  %v1873_v26 = vand.u32 2147483647, %v7483_v41  ;;  %v2474_v61 = vsub.f32 1.0, %v2473_v49  ;;  %4479 = vpow2.f32 %v3873_v20  ;;  %vm7558_vm11 = vmor %vm1869_vm8, %vm1870_vm9  ;;  %v3256_v41 = vld [vmem:[%s8160_s1 + $0xc0] sm:$0xff] }
 0x2b0   :  { %vm3075_vm10 = vcmp.eq.f32.partialorder %v3074_v52, 8.507059e+37  ;;  %v1868_v45 = vadd.f32 %v4464_v58, %v1867_v12  ;;  %v2481_v48 = vand.u32 2147483647, %v7495_v25  ;;  %v2483_v13 = vand.u32 2147483648, %v7495_v25 }
 0x2b1   :  { %v4474_v50 = vpop.eup %4473  ;;  %v3078_v9 = vsel %vm3075_vm10, %v3077_v15, %v3073_v37  ;;  %v2475_v39 = vmul.f32 %v4466_v1, %v2474_v61  ;;  %vm2478_vm15 = vweird.f32 %v4466_v1  ;;  %v662_v0 = vadd.f32 %v661_v22, %v5077_v14  ;;  %v486_v61 = vpop.f32.mrf.mxu1 }
 0x2b2   :  { %v7563_v51 = vpop.eup %4475  ;;  %v3543_v32 = vmul.f32 %v4474_v50, %v3078_v9  ;;  %v1872_v40 = vsel %vm7558_vm11, %v4464_v58, %v1868_v45  ;;  %v1876_v17 = vor.u32 1.1754944e-38, %v1875_v42  ;;  %v1268_v28 = vor.u32 1.1754944e-38, %v1267_v44  ;;  %v3320_v58 = vld [vmem:[#allocation2 + $0xc0] sm:$0xff] }
 0x2b3   :  { %v4478_v56 = vpop.eup %4477  ;;  %vm1874_vm13 = vcmp.eq.f32.partialorder %v1873_v26, 8.507059e+37  ;;  %v2476_v47 = vadd.f32 %v4466_v1, %v2475_v39  ;;  %vm2477_vm14 = vweird.f32 %v7495_v25  ;;  %v3081_v10 = vmul.f32 %v7563_v51, %v7530_v31  ;;  %v8454_v25 = vld [vmem:[#allocation19_spill] sm:$0xff] }
 0x2b4   :  { %3575 = vst [vmem:[#allocation7 + $0x178] sm:$0xff] %v3543_v32  ;;  %v1877_v38 = vsel %vm1874_vm13, %v1876_v17, %v1872_v40  ;;  %vm2479_vm2 = vmor %vm2477_vm14, %vm2478_vm15  ;;  %v2484_v4 = vor.u32 1.1754944e-38, %v2483_v13  ;;  %v7574_v60 = vadd.f32 1.0, %v4478_v56  ;;  %v3905_v36 = vmul.f32 -1.442695, %v662_v0 }
 0x2b5   :  { %v4480_v63 = vpop.eup %4479  ;;  %vm1266_vm1 = vcmp.eq.f32.partialorder %v1265_v53, 8.507059e+37  ;;  %v2480_v21 = vsel %vm2479_vm2, %v4466_v1, %v2476_v47  ;;  %vm2482_vm3 = vcmp.eq.f32.partialorder %v2481_v48, 8.507059e+37  ;;  %v3082_v52 = vsub.f32 1.0, %v3081_v10 }
 0x2b6   :  { %v1303_v62 = vsub.f32 1.0, %v7522_v19  ;;  %v3814_v20 = vmul.f32 -1.442695, %v8454_v25  ;;  %v2485_v7 = vsel %vm2482_vm3, %v2484_v4, %v2480_v21  ;;  %4481 = vrcp.f32 %v7574_v60  ;;  %v664_v21 = vpop.f32.mrf.mxu3 }
 0x2b7   :  { %v7579_v44 = vadd.f32 1.0, %v4470_v2  ;;  %v3288_v49 = vmul.f32 %v3256_v41, %v1877_v38  ;;  %v3352_v37 = vmul.f32 %v3320_v58, %v2485_v7  ;;  %v7581_v12 = vadd.f32 1.0, %v4480_v63 }
 0x2b8   :  { %v7585_v42 = vmul.f32 %v7540_v6, %v7327_v23  ;;  %v1269_v53 = vsel %vm1266_vm1, %v1268_v28, %v1264_v11  ;;  %v3083_v1 = vmul.f32 %v7563_v51, %v3082_v52  ;;  %4483 = vpow2.f32 %v3905_v36 }
 0x2b9   :  { %v3416_v15 = vmul.f32 %v4472_v34, %v1269_v53  ;;  %v3384_v2 = vadd.f32 %v3352_v37, %v3288_v49  ;;  %v1274_v26 = vmul.f32 %v8418_v8, %v1273_v30  ;;  %4485 = vrcp.f32 %v7581_v12  ;;  %v750_v34 = vpop.f32.mrf.mxu0  ;;  %v488_v46 = vpop.f32.mrf.mxu1 }
 0x2ba   :  { %4487 = vpow2.f32 %v3814_v20  ;;  %vm3085_vm12 = vweird.f32 %v7530_v31  ;;  %vm3086_vm5 = vweird.f32 %v7563_v51  ;;  %v487_v16 = vadd.f32 %v486_v61, %v5046_v57 }
 0x2bb   :  { %4489 = vrcp.f32 %v7579_v44  ;;  %v3448_v33 = vadd.f32 %v3416_v15, %v3384_v2  ;;  %v3091_v11 = vand.u32 2147483648, %v7530_v31  ;;  %v576_v29 = vadd.f32 %v575_v3, %v5074_v24  ;;  %vm7610_vm4 = vmor %vm3085_vm12, %vm3086_vm5 }
 0x2bc   :  { %v4482_v30 = vpop.eup %4481  ;;  %v3084_v45 = vadd.f32 %v7563_v51, %v3083_v1  ;;  %v3089_v48 = vand.u32 2147483647, %v7530_v31  ;;  %vm1276_vm6 = vweird.f32 %v8417_v5  ;;  %v3842_v13 = vmul.f32 -1.442695, %v487_v16 }
 0x2bd   :  { %3480 = vst [vmem:[#allocation7 + $0x180] sm:$0xff] %v3448_v33  ;;  %4491 = vtanh.f32 %v3448_v33  ;;  %v1880_v50 = vmul.f32 %v4482_v30, %v7574_v60  ;;  %v7616_v9 = vadd.f32 %v8418_v8, %v1274_v26  ;;  %v3874_v43 = vmul.f32 -1.442695, %v576_v29  ;;  %v3257_v29 = vld [vmem:[%s8160_s1 + $0xc8] sm:$0xff] }
 0x2be   :  { %v4484_v39 = vpop.eup %4483  ;;  %v751_v0 = vadd.f32 %v750_v34, %v5113_v35  ;;  %vm1277_vm7 = vweird.f32 %v8418_v8  ;;  %v1280_v32 = vand.u32 2147483647, %v8417_v5  ;;  %4493 = vpow2.f32 %v3842_v13 }
 0x2bf   :  { %v4486_v40 = vpop.eup %4485  ;;  %v3092_v31 = vor.u32 1.1754944e-38, %v3091_v11  ;;  %v1881_v17 = vsub.f32 1.0, %v1880_v50  ;;  %v1282_v28 = vand.u32 2147483648, %v8417_v5  ;;  %v7622_v56 = vadd.f32 1.0, %v4484_v39  ;;  %vm7648_vm15 = vmor %vm1276_vm6, %vm1277_vm7 }
 0x2c0   :  { %v4488_v41 = vpop.eup %4487  ;;  %v3088_v47 = vsel %vm7610_vm4, %v7563_v51, %v3084_v45  ;;  %vm3090_vm0 = vcmp.eq.f32.partialorder %v3089_v48, 8.507059e+37  ;;  %v2488_v10 = vmul.f32 %v4486_v40, %v7581_v12  ;;  %4495 = vpow2.f32 %v3874_v43  ;;  %v3321_v48 = vld [vmem:[#allocation2 + $0xc8] sm:$0xff] }
 0x2c1   :  { %v7628_v38 = vpop.eup %4489  ;;  %v1882_v4 = vmul.f32 %v4482_v30, %v1881_v17  ;;  %vm1885_vm8 = vweird.f32 %v4482_v30  ;;  %v1890_v58 = vand.u32 2147483648, %v7574_v60  ;;  %4497 = vrcp.f32 %v7622_v56 }
 0x2c2   :  { %vm1884_vm9 = vweird.f32 %v7574_v60  ;;  %v1888_v36 = vand.u32 2147483647, %v7574_v60  ;;  %4499 = vtanh.f32 %v751_v0  ;;  %v2489_v63 = vsub.f32 1.0, %v2488_v10 }
 0x2c3   :  { %v4492_v51 = vpop.eup %4491  ;;  %v3093_v52 = vsel %vm3090_vm0, %v3092_v31, %v3088_v47  ;;  %v1883_v25 = vadd.f32 %v4482_v30, %v1882_v4  ;;  %v2498_v20 = vand.u32 2147483648, %v7581_v12  ;;  %v665_v7 = vadd.f32 %v664_v21, %v5077_v14  ;;  %vm7637_vm10 = vmor %vm1884_vm9, %vm1885_vm8 }
 0x2c4   :  { %v4494_v49 = vpop.eup %4493  ;;  %v3544_v37 = vmul.f32 %v4492_v51, %v3093_v52  ;;  %v2490_v1 = vmul.f32 %v4486_v40, %v2489_v63  ;;  %vm2493_vm11 = vweird.f32 %v4486_v40  ;;  %v2496_v60 = vand.u32 2147483647, %v7581_v12 }
 0x2c5   :  { %v1887_v15 = vsel %vm7637_vm10, %v4482_v30, %v1883_v25  ;;  %v1891_v2 = vor.u32 1.1754944e-38, %v1890_v58  ;;  %v7652_v61 = vadd.f32 1.0, %v4494_v49  ;;  %v3906_v16 = vmul.f32 -1.442695, %v665_v7 }
 0x2c6   :  { %v4496_v3 = vpop.eup %4495  ;;  %3576 = vst [vmem:[#allocation7 + $0x188] sm:$0xff] %v3544_v37  ;;  %vm1889_vm13 = vcmp.eq.f32.partialorder %v1888_v36, 8.507059e+37  ;;  %v1279_v33 = vsel %vm7648_vm15, %v8418_v8, %v7616_v9  ;;  %v2491_v11 = vadd.f32 %v4486_v40, %v2490_v1  ;;  %vm2492_vm14 = vweird.f32 %v7581_v12  ;;  %v753_v8 = vpop.f32.mrf.mxu0 }
 0x2c7   :  { %v7659_v34 = vpop.eup %4497  ;;  %v1892_v5 = vsel %vm1889_vm13, %v1891_v2, %v1887_v15  ;;  %vm7664_vm2 = vcmp.eq.f32.partialorder %v1280_v32, 8.507059e+37  ;;  %vm2494_vm1 = vmor %vm2492_vm14, %vm2493_vm11  ;;  %v2499_v45 = vor.u32 1.1754944e-38, %v2498_v20  ;;  %4501 = vrcp.f32 %v7652_v61  ;;  %v577_v36 = vpop.f32.mrf.mxu2 }
 0x2c8   :  { %v4500_v13 = vpop.eup %4499  ;;  %v1283_v12 = vor.u32 1.1754944e-38, %v1282_v28  ;;  %v2495_v22 = vsel %vm2494_vm1, %v4486_v40, %v2491_v11  ;;  %vm2497_vm3 = vcmp.eq.f32.partialorder %v2496_v60, 8.507059e+37  ;;  %v3096_v50 = vmul.f32 %v7659_v34, %v7622_v56 }
 0x2c9   :  { %v2500_v9 = vsel %vm2497_vm3, %v2499_v45, %v2495_v22  ;;  %v1289_v43 = vmul.f32 %v5653_v54, %v1288_v55  ;;  %v7675_v39 = vadd.f32 1.0, %v4496_v3  ;;  %4503 = vpow2.f32 %v3906_v16 }
 0x2ca   :  { %v3289_v0 = vmul.f32 %v3257_v29, %v1892_v5  ;;  %v3353_v32 = vmul.f32 %v3321_v48, %v2500_v9  ;;  %v3097_v31 = vsub.f32 1.0, %v3096_v50  ;;  %v754_v17 = vadd.f32 %v753_v8, %v5113_v35 }
 0x2cb   :  { %v1318_v28 = vsub.f32 1.0, %v7585_v42  ;;  %v7679_v40 = vadd.f32 1.0, %v4488_v41  ;;  %v1284_v47 = vsel %vm7664_vm2, %v1283_v12, %v1279_v33  ;;  %4505 = vrcp.f32 %v7675_v39  ;;  %v3323_v42 = vld [vmem:[#allocation2 + $0xd8] sm:$0xff] }
 0x2cc   :  { %v3417_v10 = vmul.f32 %v4500_v13, %v1284_v47  ;;  %v3385_v55 = vadd.f32 %v3353_v32, %v3289_v0  ;;  %v3098_v4 = vmul.f32 %v7659_v34, %v3097_v31  ;;  %vm1291_vm12 = vweird.f32 %v5201_v18  ;;  %v666_v13 = vpop.f32.mrf.mxu3 }
 0x2cd   :  { %v489_v58 = vadd.f32 %v488_v46, %v5046_v57  ;;  %v7687_v63 = vpop.eup %4501  ;;  %v7690_v41 = vadd.f32 %v5653_v54, %v1289_v43  ;;  %vm1292_vm5 = vweird.f32 %v5653_v54  ;;  %v1295_v21 = vand.u32 2147483647, %v5201_v18 }
 0x2ce   :  { %v578_v51 = vadd.f32 %v577_v36, %v5074_v24  ;;  %v3449_v52 = vadd.f32 %v3417_v10, %v3385_v55  ;;  %v1895_v25 = vmul.f32 %v7687_v63, %v7652_v61  ;;  %v1297_v20 = vand.u32 2147483648, %v5201_v18  ;;  %vm7740_vm13 = vmor %vm1291_vm12, %vm1292_vm5  ;;  %v3258_v18 = vld [vmem:[%s8160_s1 + $0xd0] sm:$0xff] }
 0x2cf   :  { %4507 = vtanh.f32 %v754_v17  ;;  %v4504_v7 = vpop.eup %4503  ;;  %v3099_v49 = vadd.f32 %v7659_v34, %v3098_v4  ;;  %vm3101_vm6 = vweird.f32 %v7659_v34  ;;  %v3843_v37 = vmul.f32 -1.442695, %v489_v58 }
 0x2d0   :  { %v3875_v53 = vmul.f32 -1.442695, %v578_v51  ;;  %3481 = vst [vmem:[#allocation7 + $0x190] sm:$0xff] %v3449_v52  ;;  %4509 = vtanh.f32 %v3449_v52  ;;  %v3106_v1 = vand.u32 2147483648, %v7622_v56  ;;  %v1896_v60 = vsub.f32 1.0, %v1895_v25  ;;  %v3322_v51 = vld [vmem:[#allocation2 + $0xd0] sm:$0xff] }
 0x2d1   :  { %v7701_v15 = vadd.f32 1.0, %v4504_v7  ;;  %v4506_v2 = vpop.eup %4505  ;;  %vm3100_vm4 = vweird.f32 %v7622_v56  ;;  %v3104_v26 = vand.u32 2147483647, %v7622_v56  ;;  %vm1899_vm7 = vweird.f32 %v7652_v61 }
 0x2d2   :  { %4511 = vpow2.f32 %v3843_v37  ;;  %vm7706_vm0 = vmor %vm3100_vm4, %vm3101_vm6  ;;  %v1897_v3 = vmul.f32 %v7687_v63, %v1896_v60  ;;  %vm1900_vm8 = vweird.f32 %v7687_v63  ;;  %v2503_v33 = vmul.f32 %v4506_v2, %v7675_v39  ;;  %v8471_v60 = vld [vmem:[#allocation25_spill] sm:$0xff] }
 0x2d3   :  { %4513 = vrcp.f32 %v7701_v15  ;;  %v3103_v11 = vsel %vm7706_vm0, %v7659_v34, %v3099_v49  ;;  %v1905_v56 = vand.u32 2147483648, %v7652_v61  ;;  %vm7718_vm9 = vcmp.eq.f32.partialorder %v1295_v21, 8.507059e+37  ;;  %vm7726_vm11 = vmor %vm1899_vm7, %vm1900_vm8 }
 0x2d4   :  { %4515 = vpow2.f32 %v3875_v53  ;;  %v3107_v30 = vor.u32 1.1754944e-38, %v3106_v1  ;;  %v1898_v45 = vadd.f32 %v7687_v63, %v1897_v3  ;;  %v1903_v48 = vand.u32 2147483647, %v7652_v61 }
 0x2d5   :  { %v4508_v29 = vpop.eup %4507  ;;  %v2504_v8 = vsub.f32 1.0, %v2503_v33  ;;  %vm3105_vm10 = vcmp.eq.f32.partialorder %v3104_v26, 8.507059e+37  ;;  %v2511_v12 = vand.u32 2147483647, %v7675_v39  ;;  %v2513_v22 = vand.u32 2147483648, %v7675_v39 }
 0x2d6   :  { %v667_v50 = vadd.f32 %v666_v13, %v5077_v14  ;;  %v4510_v9 = vpop.eup %4509  ;;  %v3108_v43 = vsel %vm3105_vm10, %v3107_v30, %v3103_v11  ;;  %v1902_v0 = vsel %vm7726_vm11, %v7687_v63, %v1898_v45  ;;  %vm2508_vm15 = vweird.f32 %v4506_v2 }
 0x2d7   :  { %v2505_v32 = vmul.f32 %v4506_v2, %v2504_v8  ;;  %v3545_v61 = vmul.f32 %v4510_v9, %v3108_v43  ;;  %v1906_v17 = vor.u32 1.1754944e-38, %v1905_v56  ;;  %v1298_v46 = vor.u32 1.1754944e-38, %v1297_v20  ;;  %v755_v20 = vpop.f32.mrf.mxu0  ;;  %v580_v56 = vpop.f32.mrf.mxu2 }
 0x2d8   :  { %v4512_v31 = vpop.eup %4511  ;;  %v3907_v10 = vmul.f32 -1.442695, %v667_v50  ;;  %vm1904_vm14 = vcmp.eq.f32.partialorder %v1903_v48, 8.507059e+37  ;;  %vm2507_vm2 = vweird.f32 %v7675_v39  ;;  %v2514_v21 = vor.u32 1.1754944e-38, %v2513_v22 }
 0x2d9   :  { %v7744_v55 = vpop.eup %4513  ;;  %v2506_v4 = vadd.f32 %v4506_v2, %v2505_v32  ;;  %v7747_v58 = vadd.f32 1.0, %v4512_v31  ;;  %3577 = vst [vmem:[#allocation7 + $0x198] sm:$0xff] %v3545_v61  ;;  %v1907_v63 = vsel %vm1904_vm14, %v1906_v17, %v1902_v0  ;;  %vm2509_vm1 = vmor %vm2507_vm2, %vm2508_vm15  ;;  %v1294_v39 = vsel %vm7740_vm13, %v5653_v54, %v7690_v41 }
 0x2da   :  { %v4516_v36 = vpop.eup %4515  ;;  %v3111_v52 = vmul.f32 %v7744_v55, %v7701_v15  ;;  %4517 = vpow2.f32 %v3907_v10  ;;  %vm2512_vm3 = vcmp.eq.f32.partialorder %v2511_v12, 8.507059e+37  ;;  %v1304_v37 = vmul.f32 %v6721_v27, %v1303_v62  ;;  %v491_v62 = vpop.f32.mrf.mxu1 }
 0x2db   :  { %v2510_v25 = vsel %vm2509_vm1, %v4506_v2, %v2506_v4  ;;  %4519 = vrcp.f32 %v7747_v58  ;;  %v7763_v53 = vadd.f32 1.0, %v4516_v36  ;;  %v7767_v1 = vmul.f32 %v7628_v38, %v7579_v44 }
 0x2dc   :  { %v2515_v7 = vsel %vm2512_vm3, %v2514_v21, %v2510_v25  ;;  %v3112_v49 = vsub.f32 1.0, %v3111_v52  ;;  %v7770_v26 = vmul.f32 -1.442695, %v8471_v60  ;;  %v3290_v54 = vmul.f32 %v3258_v18, %v1907_v63  ;;  %v669_v25 = vpop.f32.mrf.mxu3 }
 0x2dd   :  { %v3354_v41 = vmul.f32 %v3322_v51, %v2515_v7  ;;  %v1299_v2 = vsel %vm7718_vm9, %v1298_v46, %v1294_v39  ;;  %v756_v19 = vadd.f32 %v755_v20, %v5113_v35  ;;  %4521 = vrcp.f32 %v7763_v53 }
 0x2de   :  { %v3113_v16 = vmul.f32 %v7744_v55, %v3112_v49  ;;  %4523 = vrcp.f32 %v7679_v40  ;;  %v3418_v3 = vmul.f32 %v4508_v29, %v1299_v2  ;;  %v492_v11 = vadd.f32 %v491_v62, %v5046_v57 }
 0x2df   :  { %v3386_v33 = vadd.f32 %v3354_v41, %v3290_v54  ;;  %vm3115_vm12 = vweird.f32 %v7701_v15  ;;  %vm3116_vm5 = vweird.f32 %v7744_v55  ;;  %v7782_v5 = vadd.f32 %v6721_v27, %v1304_v37 }
 0x2e0   :  { %v4518_v30 = vpop.eup %4517  ;;  %v581_v45 = vadd.f32 %v580_v56, %v5074_v24  ;;  %v3119_v13 = vand.u32 2147483647, %v7701_v15  ;;  %v3121_v29 = vand.u32 2147483648, %v7701_v15  ;;  %v3114_v12 = vadd.f32 %v7744_v55, %v3113_v16  ;;  %vm7793_vm6 = vmor %vm3115_vm12, %vm3116_vm5  ;;  %v582_v15 = vpop.f32.mrf.mxu2 }
 0x2e1   :  { %v4520_v48 = vpop.eup %4519  ;;  %v3450_v8 = vadd.f32 %v3418_v3, %v3386_v33  ;;  %v7787_v34 = vadd.f32 1.0, %v4518_v30  ;;  %4525 = vtanh.f32 %v756_v19  ;;  %v3844_v50 = vmul.f32 -1.442695, %v492_v11  ;;  %v3259_v19 = vld [vmem:[%s8160_s1 + $0xd8] sm:$0xff] }
 0x2e2   :  { %v1910_v22 = vmul.f32 %v4520_v48, %v7747_v58  ;;  %vm1306_vm4 = vweird.f32 %v6620_v59  ;;  %vm1307_vm7 = vweird.f32 %v6721_v27  ;;  %v1310_v43 = vand.u32 2147483647, %v6620_v59 }
 0x2e3   :  { %3482 = vst [vmem:[#allocation7 + $0x1a0] sm:$0xff] %v3450_v8  ;;  %4527 = vtanh.f32 %v3450_v8  ;;  %v4522_v0 = vpop.eup %4521  ;;  %v1312_v31 = vand.u32 2147483648, %v6620_v59  ;;  %v3876_v61 = vmul.f32 -1.442695, %v581_v45  ;;  %vm7804_vm0 = vcmp.eq.f32.partialorder %v3119_v13, 8.507059e+37  ;;  %vm7817_vm9 = vmor %vm1306_vm4, %vm1307_vm7 }
 0x2e4   :  { %v1911_v32 = vsub.f32 1.0, %v1910_v22  ;;  %4529 = vrcp.f32 %v7787_v34  ;;  %v7802_v17 = vpop.eup %4523  ;;  %v3122_v47 = vor.u32 1.1754944e-38, %v3121_v29  ;;  %v2518_v46 = vmul.f32 %v4522_v0, %v7763_v53 }
 0x2e5   :  { %4531 = vpow2.f32 %v3844_v50  ;;  %v3118_v10 = vsel %vm7793_vm6, %v7744_v55, %v3114_v12  ;;  %vm1915_vm8 = vweird.f32 %v4520_v48  ;;  %v1920_v36 = vand.u32 2147483648, %v7747_v58 }
 0x2e6   :  { %v1912_v4 = vmul.f32 %v4520_v48, %v1911_v32  ;;  %v1918_v18 = vand.u32 2147483647, %v7747_v58  ;;  %v1309_v21 = vsel %vm7817_vm9, %v6721_v27, %v7782_v5  ;;  %v2519_v55 = vsub.f32 1.0, %v2518_v46 }
 0x2e7   :  { %4533 = vpow2.f32 %v3876_v61  ;;  %v4526_v51 = vpop.eup %4525  ;;  %vm1914_vm10 = vweird.f32 %v7747_v58  ;;  %v2526_v39 = vand.u32 2147483647, %v7763_v53  ;;  %v2528_v59 = vand.u32 2147483648, %v7763_v53 }
 0x2e8   :  { %v1913_v52 = vadd.f32 %v4520_v48, %v1912_v4  ;;  %v3123_v7 = vsel %vm7804_vm0, %v3122_v47, %v3118_v10  ;;  %vm7832_vm11 = vmor %vm1914_vm10, %vm1915_vm8  ;;  %v2520_v27 = vmul.f32 %v4522_v0, %v2519_v55  ;;  %vm2523_vm15 = vweird.f32 %v4522_v0  ;;  %v758_v4 = vpop.f32.mrf.mxu0 }
 0x2e9   :  { %v4528_v20 = vpop.eup %4527  ;;  %v670_v37 = vadd.f32 %v669_v25, %v5077_v14  ;;  %v1921_v41 = vor.u32 1.1754944e-38, %v1920_v36  ;;  %v1319_v2 = vmul.f32 %v7540_v6, %v1318_v28  ;;  %vm1919_vm13 = vcmp.eq.f32.partialorder %v1918_v18, 8.507059e+37 }
 0x2ea   :  { %v7837_v60 = vpop.eup %4529  ;;  %v3546_v58 = vmul.f32 %v4528_v20, %v3123_v7  ;;  %v1917_v54 = vsel %vm7832_vm11, %v4520_v48, %v1913_v52  ;;  %v2521_v62 = vadd.f32 %v4522_v0, %v2520_v27  ;;  %vm2522_vm14 = vweird.f32 %v7763_v53 }
 0x2eb   :  { %v4532_v16 = vpop.eup %4531  ;;  %v3126_v3 = vmul.f32 %v7837_v60, %v7787_v34  ;;  %v1922_v33 = vsel %vm1919_vm13, %v1921_v41, %v1917_v54  ;;  %vm2524_vm2 = vmor %vm2522_vm14, %vm2523_vm15  ;;  %v2529_v11 = vor.u32 1.1754944e-38, %v2528_v59  ;;  %v3908_v28 = vmul.f32 -1.442695, %v670_v37 }
 0x2ec   :  { %3578 = vst [vmem:[#allocation7 + $0x1a8] sm:$0xff] %v3546_v58  ;;  %v7851_v56 = vadd.f32 1.0, %v4532_v16  ;;  %v1313_v5 = vor.u32 1.1754944e-38, %v1312_v31  ;;  %v2525_v45 = vsel %vm2524_vm2, %v4522_v0, %v2521_v62  ;;  %vm2527_vm1 = vcmp.eq.f32.partialorder %v2526_v39, 8.507059e+37  ;;  %v493_v31 = vpop.f32.mrf.mxu1  ;;  %v671_v62 = vpop.f32.mrf.mxu3 }
 0x2ed   :  { %v4534_v30 = vpop.eup %4533  ;;  %v3127_v48 = vsub.f32 1.0, %v3126_v3  ;;  %v2530_v8 = vsel %vm2527_vm1, %v2529_v11, %v2525_v45  ;;  %vm1321_vm3 = vweird.f32 %v7327_v23  ;;  %vm1322_vm12 = vweird.f32 %v7540_v6 }
 0x2ee   :  { %4535 = vrcp.f32 %v7851_v56  ;;  %v3291_v53 = vmul.f32 %v3259_v19, %v1922_v33  ;;  %vm1311_vm5 = vcmp.eq.f32.partialorder %v1310_v43, 8.507059e+37  ;;  %v3355_v13 = vmul.f32 %v3323_v42, %v2530_v8  ;;  %vm7862_vm6 = vmor %vm1321_vm3, %vm1322_vm12 }
 0x2ef   :  { %v7856_v29 = vadd.f32 1.0, %v4534_v30  ;;  %v1314_v12 = vsel %vm1311_vm5, %v1313_v5, %v1309_v21  ;;  %v3128_v22 = vmul.f32 %v7837_v60, %v3127_v48  ;;  %v7860_v50 = vadd.f32 %v7540_v6, %v1319_v2 }
 0x2f0   :  { %4537 = vpow2.f32 %v3908_v28  ;;  %v3419_v9 = vmul.f32 %v4526_v51, %v1314_v12  ;;  %v3387_v0 = vadd.f32 %v3355_v13, %v3291_v53  ;;  %v1333_v43 = vsub.f32 1.0, %v7767_v1 }
 0x2f1   :  { %4539 = vrcp.f32 %v7856_v29  ;;  %v494_v61 = vadd.f32 %v493_v31, %v5046_v57  ;;  %v7872_v47 = vmul.f32 %v7802_v17, %v7679_v40  ;;  %v3136_v10 = vand.u32 2147483648, %v7787_v34 }
 0x2f2   :  { %4541 = vpow2.f32 %v7770_v26  ;;  %v3451_v46 = vadd.f32 %v3419_v9, %v3387_v0  ;;  %v583_v36 = vadd.f32 %v582_v15, %v5074_v24  ;;  %v3129_v18 = vadd.f32 %v7837_v60, %v3128_v22 }
 0x2f3   :  { %vm3131_vm4 = vweird.f32 %v7837_v60  ;;  %v1324_v26 = vsel %vm7862_vm6, %v7540_v6, %v7860_v50  ;;  %v3845_v21 = vmul.f32 -1.442695, %v494_v61  ;;  %v1325_v51 = vand.u32 2147483647, %v7327_v23  ;;  %v3260_v61 = vld [vmem:[%s8160_s1 + $0xe0] sm:$0xff] }
 0x2f4   :  { %v4536_v63 = vpop.eup %4535  ;;  %3483 = vst [vmem:[#allocation7 + $0x1b0] sm:$0xff] %v3451_v46  ;;  %4543 = vtanh.f32 %v3451_v46  ;;  %v3877_v52 = vmul.f32 -1.442695, %v583_v36  ;;  %vm3130_vm7 = vweird.f32 %v7787_v34  ;;  %v3134_v59 = vand.u32 2147483647, %v7787_v34  ;;  %v3324_v46 = vld [vmem:[#allocation2 + $0xe0] sm:$0xff] }
 0x2f5   :  { %v1925_v55 = vmul.f32 %v4536_v63, %v7851_v56  ;;  %v759_v25 = vadd.f32 %v758_v4, %v5113_v35  ;;  %4545 = vpow2.f32 %v3845_v21  ;;  %vm7887_vm0 = vmor %vm3130_vm7, %vm3131_vm4  ;;  %v3137_v49 = vor.u32 1.1754944e-38, %v3136_v10 }
 0x2f6   :  { %v4538_v39 = vpop.eup %4537  ;;  %v1327_v37 = vand.u32 2147483648, %v7327_v23  ;;  %v3133_v41 = vsel %vm7887_vm0, %v7837_v60, %v3129_v18  ;;  %vm1929_vm8 = vweird.f32 %v7851_v56  ;;  %4547 = vpow2.f32 %v3877_v52 }
 0x2f7   :  { %v4540_v20 = vpop.eup %4539  ;;  %v1926_v27 = vsub.f32 1.0, %v1925_v55  ;;  %v7892_v58 = vadd.f32 1.0, %v4538_v39  ;;  %vm1930_vm9 = vweird.f32 %v4536_v63  ;;  %v1935_v16 = vand.u32 2147483648, %v7851_v56 }
 0x2f8   :  { %v4542_v54 = vpop.eup %4541  ;;  %v2533_v34 = vmul.f32 %v4540_v20, %v7856_v29  ;;  %vm3135_vm10 = vcmp.eq.f32.partialorder %v3134_v59, 8.507059e+37  ;;  %v1933_v23 = vand.u32 2147483647, %v7851_v56  ;;  %v2543_v11 = vand.u32 2147483648, %v7856_v29  ;;  %vm7907_vm11 = vmor %vm1929_vm8, %vm1930_vm9  ;;  %v496_v59 = vpop.f32.mrf.mxu1 }
 0x2f9   :  { %v1927_v2 = vmul.f32 %v4536_v63, %v1926_v27  ;;  %4549 = vrcp.f32 %v7892_v58  ;;  %v3138_v33 = vsel %vm3135_vm10, %v3137_v49, %v3133_v41  ;;  %v672_v42 = vadd.f32 %v671_v62, %v5077_v14  ;;  %v585_v27 = vpop.f32.mrf.mxu2 }
 0x2fa   :  { %4551 = vtanh.f32 %v759_v25  ;;  %v2534_v19 = vsub.f32 1.0, %v2533_v34  ;;  %v4544_v3 = vpop.eup %4543  ;;  %vm2538_vm15 = vweird.f32 %v4540_v20  ;;  %v2541_v48 = vand.u32 2147483647, %v7856_v29 }
 0x2fb   :  { %v1928_v60 = vadd.f32 %v4536_v63, %v1927_v2  ;;  %v4546_v28 = vpop.eup %4545  ;;  %v3547_v30 = vmul.f32 %v4544_v3, %v3138_v33  ;;  %v1936_v53 = vor.u32 1.1754944e-38, %v1935_v16  ;;  %v3909_v12 = vmul.f32 -1.442695, %v672_v42 }
 0x2fc   :  { %v2535_v45 = vmul.f32 %v4540_v20, %v2534_v19  ;;  %v7914_v13 = vadd.f32 1.0, %v4546_v28  ;;  %v4548_v22 = vpop.eup %4547  ;;  %vm1934_vm13 = vcmp.eq.f32.partialorder %v1933_v23, 8.507059e+37  ;;  %v1328_v9 = vor.u32 1.1754944e-38, %v1327_v37 }
 0x2fd   :  { %v1932_v8 = vsel %vm7907_vm11, %v4536_v63, %v1928_v60  ;;  %3579 = vst [vmem:[#allocation7 + $0x1b8] sm:$0xff] %v3547_v30  ;;  %vm2537_vm14 = vweird.f32 %v7856_v29  ;;  %v2544_v15 = vor.u32 1.1754944e-38, %v2543_v11  ;;  %v1334_v10 = vmul.f32 %v7628_v38, %v1333_v43 }
 0x2fe   :  { %v2536_v56 = vadd.f32 %v4540_v20, %v2535_v45  ;;  %v1937_v31 = vsel %vm1934_vm13, %v1936_v53, %v1932_v8  ;;  %vm2539_vm2 = vmor %vm2537_vm14, %vm2538_vm15  ;;  %4553 = vrcp.f32 %v7914_v13  ;;  %vm1326_vm1 = vcmp.eq.f32.partialorder %v1325_v51, 8.507059e+37 }
 0x2ff   :  { %v7917_v0 = vpop.eup %4549  ;;  %vm2542_vm3 = vcmp.eq.f32.partialorder %v2541_v48, 8.507059e+37  ;;  %v1348_v63 = vsub.f32 1.0, %v7872_v47  ;;  %v7930_v21 = vadd.f32 1.0, %v4548_v22  ;;  %4555 = vpow2.f32 %v3909_v12  ;;  %v674_v22 = vpop.f32.mrf.mxu3 }
 0x300   :  { %v4552_v4 = vpop.eup %4551  ;;  %v2540_v29 = vsel %vm2539_vm2, %v4540_v20, %v2536_v56  ;;  %v3141_v36 = vmul.f32 %v7917_v0, %v7892_v58  ;;  %v7932_v55 = vadd.f32 1.0, %v4542_v54  ;;  %v3292_v52 = vmul.f32 %v3260_v61, %v1937_v31  ;;  %v760_v54 = vpop.f32.mrf.mxu0 }
 0x301   :  { %v2545_v18 = vsel %vm2542_vm3, %v2544_v15, %v2540_v29  ;;  %v1329_v43 = vsel %vm1326_vm1, %v1328_v9, %v1324_v26  ;;  %v7940_v51 = vadd.f32 %v7628_v38, %v1334_v10  ;;  %vm1337_vm12 = vweird.f32 %v7628_v38  ;;  %v498_v16 = vpop.f32.mrf.mxu1 }
 0x302   :  { %v3356_v39 = vmul.f32 %v3324_v46, %v2545_v18  ;;  %v3142_v1 = vsub.f32 1.0, %v3141_v36  ;;  %4557 = vrcp.f32 %v7930_v21  ;;  %v3420_v25 = vmul.f32 %v4552_v4, %v1329_v43 }
 0x303   :  { %v497_v49 = vadd.f32 %v496_v59, %v5046_v57  ;;  %vm3145_vm5 = vweird.f32 %v7892_v58  ;;  %vm3146_vm6 = vweird.f32 %v7917_v0  ;;  %v3151_v6 = vand.u32 2147483648, %v7892_v58  ;;  %v3261_v59 = vld [vmem:[%s8160_s1 + $0xe8] sm:$0xff] }
 0x304   :  { %v3388_v20 = vadd.f32 %v3356_v39, %v3292_v52  ;;  %v3143_v7 = vmul.f32 %v7917_v0, %v3142_v1  ;;  %v7946_v32 = vpop.eup %4553  ;;  %v586_v50 = vadd.f32 %v585_v27, %v5074_v24  ;;  %4559 = vrcp.f32 %v7932_v55  ;;  %vm7968_vm0 = vmor %vm3145_vm5, %vm3146_vm6 }
 0x305   :  { %v1940_v37 = vmul.f32 %v7946_v32, %v7914_v13  ;;  %vm1336_vm4 = vweird.f32 %v7579_v44  ;;  %v4556_v41 = vpop.eup %4555  ;;  %v3149_v2 = vand.u32 2147483647, %v7892_v58  ;;  %v3846_v23 = vmul.f32 -1.442695, %v497_v49 }
 0x306   :  { %v3452_v26 = vadd.f32 %v3420_v25, %v3388_v20  ;;  %v3144_v34 = vadd.f32 %v7917_v0, %v3143_v7  ;;  %vm7960_vm7 = vmor %vm1336_vm4, %vm1337_vm12  ;;  %v3878_v19 = vmul.f32 -1.442695, %v586_v50  ;;  %v1340_v33 = vand.u32 2147483647, %v7579_v44 }
 0x307   :  { %v1941_v3 = vsub.f32 1.0, %v1940_v37  ;;  %v7973_v60 = vadd.f32 1.0, %v4556_v41  ;;  %v3152_v42 = vor.u32 1.1754944e-38, %v3151_v6  ;;  %v761_v28 = vadd.f32 %v760_v54, %v5113_v35 }
 0x308   :  { %3484 = vst [vmem:[#allocation7 + $0x1c0] sm:$0xff] %v3452_v26  ;;  %4561 = vtanh.f32 %v3452_v26  ;;  %v4558_v11 = vpop.eup %4557  ;;  %v1339_v30 = vsel %vm7960_vm7, %v7628_v38, %v7940_v51  ;;  %vm1945_vm8 = vweird.f32 %v7946_v32  ;;  %v3148_v45 = vsel %vm7968_vm0, %v7917_v0, %v3144_v34  ;;  %v763_v7 = vpop.f32.mrf.mxu0 }
 0x309   :  { %4563 = vpow2.f32 %v3846_v23  ;;  %v1942_v58 = vmul.f32 %v7946_v32, %v1941_v3  ;;  %v2548_v5 = vmul.f32 %v4558_v11, %v7930_v21  ;;  %vm3150_vm9 = vcmp.eq.f32.partialorder %v3149_v2, 8.507059e+37 }
 0x30a   :  { %4565 = vrcp.f32 %v7973_v60  ;;  %v1950_v48 = vand.u32 2147483648, %v7914_v13  ;;  %v7988_v8 = vpop.eup %4559  ;;  %vm1944_vm10 = vweird.f32 %v7914_v13  ;;  %v1948_v53 = vand.u32 2147483647, %v7914_v13 }
 0x30b   :  { %4567 = vpow2.f32 %v3878_v19  ;;  %v1943_v38 = vadd.f32 %v7946_v32, %v1942_v58  ;;  %v2549_v12 = vsub.f32 1.0, %v2548_v5  ;;  %vm7993_vm11 = vmor %vm1944_vm10, %vm1945_vm8  ;;  %v2556_v56 = vand.u32 2147483647, %v7930_v21 }
 0x30c   :  { %4569 = vtanh.f32 %v761_v28  ;;  %v2558_v0 = vand.u32 2147483648, %v7930_v21  ;;  %v675_v31 = vadd.f32 %v674_v22, %v5077_v14  ;;  %v3153_v15 = vsel %vm3150_vm9, %v3152_v42, %v3148_v45 }
 0x30d   :  { %v1947_v46 = vsel %vm7993_vm11, %v7946_v32, %v1943_v38  ;;  %v2550_v13 = vmul.f32 %v4558_v11, %v2549_v12  ;;  %vm2553_vm15 = vweird.f32 %v4558_v11  ;;  %v1951_v29 = vor.u32 1.1754944e-38, %v1950_v48 }
 0x30e   :  { %v4562_v61 = vpop.eup %4561  ;;  %v1342_v36 = vand.u32 2147483648, %v7579_v44  ;;  %v3910_v18 = vmul.f32 -1.442695, %v675_v31  ;;  %vm1949_vm13 = vcmp.eq.f32.partialorder %v1948_v53, 8.507059e+37  ;;  %vm2552_vm14 = vweird.f32 %v7930_v21  ;;  %v3325_v44 = vld [vmem:[#allocation2 + $0xe8] sm:$0xff] }
 0x30f   :  { %v4564_v10 = vpop.eup %4563  ;;  %v3548_v4 = vmul.f32 %v4562_v61, %v3153_v15  ;;  %v2551_v39 = vadd.f32 %v4558_v11, %v2550_v13  ;;  %v1952_v51 = vsel %vm1949_vm13, %v1951_v29, %v1947_v46  ;;  %vm2554_vm2 = vmor %vm2552_vm14, %vm2553_vm15  ;;  %v2559_v25 = vor.u32 1.1754944e-38, %v2558_v0 }
 0x310   :  { %v8004_v52 = vpop.eup %4565  ;;  %v8007_v1 = vadd.f32 1.0, %v4564_v10  ;;  %4571 = vpow2.f32 %v3910_v18  ;;  %vm1341_vm1 = vcmp.eq.f32.partialorder %v1340_v33, 8.507059e+37  ;;  %vm2557_vm3 = vcmp.eq.f32.partialorder %v2556_v56, 8.507059e+37  ;;  %v587_v33 = vpop.f32.mrf.mxu2 }
 0x311   :  { %v4568_v43 = vpop.eup %4567  ;;  %3580 = vst [vmem:[#allocation7 + $0x1c8] sm:$0xff] %v3548_v4  ;;  %v3156_v20 = vmul.f32 %v8004_v52, %v7973_v60  ;;  %v2555_v21 = vsel %vm2554_vm2, %v4558_v11, %v2551_v39  ;;  %v1343_v27 = vor.u32 1.1754944e-38, %v1342_v36  ;;  %v3293_v26 = vmul.f32 %v3261_v59, %v1952_v51  ;;  %v676_v18 = vpop.f32.mrf.mxu3 }
 0x312   :  { %4573 = vrcp.f32 %v8007_v1  ;;  %v4570_v49 = vpop.eup %4569  ;;  %v2560_v32 = vsel %vm2557_vm3, %v2559_v25, %v2555_v21  ;;  %v8016_v50 = vadd.f32 1.0, %v4568_v43  ;;  %v764_v54 = vadd.f32 %v763_v7, %v5113_v35 }
 0x313   :  { %v3157_v6 = vsub.f32 1.0, %v3156_v20  ;;  %v3357_v37 = vmul.f32 %v3325_v44, %v2560_v32  ;;  %v1349_v41 = vmul.f32 %v7802_v17, %v1348_v63  ;;  %v1344_v34 = vsel %vm1341_vm1, %v1343_v27, %v1339_v30 }
 0x314   :  { %4575 = vrcp.f32 %v8016_v50  ;;  %v8026_v23 = vmul.f32 %v7988_v8, %v7932_v55  ;;  %v3421_v19 = vmul.f32 %v4570_v49, %v1344_v34  ;;  %v499_v3 = vadd.f32 %v498_v16, %v5046_v57 }
 0x315   :  { %v3158_v2 = vmul.f32 %v8004_v52, %v3157_v6  ;;  %v3389_v62 = vadd.f32 %v3357_v37, %v3293_v26  ;;  %vm1351_vm12 = vweird.f32 %v7679_v40  ;;  %vm1352_vm5 = vweird.f32 %v7802_v17  ;;  %v3326_v26 = vld [vmem:[#allocation2 + $0xf0] sm:$0xff] }
 0x316   :  { %v4572_v11 = vpop.eup %4571  ;;  %v1355_v47 = vand.u32 2147483647, %v7679_v40  ;;  %v588_v63 = vadd.f32 %v587_v33, %v5074_v24  ;;  %v8034_v30 = vadd.f32 %v7802_v17, %v1349_v41  ;;  %4577 = vtanh.f32 %v764_v54  ;;  %vm8078_vm13 = vmor %vm1351_vm12, %vm1352_vm5 }
 0x317   :  { %v3453_v28 = vadd.f32 %v3421_v19, %v3389_v62  ;;  %v8036_v58 = vadd.f32 1.0, %v4572_v11  ;;  %v3159_v57 = vadd.f32 %v8004_v52, %v3158_v2  ;;  %vm3161_vm6 = vweird.f32 %v8004_v52 }
 0x318   :  { %v4574_v42 = vpop.eup %4573  ;;  %v3847_v45 = vmul.f32 -1.442695, %v499_v3  ;;  %vm3160_vm4 = vweird.f32 %v7973_v60  ;;  %v3166_v24 = vand.u32 2147483648, %v7973_v60  ;;  %v1357_v48 = vand.u32 2147483648, %v7679_v40 }
 0x319   :  { %v1955_v5 = vmul.f32 %v4574_v42, %v8007_v1  ;;  %3485 = vst [vmem:[#allocation7 + $0x1d0] sm:$0xff] %v3453_v28  ;;  %4579 = vtanh.f32 %v3453_v28  ;;  %v3164_v53 = vand.u32 2147483647, %v7973_v60  ;;  %v3879_v22 = vmul.f32 -1.442695, %v588_v63  ;;  %vm8046_vm7 = vmor %vm3160_vm4, %vm3161_vm6 }
 0x31a   :  { %v4576_v38 = vpop.eup %4575  ;;  %4581 = vrcp.f32 %v8036_v58  ;;  %vm1959_vm0 = vweird.f32 %v8007_v1  ;;  %vm8051_vm8 = vcmp.eq.f32.partialorder %v1355_v47, 8.507059e+37  ;;  %v3163_v60 = vsel %vm8046_vm7, %v8004_v52, %v3159_v57 }
 0x31b   :  { %v1956_v12 = vsub.f32 1.0, %v1955_v5  ;;  %v2563_v0 = vmul.f32 %v4576_v38, %v8016_v50  ;;  %4583 = vpow2.f32 %v3847_v45  ;;  %vm1960_vm9 = vweird.f32 %v4574_v42 }
 0x31c   :  { %v1965_v61 = vand.u32 2147483648, %v8007_v1  ;;  %v4578_v15 = vpop.eup %4577  ;;  %v3167_v46 = vor.u32 1.1754944e-38, %v3166_v24  ;;  %v1963_v13 = vand.u32 2147483647, %v8007_v1  ;;  %4585 = vpow2.f32 %v3879_v22  ;;  %vm8065_vm11 = vmor %vm1959_vm0, %vm1960_vm9  ;;  %v3263_v1 = vld [vmem:[%s8160_s1 + $0xf8] sm:$0xff] }
 0x31d   :  { %v1957_v31 = vmul.f32 %v4574_v42, %v1956_v12  ;;  %v2564_v10 = vsub.f32 1.0, %v2563_v0  ;;  %vm3165_vm10 = vcmp.eq.f32.partialorder %v3164_v53, 8.507059e+37  ;;  %v2571_v29 = vand.u32 2147483647, %v8016_v50 }
 0x31e   :  { %v2573_v36 = vand.u32 2147483648, %v8016_v50  ;;  %v3168_v43 = vsel %vm3165_vm10, %v3167_v46, %v3163_v60  ;;  %vm2568_vm15 = vweird.f32 %v4576_v38  ;;  %v677_v59 = vadd.f32 %v676_v18, %v5077_v14  ;;  %v3262_v14 = vld [vmem:[%s8160_s1 + $0xf0] sm:$0xff]  ;;  %s4685_s1 = smov [#allocation7]  }
 0x31f   :  { %v1958_v4 = vadd.f32 %v4574_v42, %v1957_v31  ;;  %v4580_v39 = vpop.eup %4579  ;;  %v2565_v51 = vmul.f32 %v4576_v38, %v2564_v10  ;;  %v1966_v7 = vor.u32 1.1754944e-38, %v1965_v61  ;;  %v1358_v21 = vor.u32 1.1754944e-38, %v1357_v48  ;;  %s3588_s21 = sshll.u32 %s4685_s1, 4  ;;  %s3589_s21 = int_to_ptr.vmem [resolvable:$true] %s3588_s21 }
 0x320   :  { %v8070_v25 = vpop.eup %4581  ;;  %v3549_v44 = vmul.f32 %v4580_v39, %v3168_v43  ;;  %vm1964_vm14 = vcmp.eq.f32.partialorder %v1963_v13, 8.507059e+37  ;;  %vm2567_vm2 = vweird.f32 %v8016_v50  ;;  %v2574_v40 = vor.u32 1.1754944e-38, %v2573_v36 }
 0x321   :  { %v1962_v20 = vsel %vm8065_vm11, %v4574_v42, %v1958_v4  ;;  %v4584_v49 = vpop.eup %4583  ;;  %v2566_v27 = vadd.f32 %v4576_v38, %v2565_v51  ;;  %v3171_v32 = vmul.f32 %v8070_v25, %v8036_v58  ;;  %vm2569_vm1 = vmor %vm2567_vm2, %vm2568_vm15  ;;  %v3911_v54 = vmul.f32 -1.442695, %v677_v59 }
 0x322   :  { %3581 = vst [vmem:[#allocation7 + $0x1d8] sm:$0xff] %v3549_v44  ;;  %v1967_v6 = vsel %vm1964_vm14, %v1966_v7, %v1962_v20  ;;  %v8089_v37 = vadd.f32 1.0, %v4584_v49  ;;  %v4586_v41 = vpop.eup %4585  ;;  %v1354_v34 = vsel %vm8078_vm13, %v7802_v17, %v8034_v30  ;;  %vm2572_vm3 = vcmp.eq.f32.partialorder %v2571_v29, 8.507059e+37  ;;  %v765_v30 = vpop.f32.mrf.mxu0  ;;  %v3327_v49 = vld [vmem:[#allocation2 + $0xf8] sm:$0xff] }
 0x323   :  { %v2570_v2 = vsel %vm2569_vm1, %v4576_v38, %v2566_v27  ;;  %v3172_v50 = vsub.f32 1.0, %v3171_v32  ;;  %v3294_v19 = vmul.f32 %v3262_v14, %v1967_v6  ;;  %v8096_v3 = vadd.f32 1.0, %v4586_v41 }
 0x324   :  { %v2575_v16 = vsel %vm2572_vm3, %v2574_v40, %v2570_v2  ;;  %4587 = vrcp.f32 %v8089_v37  ;;  %v1363_v33 = vsub.f32 1.0, %v8026_v23  ;;  %v1359_v11 = vsel %vm8051_vm8, %v1358_v21, %v1354_v34 }
 0x325   :  { %v3358_v62 = vmul.f32 %v3326_v26, %v2575_v16  ;;  %v3173_v47 = vmul.f32 %v8070_v25, %v3172_v50  ;;  %4589 = vpow2.f32 %v3911_v54  ;;  %v3422_v63 = vmul.f32 %v4578_v15, %v1359_v11 }
 0x326   :  { %4591 = vrcp.f32 %v8096_v3  ;;  %vm3175_vm12 = vweird.f32 %v8036_v58  ;;  %vm3176_vm5 = vweird.f32 %v8070_v25  ;;  %v3181_v28 = vand.u32 2147483648, %v8036_v58 }
 0x327   :  { %v3390_v17 = vadd.f32 %v3358_v62, %v3294_v19  ;;  %v3174_v23 = vadd.f32 %v8070_v25, %v3173_v47  ;;  %v3179_v5 = vand.u32 2147483647, %v8036_v58  ;;  %v1364_v45 = vmul.f32 %v7988_v8, %v1363_v33  ;;  %vm8109_vm6 = vmor %vm3175_vm12, %vm3176_vm5 }
 0x328   :  { %v766_v53 = vadd.f32 %v765_v30, %v5113_v35  ;;  %v3182_v22 = vor.u32 1.1754944e-38, %v3181_v28  ;;  %v1980_v61 = vand.u32 2147483648, %v8089_v37  ;;  %v1978_v35 = vand.u32 2147483647, %v8089_v37 }
 0x329   :  { %v3454_v42 = vadd.f32 %v3422_v63, %v3390_v17  ;;  %v3178_v58 = vsel %vm8109_vm6, %v8070_v25, %v3174_v23  ;;  %vm3180_vm4 = vcmp.eq.f32.partialorder %v3179_v5, 8.507059e+37  ;;  %v1365_v0 = vadd.f32 %v7988_v8, %v1364_v45 }
 0x32a   :  { %v4588_v57 = vpop.eup %4587  ;;  %vm1367_vm0 = vweird.f32 %v7988_v8  ;;  %v3183_v13 = vsel %vm3180_vm4, %v3182_v22, %v3178_v58  ;;  %vm1974_vm8 = vweird.f32 %v8089_v37  ;;  %v2588_v4 = vand.u32 2147483648, %v8096_v3 }
 0x32b   :  { %3486 = vst [vmem:[#allocation7 + $0x1e0] sm:$0xff] %v3454_v42  ;;  %4593 = vtanh.f32 %v3454_v42  ;;  %v1970_v48 = vmul.f32 %v4588_v57, %v8089_v37  ;;  %v4590_v38 = vpop.eup %4589  ;;  %vm1975_vm7 = vweird.f32 %v4588_v57  ;;  %v2586_v39 = vand.u32 2147483647, %v8096_v3 }
 0x32c   :  { %v4592_v12 = vpop.eup %4591  ;;  %v8115_v56 = vadd.f32 1.0, %v4590_v38  ;;  %vm8128_vm9 = vmor %vm1974_vm8, %vm1975_vm7  ;;  %v1981_v52 = vor.u32 1.1754944e-38, %v1980_v61  ;;  %vm1366_vm11 = vweird.f32 %v7932_v55  ;;  %v1372_v51 = vand.u32 2147483648, %v7932_v55 }
 0x32d   :  { %v1971_v9 = vsub.f32 1.0, %v1970_v48  ;;  %v2578_v60 = vmul.f32 %v4592_v12, %v8096_v3  ;;  %vm2583_vm10 = vweird.f32 %v4592_v12  ;;  %vm1979_vm15 = vcmp.eq.f32.partialorder %v1978_v35, 8.507059e+37  ;;  %vm8139_vm13 = vmor %vm1366_vm11, %vm1367_vm0 }
 0x32e   :  { %4595 = vrcp.f32 %v8115_v56  ;;  %v1370_v25 = vand.u32 2147483647, %v7932_v55  ;;  %vm2582_vm14 = vweird.f32 %v8096_v3  ;;  %v2589_v21 = vor.u32 1.1754944e-38, %v2588_v4 }
 0x32f   :  { %v1972_v31 = vmul.f32 %v4588_v57, %v1971_v9  ;;  %4597 = vtanh.f32 %v766_v53  ;;  %v2579_v15 = vsub.f32 1.0, %v2578_v60  ;;  %vm2584_vm2 = vmor %vm2582_vm14, %vm2583_vm10  ;;  %v1369_v27 = vsel %vm8139_vm13, %v7988_v8, %v1365_v0 }
 0x330   :  { %vm2587_vm1 = vcmp.eq.f32.partialorder %v2586_v39, 8.507059e+37  ;;  %v1373_v6 = vor.u32 1.1754944e-38, %v1372_v51  ;;  %vm1371_vm3 = vcmp.eq.f32.partialorder %v1370_v25, 8.507059e+37  ;;  %v3196_v8 = vand.u32 2147483648, %v8115_v56 }
 0x331   :  { %v4594_v46 = vpop.eup %4593  ;;  %v1973_v10 = vadd.f32 %v4588_v57, %v1972_v31  ;;  %v2580_v18 = vmul.f32 %v4592_v12, %v2579_v15  ;;  %vm3190_vm5 = vweird.f32 %v8115_v56  ;;  %v3194_v62 = vand.u32 2147483647, %v8115_v56 }
 0x332   :  { %v3550_v29 = vmul.f32 %v4594_v46, %v3183_v13  ;;  %v1374_v41 = vsel %vm1371_vm3, %v1373_v6, %v1369_v27  ;;  %v3197_v33 = vor.u32 1.1754944e-38, %v3196_v8 }
 0x333   :  { %v1977_v43 = vsel %vm8128_vm9, %v4588_v57, %v1973_v10  ;;  %v2581_v44 = vadd.f32 %v4592_v12, %v2580_v18  ;;  %vm3195_vm4 = vcmp.eq.f32.partialorder %v3194_v62, 8.507059e+37 }
 0x334   :  { %3582 = vst [vmem:[#allocation7 + $0x1e8] sm:$0xff] %v3550_v29  ;;  %v4596_v20 = vpop.eup %4595  ;;  %v1982_v7 = vsel %vm1979_vm15, %v1981_v52, %v1977_v43 }
 0x335   :  { %v4598_v14 = vpop.eup %4597  ;;  %v2585_v32 = vsel %vm2584_vm2, %v4592_v12, %v2581_v44  ;;  %v3186_v55 = vmul.f32 %v4596_v20, %v8115_v56  ;;  %v3295_v26 = vmul.f32 %v3263_v1, %v1982_v7  ;;  %vm3191_vm12 = vweird.f32 %v4596_v20 }
 0x336   :  { %v2590_v40 = vsel %vm2587_vm1, %v2589_v21, %v2585_v32  ;;  %v3423_v34 = vmul.f32 %v4598_v14, %v1374_v41  ;;  %vm3192_vm6 = vmor %vm3190_vm5, %vm3191_vm12 }
 0x337   :  { %v3359_v37 = vmul.f32 %v3327_v49, %v2590_v40  ;;  %v3187_v54 = vsub.f32 1.0, %v3186_v55 }
 0x339   :  { %v3391_v2 = vadd.f32 %v3359_v37, %v3295_v26  ;;  %v3188_v50 = vmul.f32 %v4596_v20, %v3187_v54 }
 0x33b   :  { %v3455_v16 = vadd.f32 %v3423_v34, %v3391_v2  ;;  %v3189_v19 = vadd.f32 %v4596_v20, %v3188_v50 }
 0x33d   :  { %3487 = vst [vmem:[#allocation7 + $0x1f0] sm:$0xff] %v3455_v16  ;;  %4599 = vtanh.f32 %v3455_v16  ;;  %v3193_v3 = vsel %vm3192_vm6, %v4596_v20, %v3189_v19 }
 0x33e   :  { %v3198_v47 = vsel %vm3195_vm4, %v3197_v33, %v3193_v3 }
 0x343   :  { %v4600_v11 = vpop.eup %4599 }
 0x344   :  { %v3551_v63 = vmul.f32 %v4600_v11, %v3198_v47 }
 0x346   :  { %3583 = vst [vmem:[#allocation7 + $0x1f8] sm:$0xff] %v3551_v63 }
 0x347   :  { %3596 = dma.vmem_to_hbm [thread:$0]  %s3589_s21, 8192, %s3591_s24, [#allocation4], %s4686_s25, %s4686_s25, %s4687_s26  }
 0x348   :  { %4677 = dma.done.wait [#allocation4], 8192  }
 0x349   :  { %4678 = vsyncadd [#allocation4], 4294959104 }
 0x34a   :  { %3601 = vsyncpa [#allocation3], 1 }
 0x34b   :  { %3602 = vsyncpa [#allocation6], 1 }
 0x34c   :  { %3603 = vsyncpa [#allocation4], 1 }

</bundles_post_ra>
